<compile_context>
chip_gen: v7x
topology: tpu7x:2x2x1
jax: 0.10.0
libtpu: 0.0.40
codegen_flags: <defaults>
</compile_context>

<pallas_src>
import jax
import jax.numpy as jnp
from jax.experimental import pallas as pl
from jax.experimental.pallas import tpu as pltpu


def _encoder_kernel(x_ref, u_t_ref, b_u_ref, b_ehs_ref, w_ehs_ref,
                    v_w_ref, w_lstm_ref, b_lstm_ref,
                    outw_ref, oute_ref):
    """Whole encoder forward in one invocation; recurrence fully unrolled."""
    B, Tm1, n = x_ref.shape
    H = w_ehs_ref.shape[0] // 2

    # ---- prologue: hoist every load / broadcast out of the unrolled loop ----
    x = x_ref[...]                        # [B, T-1, n]
    u_t = u_t_ref[...]                    # [T-1, T-1]   (U_e.weight^T)
    w_ehs = w_ehs_ref[...]                # [2H, T-1]    (W_ehs.weight^T)
    v_w3 = v_w_ref[...][None, :, :]       # [1, 1, T-1]
    w_lstm = w_lstm_ref[...]              # [n+H, 4H]    fused [W_ih^T ; W_hh^T]
    b_lstm = b_lstm_ref[...]              # [1, 4H]

    # Time-invariant attention term, computed ONCE in the kernel prologue:
    #   ue[b, i, s] = sum_t x[b, t, i] * u_t[t, s] + b_u[s] + b_ehs[s]
    # b_ehs is folded in here (it broadcasts identically over (b, n) every
    # step), so the per-step attention dot below needs no bias add.
    # Built as T-1 outer-product accumulations (pure VPU, no transpose needed).
    ue_bias = (b_u_ref[...] + b_ehs_ref[...])[None, :, :]          # [1, 1, T-1]
    ue = jnp.zeros((B, n, Tm1), jnp.float32) + ue_bias
    for t in range(Tm1):
        ue = ue + x[:, t, :][:, :, None] * u_t[t:t + 1, :][None, :, :]

    h = jnp.zeros((B, H), jnp.float32)
    c = jnp.zeros((B, H), jnp.float32)
    xw_steps = []
    hs_steps = []

    # Static Python loop == fully unrolled (T-1 = 8); every slice index below
    # is a compile-time constant.
    for t in range(Tm1):
        # ---------------- input attention ----------------
        # Single fused [B, 2H] @ [2H, T-1] dot on the lane-concatenated [h | c]
        # (one MXU push per step instead of two on the serial chain).
        hc = jnp.concatenate([h, c], axis=1)                          # [B, 2H]
        we = jnp.dot(hc, w_ehs, preferred_element_type=jnp.float32)   # [B, T-1]
        z = jnp.tanh(we[:, None, :] + ue)                             # [B, n, T-1]
        v = jnp.sum(z * v_w3, axis=-1)                                # [B, n]
        # (v_e bias dropped: softmax is shift-invariant, so it never affects a.)

        # softmax over the feature axis (reciprocal pushed to the EUP slot)
        m = jnp.max(v, axis=1, keepdims=True)
        e = jnp.exp(v - m)
        a = e * pl.reciprocal(jnp.sum(e, axis=1, keepdims=True), approx=True)

        x_hat = a * x[:, t, :]                                        # [B, n]

        # ---------------- LSTM cell (torch gate order i, f, g, o) ----------
        xh = jnp.concatenate([x_hat, h], axis=1)                      # [B, n+H]
        gates = (jnp.dot(xh, w_lstm, preferred_element_type=jnp.float32)
                 + b_lstm)                                            # [B, 4H]
        i_g = jax.nn.sigmoid(gates[:, 0:H])
        f_g = jax.nn.sigmoid(gates[:, H:2 * H])
        g_g = jnp.tanh(gates[:, 2 * H:3 * H])
        o_g = jax.nn.sigmoid(gates[:, 3 * H:4 * H])
        c = f_g * c + i_g * g_g
        h = o_g * jnp.tanh(c)

        xw_steps.append(x_hat)
        hs_steps.append(h)

    # Two bulk stores (one contiguous writeback per output) instead of 16
    # per-step masked partial stores.
    outw_ref[...] = jnp.stack(xw_steps, axis=1)                       # [B, T-1, n]
    oute_ref[...] = jnp.stack(hs_steps, axis=1)                       # [B, T-1, H]


def encoder_forward(x, params):
    """x: [B, T-1, input_size] float32.  Returns (input_weighted, input_encoded)."""
    B, Tm1, n = x.shape
    H = params["w_ehs_t"].shape[0] // 2

    vmem = pl.BlockSpec(memory_space=pltpu.MemorySpace.VMEM)

    out_w, out_e = pl.pallas_call(
        _encoder_kernel,
        out_shape=(
            jax.ShapeDtypeStruct((B, Tm1, n), jnp.float32),
            jax.ShapeDtypeStruct((B, Tm1, H), jnp.float32),
        ),
        in_specs=[
            vmem,   # x        [B, T-1, n]
            vmem,   # u_t      [T-1, T-1]
            vmem,   # b_u      [1, T-1]
            vmem,   # b_ehs    [1, T-1]
            vmem,   # w_ehs_t  [2H, T-1]
            vmem,   # v_w      [1, T-1]
            vmem,   # w_lstm   [n+H, 4H]
            vmem,   # b_lstm   [1, 4H]
        ],
        out_specs=(vmem, vmem),
    )(x, params["u_t"], params["b_u"], params["b_ehs"], params["w_ehs_t"],
      params["v_w"], params["w_lstm"], params["b_lstm"])

    return out_w, out_e


def init_params(key, input_size, hidden_size, t):
    """Deterministic parameter init (PyTorch-style uniform(-1/sqrt(fan), 1/sqrt(fan)))."""
    tm1 = t - 1
    H = hidden_size
    n = input_size
    keys = jax.random.split(key, 10)

    def u(k, shape, fan):
        b = float(fan) ** -0.5
        return jax.random.uniform(k, shape, jnp.float32, -b, b)

    # nn.Linear weights are stored [out, in]; we keep transposed [in, out] tiles.
    w_ehs = u(keys[0], (tm1, 2 * H), 2 * H)          # W_ehs.weight
    b_ehs = u(keys[1], (1, tm1), 2 * H)
    u_e = u(keys[2], (tm1, tm1), tm1)                # U_e.weight
    b_u = u(keys[3], (1, tm1), tm1)
    v_w = u(keys[4], (1, tm1), tm1)                  # v_e.weight (already [1, T-1])
    v_b = u(keys[5], (1, 1), tm1)                    # v_e.bias (inert under softmax)
    w_ih = u(keys[6], (4 * H, n), H)                 # LSTM weight_ih_l0
    w_hh = u(keys[7], (4 * H, H), H)                 # LSTM weight_hh_l0
    b_ih = u(keys[8], (4 * H,), H)
    b_hh = u(keys[9], (4 * H,), H)

    return {
        "w_ehs_t": jnp.transpose(w_ehs),             # [2H, T-1]  (rows: h then c)
        "b_ehs": b_ehs,                              # [1, T-1]
        "u_t": jnp.transpose(u_e),                   # [T-1, T-1]
        "b_u": b_u,                                  # [1, T-1]
        "v_w": v_w,                                  # [1, T-1]
        "v_b": v_b,                                  # [1, 1]  (reference only)
        # fused LSTM weights: [x_hat, h] @ w_lstm == x_hat @ W_ih^T + h @ W_hh^T
        "w_lstm": jnp.concatenate(
            [jnp.transpose(w_ih), jnp.transpose(w_hh)], axis=0),   # [n+H, 4H]
        "b_lstm": (b_ih + b_hh)[None, :],            # [1, 4H]
    }


def encoder_reference(x, params):
    """Pure-JAX reference mirroring the PyTorch forward, for correctness checking."""
    B, Tm1, n = x.shape
    H = params["w_ehs_t"].shape[0] // 2
    wih_t = params["w_lstm"][:n]                                         # [n, 4H]
    whh_t = params["w_lstm"][n:]                                         # [H, 4H]
    h = jnp.zeros((B, H), jnp.float32)
    c = jnp.zeros((B, H), jnp.float32)
    x_flat = jnp.transpose(x, (0, 2, 1)).reshape(B * n, Tm1)
    ue = (x_flat @ params["u_t"] + params["b_u"]).reshape(B, n, Tm1)
    outw, oute = [], []
    for t in range(Tm1):
        hc = jnp.concatenate([h, c], axis=1)
        we = hc @ params["w_ehs_t"] + params["b_ehs"]
        z = jnp.tanh(we[:, None, :] + ue)
        v = jnp.sum(z * params["v_w"][None, :, :], axis=-1) + params["v_b"]
        a = jax.nn.softmax(v, axis=1)
        x_hat = a * x[:, t, :]
        gates = x_hat @ wih_t + h @ whh_t + params["b_lstm"]
        i = jax.nn.sigmoid(gates[:, :H])
        f = jax.nn.sigmoid(gates[:, H:2 * H])
        g = jnp.tanh(gates[:, 2 * H:3 * H])
        o = jax.nn.sigmoid(gates[:, 3 * H:])
        c = f * c + i * g
        h = o * jnp.tanh(c)
        outw.append(x_hat)
        oute.append(h)
    return jnp.stack(outw, axis=1), jnp.stack(oute, axis=1)


if __name__ == "__main__":
    # small shapes consistent with the module: batch=4, input_size=8, hidden=32, T=9
    B, INPUT_SIZE, HIDDEN_SIZE, T = 4, 8, 32, 9

    key = jax.random.PRNGKey(0)
    k_x, k_p = jax.random.split(key)
    x = jax.random.normal(k_x, (B, T - 1, INPUT_SIZE), jnp.float32)
    params = init_params(k_p, INPUT_SIZE, HIDDEN_SIZE, T)

    iw, ie = jax.block_until_ready(jax.jit(encoder_forward)(x, params))

    iw_ref, ie_ref = encoder_reference(x, params)
    assert iw.shape == (B, T - 1, INPUT_SIZE) and ie.shape == (B, T - 1, HIDDEN_SIZE)
    # 1e-3 tolerance accommodates the EUP approx-reciprocal softmax normalization.
    assert jnp.allclose(iw, iw_ref, rtol=1e-3, atol=1e-3), "input_weighted mismatch"
    assert jnp.allclose(ie, ie_ref, rtol=1e-3, atol=1e-3), "input_encoded mismatch"

    print("KERNEL_OK")
</pallas_src>

<mosaic_0001>
module attributes {stable_mosaic.version = 11 : i64} {
  func.func @_encoder_kernel(%arg0: memref<4x8x8xf32, #tpu.memory_space<vmem>>, %arg1: memref<8x8xf32, #tpu.memory_space<vmem>>, %arg2: memref<1x8xf32, #tpu.memory_space<vmem>>, %arg3: memref<1x8xf32, #tpu.memory_space<vmem>>, %arg4: memref<64x8xf32, #tpu.memory_space<vmem>>, %arg5: memref<1x8xf32, #tpu.memory_space<vmem>>, %arg6: memref<40x128xf32, #tpu.memory_space<vmem>>, %arg7: memref<1x128xf32, #tpu.memory_space<vmem>>, %arg8: memref<4x8x8xf32, #tpu.memory_space<vmem>>, %arg9: memref<4x8x32xf32, #tpu.memory_space<vmem>>) attributes {dimension_semantics = [], scalar_prefetch = 0 : i64, scratch_operands = 0 : i64, tpu.core_type = #tpu.core_type<tc>} {
    %c0 = arith.constant 0 : index
    %c0_0 = arith.constant 0 : index
    %c0_1 = arith.constant 0 : index
    %0 = vector.load %arg0[%c0, %c0_0, %c0_1] : memref<4x8x8xf32, #tpu.memory_space<vmem>>, vector<4x8x8xf32>
    %c0_2 = arith.constant 0 : index
    %c0_3 = arith.constant 0 : index
    %1 = vector.load %arg1[%c0_2, %c0_3] : memref<8x8xf32, #tpu.memory_space<vmem>>, vector<8x8xf32>
    %c0_4 = arith.constant 0 : index
    %c0_5 = arith.constant 0 : index
    %2 = vector.load %arg4[%c0_4, %c0_5] : memref<64x8xf32, #tpu.memory_space<vmem>>, vector<64x8xf32>
    %c0_6 = arith.constant 0 : index
    %c0_7 = arith.constant 0 : index
    %3 = vector.load %arg5[%c0_6, %c0_7] : memref<1x8xf32, #tpu.memory_space<vmem>>, vector<1x8xf32>
    %4 = vector.shape_cast %3 : vector<1x8xf32> to vector<1x1x8xf32>
    %c0_8 = arith.constant 0 : index
    %c0_9 = arith.constant 0 : index
    %5 = vector.load %arg6[%c0_8, %c0_9] : memref<40x128xf32, #tpu.memory_space<vmem>>, vector<40x128xf32>
    %c0_10 = arith.constant 0 : index
    %c0_11 = arith.constant 0 : index
    %6 = vector.load %arg7[%c0_10, %c0_11] : memref<1x128xf32, #tpu.memory_space<vmem>>, vector<1x128xf32>
    %c0_12 = arith.constant 0 : index
    %c0_13 = arith.constant 0 : index
    %7 = vector.load %arg2[%c0_12, %c0_13] : memref<1x8xf32, #tpu.memory_space<vmem>>, vector<1x8xf32>
    %c0_14 = arith.constant 0 : index
    %c0_15 = arith.constant 0 : index
    %8 = vector.load %arg3[%c0_14, %c0_15] : memref<1x8xf32, #tpu.memory_space<vmem>>, vector<1x8xf32>
    %9 = arith.addf %7, %8 : vector<1x8xf32>
    %10 = vector.shape_cast %9 : vector<1x8xf32> to vector<1x1x8xf32>
    %cst = arith.constant 0.000000e+00 : f32
    %11 = vector.broadcast %cst : f32 to vector<4x8x8xf32>
    %12 = vector.broadcast %10 : vector<1x1x8xf32> to vector<4x8x8xf32>
    %13 = arith.addf %11, %12 : vector<4x8x8xf32>
    %14 = vector.extract_strided_slice %0 {offsets = [0, 0, 0], sizes = [4, 1, 8], strides = [1, 1, 1]} : vector<4x8x8xf32> to vector<4x1x8xf32>
    %15 = vector.shape_cast %14 : vector<4x1x8xf32> to vector<4x8xf32>
    %16 = vector.shape_cast %15 : vector<4x8xf32> to vector<4x8x1xf32>
    %17 = vector.extract_strided_slice %1 {offsets = [0, 0], sizes = [1, 8], strides = [1, 1]} : vector<8x8xf32> to vector<1x8xf32>
    %18 = vector.shape_cast %17 : vector<1x8xf32> to vector<1x1x8xf32>
    %19 = vector.broadcast %16 : vector<4x8x1xf32> to vector<4x8x8xf32>
    %20 = vector.broadcast %18 : vector<1x1x8xf32> to vector<4x8x8xf32>
    %21 = arith.mulf %19, %20 : vector<4x8x8xf32>
    %22 = arith.addf %13, %21 : vector<4x8x8xf32>
    %23 = vector.extract_strided_slice %0 {offsets = [0, 1, 0], sizes = [4, 1, 8], strides = [1, 1, 1]} : vector<4x8x8xf32> to vector<4x1x8xf32>
    %24 = vector.shape_cast %23 : vector<4x1x8xf32> to vector<4x8xf32>
    %25 = vector.shape_cast %24 : vector<4x8xf32> to vector<4x8x1xf32>
    %26 = vector.extract_strided_slice %1 {offsets = [1, 0], sizes = [1, 8], strides = [1, 1]} : vector<8x8xf32> to vector<1x8xf32>
    %27 = vector.shape_cast %26 : vector<1x8xf32> to vector<1x1x8xf32>
    %28 = vector.broadcast %25 : vector<4x8x1xf32> to vector<4x8x8xf32>
    %29 = vector.broadcast %27 : vector<1x1x8xf32> to vector<4x8x8xf32>
    %30 = arith.mulf %28, %29 : vector<4x8x8xf32>
    %31 = arith.addf %22, %30 : vector<4x8x8xf32>
    %32 = vector.extract_strided_slice %0 {offsets = [0, 2, 0], sizes = [4, 1, 8], strides = [1, 1, 1]} : vector<4x8x8xf32> to vector<4x1x8xf32>
    %33 = vector.shape_cast %32 : vector<4x1x8xf32> to vector<4x8xf32>
    %34 = vector.shape_cast %33 : vector<4x8xf32> to vector<4x8x1xf32>
    %35 = vector.extract_strided_slice %1 {offsets = [2, 0], sizes = [1, 8], strides = [1, 1]} : vector<8x8xf32> to vector<1x8xf32>
    %36 = vector.shape_cast %35 : vector<1x8xf32> to vector<1x1x8xf32>
    %37 = vector.broadcast %34 : vector<4x8x1xf32> to vector<4x8x8xf32>
    %38 = vector.broadcast %36 : vector<1x1x8xf32> to vector<4x8x8xf32>
    %39 = arith.mulf %37, %38 : vector<4x8x8xf32>
    %40 = arith.addf %31, %39 : vector<4x8x8xf32>
    %41 = vector.extract_strided_slice %0 {offsets = [0, 3, 0], sizes = [4, 1, 8], strides = [1, 1, 1]} : vector<4x8x8xf32> to vector<4x1x8xf32>
    %42 = vector.shape_cast %41 : vector<4x1x8xf32> to vector<4x8xf32>
    %43 = vector.shape_cast %42 : vector<4x8xf32> to vector<4x8x1xf32>
    %44 = vector.extract_strided_slice %1 {offsets = [3, 0], sizes = [1, 8], strides = [1, 1]} : vector<8x8xf32> to vector<1x8xf32>
    %45 = vector.shape_cast %44 : vector<1x8xf32> to vector<1x1x8xf32>
    %46 = vector.broadcast %43 : vector<4x8x1xf32> to vector<4x8x8xf32>
    %47 = vector.broadcast %45 : vector<1x1x8xf32> to vector<4x8x8xf32>
    %48 = arith.mulf %46, %47 : vector<4x8x8xf32>
    %49 = arith.addf %40, %48 : vector<4x8x8xf32>
    %50 = vector.extract_strided_slice %0 {offsets = [0, 4, 0], sizes = [4, 1, 8], strides = [1, 1, 1]} : vector<4x8x8xf32> to vector<4x1x8xf32>
    %51 = vector.shape_cast %50 : vector<4x1x8xf32> to vector<4x8xf32>
    %52 = vector.shape_cast %51 : vector<4x8xf32> to vector<4x8x1xf32>
    %53 = vector.extract_strided_slice %1 {offsets = [4, 0], sizes = [1, 8], strides = [1, 1]} : vector<8x8xf32> to vector<1x8xf32>
    %54 = vector.shape_cast %53 : vector<1x8xf32> to vector<1x1x8xf32>
    %55 = vector.broadcast %52 : vector<4x8x1xf32> to vector<4x8x8xf32>
    %56 = vector.broadcast %54 : vector<1x1x8xf32> to vector<4x8x8xf32>
    %57 = arith.mulf %55, %56 : vector<4x8x8xf32>
    %58 = arith.addf %49, %57 : vector<4x8x8xf32>
    %59 = vector.extract_strided_slice %0 {offsets = [0, 5, 0], sizes = [4, 1, 8], strides = [1, 1, 1]} : vector<4x8x8xf32> to vector<4x1x8xf32>
    %60 = vector.shape_cast %59 : vector<4x1x8xf32> to vector<4x8xf32>
    %61 = vector.shape_cast %60 : vector<4x8xf32> to vector<4x8x1xf32>
    %62 = vector.extract_strided_slice %1 {offsets = [5, 0], sizes = [1, 8], strides = [1, 1]} : vector<8x8xf32> to vector<1x8xf32>
    %63 = vector.shape_cast %62 : vector<1x8xf32> to vector<1x1x8xf32>
    %64 = vector.broadcast %61 : vector<4x8x1xf32> to vector<4x8x8xf32>
    %65 = vector.broadcast %63 : vector<1x1x8xf32> to vector<4x8x8xf32>
    %66 = arith.mulf %64, %65 : vector<4x8x8xf32>
    %67 = arith.addf %58, %66 : vector<4x8x8xf32>
    %68 = vector.extract_strided_slice %0 {offsets = [0, 6, 0], sizes = [4, 1, 8], strides = [1, 1, 1]} : vector<4x8x8xf32> to vector<4x1x8xf32>
    %69 = vector.shape_cast %68 : vector<4x1x8xf32> to vector<4x8xf32>
    %70 = vector.shape_cast %69 : vector<4x8xf32> to vector<4x8x1xf32>
    %71 = vector.extract_strided_slice %1 {offsets = [6, 0], sizes = [1, 8], strides = [1, 1]} : vector<8x8xf32> to vector<1x8xf32>
    %72 = vector.shape_cast %71 : vector<1x8xf32> to vector<1x1x8xf32>
    %73 = vector.broadcast %70 : vector<4x8x1xf32> to vector<4x8x8xf32>
    %74 = vector.broadcast %72 : vector<1x1x8xf32> to vector<4x8x8xf32>
    %75 = arith.mulf %73, %74 : vector<4x8x8xf32>
    %76 = arith.addf %67, %75 : vector<4x8x8xf32>
    %77 = vector.extract_strided_slice %0 {offsets = [0, 7, 0], sizes = [4, 1, 8], strides = [1, 1, 1]} : vector<4x8x8xf32> to vector<4x1x8xf32>
    %78 = vector.shape_cast %77 : vector<4x1x8xf32> to vector<4x8xf32>
    %79 = vector.shape_cast %78 : vector<4x8xf32> to vector<4x8x1xf32>
    %80 = vector.extract_strided_slice %1 {offsets = [7, 0], sizes = [1, 8], strides = [1, 1]} : vector<8x8xf32> to vector<1x8xf32>
    %81 = vector.shape_cast %80 : vector<1x8xf32> to vector<1x1x8xf32>
    %82 = vector.broadcast %79 : vector<4x8x1xf32> to vector<4x8x8xf32>
    %83 = vector.broadcast %81 : vector<1x1x8xf32> to vector<4x8x8xf32>
    %84 = arith.mulf %82, %83 : vector<4x8x8xf32>
    %85 = arith.addf %76, %84 : vector<4x8x8xf32>
    %cst_16 = arith.constant 0.000000e+00 : f32
    %86 = vector.broadcast %cst_16 : f32 to vector<4x32xf32>
    %cst_17 = arith.constant 0.000000e+00 : f32
    %87 = vector.broadcast %cst_17 : f32 to vector<4x32xf32>
    %88 = tpu.concatenate %86, %87 in 1 : vector<4x32xf32>, vector<4x32xf32> -> vector<4x64xf32>
    %cst_18 = arith.constant dense<0.000000e+00> : vector<4x8xf32>
    %89 = tpu.matmul %88, %2, %cst_18 {dimension_numbers = #tpu.dot_dimension_numbers<[1], [0], [0], [1], [0, 0, 1, 1], [], []>} : vector<4x64xf32>, vector<64x8xf32>, vector<4x8xf32> -> vector<4x8xf32>
    %90 = vector.shape_cast %89 : vector<4x8xf32> to vector<4x1x8xf32>
    %91 = vector.broadcast %90 : vector<4x1x8xf32> to vector<4x8x8xf32>
    %92 = arith.addf %91, %85 : vector<4x8x8xf32>
    %93 = math.tanh %92 : vector<4x8x8xf32>
    %94 = vector.broadcast %4 : vector<1x1x8xf32> to vector<4x8x8xf32>
    %95 = arith.mulf %93, %94 : vector<4x8x8xf32>
    %cst_19 = arith.constant dense<0.000000e+00> : vector<4x8xf32>
    %96 = vector.multi_reduction <add>, %95, %cst_19 [2] : vector<4x8x8xf32> to vector<4x8xf32>
    %cst_20 = arith.constant dense<0xFF800000> : vector<4xf32>
    %97 = vector.multi_reduction <maximumf>, %96, %cst_20 [1] : vector<4x8xf32> to vector<4xf32>
    %98 = vector.shape_cast %97 : vector<4xf32> to vector<4x1xf32>
    %99 = vector.broadcast %98 : vector<4x1xf32> to vector<4x8xf32>
    %100 = arith.subf %96, %99 : vector<4x8xf32>
    %101 = math.exp %100 : vector<4x8xf32>
    %cst_21 = arith.constant dense<0.000000e+00> : vector<4xf32>
    %102 = vector.multi_reduction <add>, %101, %cst_21 [1] : vector<4x8xf32> to vector<4xf32>
    %103 = vector.shape_cast %102 : vector<4xf32> to vector<4x1xf32>
    %104 = tpu.reciprocal %103 {approx = true} : vector<4x1xf32> -> vector<4x1xf32>
    %105 = vector.broadcast %104 : vector<4x1xf32> to vector<4x8xf32>
    %106 = arith.mulf %101, %105 : vector<4x8xf32>
    %107 = vector.extract_strided_slice %0 {offsets = [0, 0, 0], sizes = [4, 1, 8], strides = [1, 1, 1]} : vector<4x8x8xf32> to vector<4x1x8xf32>
    %108 = vector.shape_cast %107 : vector<4x1x8xf32> to vector<4x8xf32>
    %109 = arith.mulf %106, %108 : vector<4x8xf32>
    %110 = tpu.concatenate %109, %86 in 1 : vector<4x8xf32>, vector<4x32xf32> -> vector<4x40xf32>
    %cst_22 = arith.constant dense<0.000000e+00> : vector<4x128xf32>
    %111 = tpu.matmul %110, %5, %cst_22 {dimension_numbers = #tpu.dot_dimension_numbers<[1], [0], [0], [1], [0, 0, 1, 1], [], []>} : vector<4x40xf32>, vector<40x128xf32>, vector<4x128xf32> -> vector<4x128xf32>
    %112 = vector.broadcast %6 : vector<1x128xf32> to vector<4x128xf32>
    %113 = arith.addf %111, %112 : vector<4x128xf32>
    %114 = vector.extract_strided_slice %113 {offsets = [0, 0], sizes = [4, 32], strides = [1, 1]} : vector<4x128xf32> to vector<4x32xf32>
    %115 = arith.negf %114 : vector<4x32xf32>
    %116 = math.exp %115 : vector<4x32xf32>
    %cst_23 = arith.constant 1.000000e+00 : f32
    %117 = vector.broadcast %cst_23 : f32 to vector<4x32xf32>
    %118 = arith.addf %117, %116 : vector<4x32xf32>
    %119 = arith.divf %117, %118 : vector<4x32xf32>
    %120 = vector.extract_strided_slice %113 {offsets = [0, 32], sizes = [4, 32], strides = [1, 1]} : vector<4x128xf32> to vector<4x32xf32>
    %121 = arith.negf %120 : vector<4x32xf32>
    %122 = math.exp %121 : vector<4x32xf32>
    %cst_24 = arith.constant 1.000000e+00 : f32
    %123 = vector.broadcast %cst_24 : f32 to vector<4x32xf32>
    %124 = arith.addf %123, %122 : vector<4x32xf32>
    %125 = arith.divf %123, %124 : vector<4x32xf32>
    %126 = vector.extract_strided_slice %113 {offsets = [0, 64], sizes = [4, 32], strides = [1, 1]} : vector<4x128xf32> to vector<4x32xf32>
    %127 = math.tanh %126 : vector<4x32xf32>
    %128 = vector.extract_strided_slice %113 {offsets = [0, 96], sizes = [4, 32], strides = [1, 1]} : vector<4x128xf32> to vector<4x32xf32>
    %129 = arith.negf %128 : vector<4x32xf32>
    %130 = math.exp %129 : vector<4x32xf32>
    %cst_25 = arith.constant 1.000000e+00 : f32
    %131 = vector.broadcast %cst_25 : f32 to vector<4x32xf32>
    %132 = arith.addf %131, %130 : vector<4x32xf32>
    %133 = arith.divf %131, %132 : vector<4x32xf32>
    %134 = arith.mulf %125, %87 : vector<4x32xf32>
    %135 = arith.mulf %119, %127 : vector<4x32xf32>
    %136 = arith.addf %134, %135 : vector<4x32xf32>
    %137 = math.tanh %136 : vector<4x32xf32>
    %138 = arith.mulf %133, %137 : vector<4x32xf32>
    %139 = tpu.concatenate %138, %136 in 1 : vector<4x32xf32>, vector<4x32xf32> -> vector<4x64xf32>
    %cst_26 = arith.constant dense<0.000000e+00> : vector<4x8xf32>
    %140 = tpu.matmul %139, %2, %cst_26 {dimension_numbers = #tpu.dot_dimension_numbers<[1], [0], [0], [1], [0, 0, 1, 1], [], []>} : vector<4x64xf32>, vector<64x8xf32>, vector<4x8xf32> -> vector<4x8xf32>
    %141 = vector.shape_cast %140 : vector<4x8xf32> to vector<4x1x8xf32>
    %142 = vector.broadcast %141 : vector<4x1x8xf32> to vector<4x8x8xf32>
    %143 = arith.addf %142, %85 : vector<4x8x8xf32>
    %144 = math.tanh %143 : vector<4x8x8xf32>
    %145 = vector.broadcast %4 : vector<1x1x8xf32> to vector<4x8x8xf32>
    %146 = arith.mulf %144, %145 : vector<4x8x8xf32>
    %cst_27 = arith.constant dense<0.000000e+00> : vector<4x8xf32>
    %147 = vector.multi_reduction <add>, %146, %cst_27 [2] : vector<4x8x8xf32> to vector<4x8xf32>
    %cst_28 = arith.constant dense<0xFF800000> : vector<4xf32>
    %148 = vector.multi_reduction <maximumf>, %147, %cst_28 [1] : vector<4x8xf32> to vector<4xf32>
    %149 = vector.shape_cast %148 : vector<4xf32> to vector<4x1xf32>
    %150 = vector.broadcast %149 : vector<4x1xf32> to vector<4x8xf32>
    %151 = arith.subf %147, %150 : vector<4x8xf32>
    %152 = math.exp %151 : vector<4x8xf32>
    %cst_29 = arith.constant dense<0.000000e+00> : vector<4xf32>
    %153 = vector.multi_reduction <add>, %152, %cst_29 [1] : vector<4x8xf32> to vector<4xf32>
    %154 = vector.shape_cast %153 : vector<4xf32> to vector<4x1xf32>
    %155 = tpu.reciprocal %154 {approx = true} : vector<4x1xf32> -> vector<4x1xf32>
    %156 = vector.broadcast %155 : vector<4x1xf32> to vector<4x8xf32>
    %157 = arith.mulf %152, %156 : vector<4x8xf32>
    %158 = vector.extract_strided_slice %0 {offsets = [0, 1, 0], sizes = [4, 1, 8], strides = [1, 1, 1]} : vector<4x8x8xf32> to vector<4x1x8xf32>
    %159 = vector.shape_cast %158 : vector<4x1x8xf32> to vector<4x8xf32>
    %160 = arith.mulf %157, %159 : vector<4x8xf32>
    %161 = tpu.concatenate %160, %138 in 1 : vector<4x8xf32>, vector<4x32xf32> -> vector<4x40xf32>
    %cst_30 = arith.constant dense<0.000000e+00> : vector<4x128xf32>
    %162 = tpu.matmul %161, %5, %cst_30 {dimension_numbers = #tpu.dot_dimension_numbers<[1], [0], [0], [1], [0, 0, 1, 1], [], []>} : vector<4x40xf32>, vector<40x128xf32>, vector<4x128xf32> -> vector<4x128xf32>
    %163 = vector.broadcast %6 : vector<1x128xf32> to vector<4x128xf32>
    %164 = arith.addf %162, %163 : vector<4x128xf32>
    %165 = vector.extract_strided_slice %164 {offsets = [0, 0], sizes = [4, 32], strides = [1, 1]} : vector<4x128xf32> to vector<4x32xf32>
    %166 = arith.negf %165 : vector<4x32xf32>
    %167 = math.exp %166 : vector<4x32xf32>
    %cst_31 = arith.constant 1.000000e+00 : f32
    %168 = vector.broadcast %cst_31 : f32 to vector<4x32xf32>
    %169 = arith.addf %168, %167 : vector<4x32xf32>
    %170 = arith.divf %168, %169 : vector<4x32xf32>
    %171 = vector.extract_strided_slice %164 {offsets = [0, 32], sizes = [4, 32], strides = [1, 1]} : vector<4x128xf32> to vector<4x32xf32>
    %172 = arith.negf %171 : vector<4x32xf32>
    %173 = math.exp %172 : vector<4x32xf32>
    %cst_32 = arith.constant 1.000000e+00 : f32
    %174 = vector.broadcast %cst_32 : f32 to vector<4x32xf32>
    %175 = arith.addf %174, %173 : vector<4x32xf32>
    %176 = arith.divf %174, %175 : vector<4x32xf32>
    %177 = vector.extract_strided_slice %164 {offsets = [0, 64], sizes = [4, 32], strides = [1, 1]} : vector<4x128xf32> to vector<4x32xf32>
    %178 = math.tanh %177 : vector<4x32xf32>
    %179 = vector.extract_strided_slice %164 {offsets = [0, 96], sizes = [4, 32], strides = [1, 1]} : vector<4x128xf32> to vector<4x32xf32>
    %180 = arith.negf %179 : vector<4x32xf32>
    %181 = math.exp %180 : vector<4x32xf32>
    %cst_33 = arith.constant 1.000000e+00 : f32
    %182 = vector.broadcast %cst_33 : f32 to vector<4x32xf32>
    %183 = arith.addf %182, %181 : vector<4x32xf32>
    %184 = arith.divf %182, %183 : vector<4x32xf32>
    %185 = arith.mulf %176, %136 : vector<4x32xf32>
    %186 = arith.mulf %170, %178 : vector<4x32xf32>
    %187 = arith.addf %185, %186 : vector<4x32xf32>
    %188 = math.tanh %187 : vector<4x32xf32>
    %189 = arith.mulf %184, %188 : vector<4x32xf32>
    %190 = tpu.concatenate %189, %187 in 1 : vector<4x32xf32>, vector<4x32xf32> -> vector<4x64xf32>
    %cst_34 = arith.constant dense<0.000000e+00> : vector<4x8xf32>
    %191 = tpu.matmul %190, %2, %cst_34 {dimension_numbers = #tpu.dot_dimension_numbers<[1], [0], [0], [1], [0, 0, 1, 1], [], []>} : vector<4x64xf32>, vector<64x8xf32>, vector<4x8xf32> -> vector<4x8xf32>
    %192 = vector.shape_cast %191 : vector<4x8xf32> to vector<4x1x8xf32>
    %193 = vector.broadcast %192 : vector<4x1x8xf32> to vector<4x8x8xf32>
    %194 = arith.addf %193, %85 : vector<4x8x8xf32>
    %195 = math.tanh %194 : vector<4x8x8xf32>
    %196 = vector.broadcast %4 : vector<1x1x8xf32> to vector<4x8x8xf32>
    %197 = arith.mulf %195, %196 : vector<4x8x8xf32>
    %cst_35 = arith.constant dense<0.000000e+00> : vector<4x8xf32>
    %198 = vector.multi_reduction <add>, %197, %cst_35 [2] : vector<4x8x8xf32> to vector<4x8xf32>
    %cst_36 = arith.constant dense<0xFF800000> : vector<4xf32>
    %199 = vector.multi_reduction <maximumf>, %198, %cst_36 [1] : vector<4x8xf32> to vector<4xf32>
    %200 = vector.shape_cast %199 : vector<4xf32> to vector<4x1xf32>
    %201 = vector.broadcast %200 : vector<4x1xf32> to vector<4x8xf32>
    %202 = arith.subf %198, %201 : vector<4x8xf32>
    %203 = math.exp %202 : vector<4x8xf32>
    %cst_37 = arith.constant dense<0.000000e+00> : vector<4xf32>
    %204 = vector.multi_reduction <add>, %203, %cst_37 [1] : vector<4x8xf32> to vector<4xf32>
    %205 = vector.shape_cast %204 : vector<4xf32> to vector<4x1xf32>
    %206 = tpu.reciprocal %205 {approx = true} : vector<4x1xf32> -> vector<4x1xf32>
    %207 = vector.broadcast %206 : vector<4x1xf32> to vector<4x8xf32>
    %208 = arith.mulf %203, %207 : vector<4x8xf32>
    %209 = vector.extract_strided_slice %0 {offsets = [0, 2, 0], sizes = [4, 1, 8], strides = [1, 1, 1]} : vector<4x8x8xf32> to vector<4x1x8xf32>
    %210 = vector.shape_cast %209 : vector<4x1x8xf32> to vector<4x8xf32>
    %211 = arith.mulf %208, %210 : vector<4x8xf32>
    %212 = tpu.concatenate %211, %189 in 1 : vector<4x8xf32>, vector<4x32xf32> -> vector<4x40xf32>
    %cst_38 = arith.constant dense<0.000000e+00> : vector<4x128xf32>
    %213 = tpu.matmul %212, %5, %cst_38 {dimension_numbers = #tpu.dot_dimension_numbers<[1], [0], [0], [1], [0, 0, 1, 1], [], []>} : vector<4x40xf32>, vector<40x128xf32>, vector<4x128xf32> -> vector<4x128xf32>
    %214 = vector.broadcast %6 : vector<1x128xf32> to vector<4x128xf32>
    %215 = arith.addf %213, %214 : vector<4x128xf32>
    %216 = vector.extract_strided_slice %215 {offsets = [0, 0], sizes = [4, 32], strides = [1, 1]} : vector<4x128xf32> to vector<4x32xf32>
    %217 = arith.negf %216 : vector<4x32xf32>
    %218 = math.exp %217 : vector<4x32xf32>
    %cst_39 = arith.constant 1.000000e+00 : f32
    %219 = vector.broadcast %cst_39 : f32 to vector<4x32xf32>
    %220 = arith.addf %219, %218 : vector<4x32xf32>
    %221 = arith.divf %219, %220 : vector<4x32xf32>
    %222 = vector.extract_strided_slice %215 {offsets = [0, 32], sizes = [4, 32], strides = [1, 1]} : vector<4x128xf32> to vector<4x32xf32>
    %223 = arith.negf %222 : vector<4x32xf32>
    %224 = math.exp %223 : vector<4x32xf32>
    %cst_40 = arith.constant 1.000000e+00 : f32
    %225 = vector.broadcast %cst_40 : f32 to vector<4x32xf32>
    %226 = arith.addf %225, %224 : vector<4x32xf32>
    %227 = arith.divf %225, %226 : vector<4x32xf32>
    %228 = vector.extract_strided_slice %215 {offsets = [0, 64], sizes = [4, 32], strides = [1, 1]} : vector<4x128xf32> to vector<4x32xf32>
    %229 = math.tanh %228 : vector<4x32xf32>
    %230 = vector.extract_strided_slice %215 {offsets = [0, 96], sizes = [4, 32], strides = [1, 1]} : vector<4x128xf32> to vector<4x32xf32>
    %231 = arith.negf %230 : vector<4x32xf32>
    %232 = math.exp %231 : vector<4x32xf32>
    %cst_41 = arith.constant 1.000000e+00 : f32
    %233 = vector.broadcast %cst_41 : f32 to vector<4x32xf32>
    %234 = arith.addf %233, %232 : vector<4x32xf32>
    %235 = arith.divf %233, %234 : vector<4x32xf32>
    %236 = arith.mulf %227, %187 : vector<4x32xf32>
    %237 = arith.mulf %221, %229 : vector<4x32xf32>
    %238 = arith.addf %236, %237 : vector<4x32xf32>
    %239 = math.tanh %238 : vector<4x32xf32>
    %240 = arith.mulf %235, %239 : vector<4x32xf32>
    %241 = tpu.concatenate %240, %238 in 1 : vector<4x32xf32>, vector<4x32xf32> -> vector<4x64xf32>
    %cst_42 = arith.constant dense<0.000000e+00> : vector<4x8xf32>
    %242 = tpu.matmul %241, %2, %cst_42 {dimension_numbers = #tpu.dot_dimension_numbers<[1], [0], [0], [1], [0, 0, 1, 1], [], []>} : vector<4x64xf32>, vector<64x8xf32>, vector<4x8xf32> -> vector<4x8xf32>
    %243 = vector.shape_cast %242 : vector<4x8xf32> to vector<4x1x8xf32>
    %244 = vector.broadcast %243 : vector<4x1x8xf32> to vector<4x8x8xf32>
    %245 = arith.addf %244, %85 : vector<4x8x8xf32>
    %246 = math.tanh %245 : vector<4x8x8xf32>
    %247 = vector.broadcast %4 : vector<1x1x8xf32> to vector<4x8x8xf32>
    %248 = arith.mulf %246, %247 : vector<4x8x8xf32>
    %cst_43 = arith.constant dense<0.000000e+00> : vector<4x8xf32>
    %249 = vector.multi_reduction <add>, %248, %cst_43 [2] : vector<4x8x8xf32> to vector<4x8xf32>
    %cst_44 = arith.constant dense<0xFF800000> : vector<4xf32>
    %250 = vector.multi_reduction <maximumf>, %249, %cst_44 [1] : vector<4x8xf32> to vector<4xf32>
    %251 = vector.shape_cast %250 : vector<4xf32> to vector<4x1xf32>
    %252 = vector.broadcast %251 : vector<4x1xf32> to vector<4x8xf32>
    %253 = arith.subf %249, %252 : vector<4x8xf32>
    %254 = math.exp %253 : vector<4x8xf32>
    %cst_45 = arith.constant dense<0.000000e+00> : vector<4xf32>
    %255 = vector.multi_reduction <add>, %254, %cst_45 [1] : vector<4x8xf32> to vector<4xf32>
    %256 = vector.shape_cast %255 : vector<4xf32> to vector<4x1xf32>
    %257 = tpu.reciprocal %256 {approx = true} : vector<4x1xf32> -> vector<4x1xf32>
    %258 = vector.broadcast %257 : vector<4x1xf32> to vector<4x8xf32>
    %259 = arith.mulf %254, %258 : vector<4x8xf32>
    %260 = vector.extract_strided_slice %0 {offsets = [0, 3, 0], sizes = [4, 1, 8], strides = [1, 1, 1]} : vector<4x8x8xf32> to vector<4x1x8xf32>
    %261 = vector.shape_cast %260 : vector<4x1x8xf32> to vector<4x8xf32>
    %262 = arith.mulf %259, %261 : vector<4x8xf32>
    %263 = tpu.concatenate %262, %240 in 1 : vector<4x8xf32>, vector<4x32xf32> -> vector<4x40xf32>
    %cst_46 = arith.constant dense<0.000000e+00> : vector<4x128xf32>
    %264 = tpu.matmul %263, %5, %cst_46 {dimension_numbers = #tpu.dot_dimension_numbers<[1], [0], [0], [1], [0, 0, 1, 1], [], []>} : vector<4x40xf32>, vector<40x128xf32>, vector<4x128xf32> -> vector<4x128xf32>
    %265 = vector.broadcast %6 : vector<1x128xf32> to vector<4x128xf32>
    %266 = arith.addf %264, %265 : vector<4x128xf32>
    %267 = vector.extract_strided_slice %266 {offsets = [0, 0], sizes = [4, 32], strides = [1, 1]} : vector<4x128xf32> to vector<4x32xf32>
    %268 = arith.negf %267 : vector<4x32xf32>
    %269 = math.exp %268 : vector<4x32xf32>
    %cst_47 = arith.constant 1.000000e+00 : f32
    %270 = vector.broadcast %cst_47 : f32 to vector<4x32xf32>
    %271 = arith.addf %270, %269 : vector<4x32xf32>
    %272 = arith.divf %270, %271 : vector<4x32xf32>
    %273 = vector.extract_strided_slice %266 {offsets = [0, 32], sizes = [4, 32], strides = [1, 1]} : vector<4x128xf32> to vector<4x32xf32>
    %274 = arith.negf %273 : vector<4x32xf32>
    %275 = math.exp %274 : vector<4x32xf32>
    %cst_48 = arith.constant 1.000000e+00 : f32
    %276 = vector.broadcast %cst_48 : f32 to vector<4x32xf32>
    %277 = arith.addf %276, %275 : vector<4x32xf32>
    %278 = arith.divf %276, %277 : vector<4x32xf32>
    %279 = vector.extract_strided_slice %266 {offsets = [0, 64], sizes = [4, 32], strides = [1, 1]} : vector<4x128xf32> to vector<4x32xf32>
    %280 = math.tanh %279 : vector<4x32xf32>
    %281 = vector.extract_strided_slice %266 {offsets = [0, 96], sizes = [4, 32], strides = [1, 1]} : vector<4x128xf32> to vector<4x32xf32>
    %282 = arith.negf %281 : vector<4x32xf32>
    %283 = math.exp %282 : vector<4x32xf32>
    %cst_49 = arith.constant 1.000000e+00 : f32
    %284 = vector.broadcast %cst_49 : f32 to vector<4x32xf32>
    %285 = arith.addf %284, %283 : vector<4x32xf32>
    %286 = arith.divf %284, %285 : vector<4x32xf32>
    %287 = arith.mulf %278, %238 : vector<4x32xf32>
    %288 = arith.mulf %272, %280 : vector<4x32xf32>
    %289 = arith.addf %287, %288 : vector<4x32xf32>
    %290 = math.tanh %289 : vector<4x32xf32>
    %291 = arith.mulf %286, %290 : vector<4x32xf32>
    %292 = tpu.concatenate %291, %289 in 1 : vector<4x32xf32>, vector<4x32xf32> -> vector<4x64xf32>
    %cst_50 = arith.constant dense<0.000000e+00> : vector<4x8xf32>
    %293 = tpu.matmul %292, %2, %cst_50 {dimension_numbers = #tpu.dot_dimension_numbers<[1], [0], [0], [1], [0, 0, 1, 1], [], []>} : vector<4x64xf32>, vector<64x8xf32>, vector<4x8xf32> -> vector<4x8xf32>
    %294 = vector.shape_cast %293 : vector<4x8xf32> to vector<4x1x8xf32>
    %295 = vector.broadcast %294 : vector<4x1x8xf32> to vector<4x8x8xf32>
    %296 = arith.addf %295, %85 : vector<4x8x8xf32>
    %297 = math.tanh %296 : vector<4x8x8xf32>
    %298 = vector.broadcast %4 : vector<1x1x8xf32> to vector<4x8x8xf32>
    %299 = arith.mulf %297, %298 : vector<4x8x8xf32>
    %cst_51 = arith.constant dense<0.000000e+00> : vector<4x8xf32>
    %300 = vector.multi_reduction <add>, %299, %cst_51 [2] : vector<4x8x8xf32> to vector<4x8xf32>
    %cst_52 = arith.constant dense<0xFF800000> : vector<4xf32>
    %301 = vector.multi_reduction <maximumf>, %300, %cst_52 [1] : vector<4x8xf32> to vector<4xf32>
    %302 = vector.shape_cast %301 : vector<4xf32> to vector<4x1xf32>
    %303 = vector.broadcast %302 : vector<4x1xf32> to vector<4x8xf32>
    %304 = arith.subf %300, %303 : vector<4x8xf32>
    %305 = math.exp %304 : vector<4x8xf32>
    %cst_53 = arith.constant dense<0.000000e+00> : vector<4xf32>
    %306 = vector.multi_reduction <add>, %305, %cst_53 [1] : vector<4x8xf32> to vector<4xf32>
    %307 = vector.shape_cast %306 : vector<4xf32> to vector<4x1xf32>
    %308 = tpu.reciprocal %307 {approx = true} : vector<4x1xf32> -> vector<4x1xf32>
    %309 = vector.broadcast %308 : vector<4x1xf32> to vector<4x8xf32>
    %310 = arith.mulf %305, %309 : vector<4x8xf32>
    %311 = vector.extract_strided_slice %0 {offsets = [0, 4, 0], sizes = [4, 1, 8], strides = [1, 1, 1]} : vector<4x8x8xf32> to vector<4x1x8xf32>
    %312 = vector.shape_cast %311 : vector<4x1x8xf32> to vector<4x8xf32>
    %313 = arith.mulf %310, %312 : vector<4x8xf32>
    %314 = tpu.concatenate %313, %291 in 1 : vector<4x8xf32>, vector<4x32xf32> -> vector<4x40xf32>
    %cst_54 = arith.constant dense<0.000000e+00> : vector<4x128xf32>
    %315 = tpu.matmul %314, %5, %cst_54 {dimension_numbers = #tpu.dot_dimension_numbers<[1], [0], [0], [1], [0, 0, 1, 1], [], []>} : vector<4x40xf32>, vector<40x128xf32>, vector<4x128xf32> -> vector<4x128xf32>
    %316 = vector.broadcast %6 : vector<1x128xf32> to vector<4x128xf32>
    %317 = arith.addf %315, %316 : vector<4x128xf32>
    %318 = vector.extract_strided_slice %317 {offsets = [0, 0], sizes = [4, 32], strides = [1, 1]} : vector<4x128xf32> to vector<4x32xf32>
    %319 = arith.negf %318 : vector<4x32xf32>
    %320 = math.exp %319 : vector<4x32xf32>
    %cst_55 = arith.constant 1.000000e+00 : f32
    %321 = vector.broadcast %cst_55 : f32 to vector<4x32xf32>
    %322 = arith.addf %321, %320 : vector<4x32xf32>
    %323 = arith.divf %321, %322 : vector<4x32xf32>
    %324 = vector.extract_strided_slice %317 {offsets = [0, 32], sizes = [4, 32], strides = [1, 1]} : vector<4x128xf32> to vector<4x32xf32>
    %325 = arith.negf %324 : vector<4x32xf32>
    %326 = math.exp %325 : vector<4x32xf32>
    %cst_56 = arith.constant 1.000000e+00 : f32
    %327 = vector.broadcast %cst_56 : f32 to vector<4x32xf32>
    %328 = arith.addf %327, %326 : vector<4x32xf32>
    %329 = arith.divf %327, %328 : vector<4x32xf32>
    %330 = vector.extract_strided_slice %317 {offsets = [0, 64], sizes = [4, 32], strides = [1, 1]} : vector<4x128xf32> to vector<4x32xf32>
    %331 = math.tanh %330 : vector<4x32xf32>
    %332 = vector.extract_strided_slice %317 {offsets = [0, 96], sizes = [4, 32], strides = [1, 1]} : vector<4x128xf32> to vector<4x32xf32>
    %333 = arith.negf %332 : vector<4x32xf32>
    %334 = math.exp %333 : vector<4x32xf32>
    %cst_57 = arith.constant 1.000000e+00 : f32
    %335 = vector.broadcast %cst_57 : f32 to vector<4x32xf32>
    %336 = arith.addf %335, %334 : vector<4x32xf32>
    %337 = arith.divf %335, %336 : vector<4x32xf32>
    %338 = arith.mulf %329, %289 : vector<4x32xf32>
    %339 = arith.mulf %323, %331 : vector<4x32xf32>
    %340 = arith.addf %338, %339 : vector<4x32xf32>
    %341 = math.tanh %340 : vector<4x32xf32>
    %342 = arith.mulf %337, %341 : vector<4x32xf32>
    %343 = tpu.concatenate %342, %340 in 1 : vector<4x32xf32>, vector<4x32xf32> -> vector<4x64xf32>
    %cst_58 = arith.constant dense<0.000000e+00> : vector<4x8xf32>
    %344 = tpu.matmul %343, %2, %cst_58 {dimension_numbers = #tpu.dot_dimension_numbers<[1], [0], [0], [1], [0, 0, 1, 1], [], []>} : vector<4x64xf32>, vector<64x8xf32>, vector<4x8xf32> -> vector<4x8xf32>
    %345 = vector.shape_cast %344 : vector<4x8xf32> to vector<4x1x8xf32>
    %346 = vector.broadcast %345 : vector<4x1x8xf32> to vector<4x8x8xf32>
    %347 = arith.addf %346, %85 : vector<4x8x8xf32>
    %348 = math.tanh %347 : vector<4x8x8xf32>
    %349 = vector.broadcast %4 : vector<1x1x8xf32> to vector<4x8x8xf32>
    %350 = arith.mulf %348, %349 : vector<4x8x8xf32>
    %cst_59 = arith.constant dense<0.000000e+00> : vector<4x8xf32>
    %351 = vector.multi_reduction <add>, %350, %cst_59 [2] : vector<4x8x8xf32> to vector<4x8xf32>
    %cst_60 = arith.constant dense<0xFF800000> : vector<4xf32>
    %352 = vector.multi_reduction <maximumf>, %351, %cst_60 [1] : vector<4x8xf32> to vector<4xf32>
    %353 = vector.shape_cast %352 : vector<4xf32> to vector<4x1xf32>
    %354 = vector.broadcast %353 : vector<4x1xf32> to vector<4x8xf32>
    %355 = arith.subf %351, %354 : vector<4x8xf32>
    %356 = math.exp %355 : vector<4x8xf32>
    %cst_61 = arith.constant dense<0.000000e+00> : vector<4xf32>
    %357 = vector.multi_reduction <add>, %356, %cst_61 [1] : vector<4x8xf32> to vector<4xf32>
    %358 = vector.shape_cast %357 : vector<4xf32> to vector<4x1xf32>
    %359 = tpu.reciprocal %358 {approx = true} : vector<4x1xf32> -> vector<4x1xf32>
    %360 = vector.broadcast %359 : vector<4x1xf32> to vector<4x8xf32>
    %361 = arith.mulf %356, %360 : vector<4x8xf32>
    %362 = vector.extract_strided_slice %0 {offsets = [0, 5, 0], sizes = [4, 1, 8], strides = [1, 1, 1]} : vector<4x8x8xf32> to vector<4x1x8xf32>
    %363 = vector.shape_cast %362 : vector<4x1x8xf32> to vector<4x8xf32>
    %364 = arith.mulf %361, %363 : vector<4x8xf32>
    %365 = tpu.concatenate %364, %342 in 1 : vector<4x8xf32>, vector<4x32xf32> -> vector<4x40xf32>
    %cst_62 = arith.constant dense<0.000000e+00> : vector<4x128xf32>
    %366 = tpu.matmul %365, %5, %cst_62 {dimension_numbers = #tpu.dot_dimension_numbers<[1], [0], [0], [1], [0, 0, 1, 1], [], []>} : vector<4x40xf32>, vector<40x128xf32>, vector<4x128xf32> -> vector<4x128xf32>
    %367 = vector.broadcast %6 : vector<1x128xf32> to vector<4x128xf32>
    %368 = arith.addf %366, %367 : vector<4x128xf32>
    %369 = vector.extract_strided_slice %368 {offsets = [0, 0], sizes = [4, 32], strides = [1, 1]} : vector<4x128xf32> to vector<4x32xf32>
    %370 = arith.negf %369 : vector<4x32xf32>
    %371 = math.exp %370 : vector<4x32xf32>
    %cst_63 = arith.constant 1.000000e+00 : f32
    %372 = vector.broadcast %cst_63 : f32 to vector<4x32xf32>
    %373 = arith.addf %372, %371 : vector<4x32xf32>
    %374 = arith.divf %372, %373 : vector<4x32xf32>
    %375 = vector.extract_strided_slice %368 {offsets = [0, 32], sizes = [4, 32], strides = [1, 1]} : vector<4x128xf32> to vector<4x32xf32>
    %376 = arith.negf %375 : vector<4x32xf32>
    %377 = math.exp %376 : vector<4x32xf32>
    %cst_64 = arith.constant 1.000000e+00 : f32
    %378 = vector.broadcast %cst_64 : f32 to vector<4x32xf32>
    %379 = arith.addf %378, %377 : vector<4x32xf32>
    %380 = arith.divf %378, %379 : vector<4x32xf32>
    %381 = vector.extract_strided_slice %368 {offsets = [0, 64], sizes = [4, 32], strides = [1, 1]} : vector<4x128xf32> to vector<4x32xf32>
    %382 = math.tanh %381 : vector<4x32xf32>
    %383 = vector.extract_strided_slice %368 {offsets = [0, 96], sizes = [4, 32], strides = [1, 1]} : vector<4x128xf32> to vector<4x32xf32>
    %384 = arith.negf %383 : vector<4x32xf32>
    %385 = math.exp %384 : vector<4x32xf32>
    %cst_65 = arith.constant 1.000000e+00 : f32
    %386 = vector.broadcast %cst_65 : f32 to vector<4x32xf32>
    %387 = arith.addf %386, %385 : vector<4x32xf32>
    %388 = arith.divf %386, %387 : vector<4x32xf32>
    %389 = arith.mulf %380, %340 : vector<4x32xf32>
    %390 = arith.mulf %374, %382 : vector<4x32xf32>
    %391 = arith.addf %389, %390 : vector<4x32xf32>
    %392 = math.tanh %391 : vector<4x32xf32>
    %393 = arith.mulf %388, %392 : vector<4x32xf32>
    %394 = tpu.concatenate %393, %391 in 1 : vector<4x32xf32>, vector<4x32xf32> -> vector<4x64xf32>
    %cst_66 = arith.constant dense<0.000000e+00> : vector<4x8xf32>
    %395 = tpu.matmul %394, %2, %cst_66 {dimension_numbers = #tpu.dot_dimension_numbers<[1], [0], [0], [1], [0, 0, 1, 1], [], []>} : vector<4x64xf32>, vector<64x8xf32>, vector<4x8xf32> -> vector<4x8xf32>
    %396 = vector.shape_cast %395 : vector<4x8xf32> to vector<4x1x8xf32>
    %397 = vector.broadcast %396 : vector<4x1x8xf32> to vector<4x8x8xf32>
    %398 = arith.addf %397, %85 : vector<4x8x8xf32>
    %399 = math.tanh %398 : vector<4x8x8xf32>
    %400 = vector.broadcast %4 : vector<1x1x8xf32> to vector<4x8x8xf32>
    %401 = arith.mulf %399, %400 : vector<4x8x8xf32>
    %cst_67 = arith.constant dense<0.000000e+00> : vector<4x8xf32>
    %402 = vector.multi_reduction <add>, %401, %cst_67 [2] : vector<4x8x8xf32> to vector<4x8xf32>
    %cst_68 = arith.constant dense<0xFF800000> : vector<4xf32>
    %403 = vector.multi_reduction <maximumf>, %402, %cst_68 [1] : vector<4x8xf32> to vector<4xf32>
    %404 = vector.shape_cast %403 : vector<4xf32> to vector<4x1xf32>
    %405 = vector.broadcast %404 : vector<4x1xf32> to vector<4x8xf32>
    %406 = arith.subf %402, %405 : vector<4x8xf32>
    %407 = math.exp %406 : vector<4x8xf32>
    %cst_69 = arith.constant dense<0.000000e+00> : vector<4xf32>
    %408 = vector.multi_reduction <add>, %407, %cst_69 [1] : vector<4x8xf32> to vector<4xf32>
    %409 = vector.shape_cast %408 : vector<4xf32> to vector<4x1xf32>
    %410 = tpu.reciprocal %409 {approx = true} : vector<4x1xf32> -> vector<4x1xf32>
    %411 = vector.broadcast %410 : vector<4x1xf32> to vector<4x8xf32>
    %412 = arith.mulf %407, %411 : vector<4x8xf32>
    %413 = vector.extract_strided_slice %0 {offsets = [0, 6, 0], sizes = [4, 1, 8], strides = [1, 1, 1]} : vector<4x8x8xf32> to vector<4x1x8xf32>
    %414 = vector.shape_cast %413 : vector<4x1x8xf32> to vector<4x8xf32>
    %415 = arith.mulf %412, %414 : vector<4x8xf32>
    %416 = tpu.concatenate %415, %393 in 1 : vector<4x8xf32>, vector<4x32xf32> -> vector<4x40xf32>
    %cst_70 = arith.constant dense<0.000000e+00> : vector<4x128xf32>
    %417 = tpu.matmul %416, %5, %cst_70 {dimension_numbers = #tpu.dot_dimension_numbers<[1], [0], [0], [1], [0, 0, 1, 1], [], []>} : vector<4x40xf32>, vector<40x128xf32>, vector<4x128xf32> -> vector<4x128xf32>
    %418 = vector.broadcast %6 : vector<1x128xf32> to vector<4x128xf32>
    %419 = arith.addf %417, %418 : vector<4x128xf32>
    %420 = vector.extract_strided_slice %419 {offsets = [0, 0], sizes = [4, 32], strides = [1, 1]} : vector<4x128xf32> to vector<4x32xf32>
    %421 = arith.negf %420 : vector<4x32xf32>
    %422 = math.exp %421 : vector<4x32xf32>
    %cst_71 = arith.constant 1.000000e+00 : f32
    %423 = vector.broadcast %cst_71 : f32 to vector<4x32xf32>
    %424 = arith.addf %423, %422 : vector<4x32xf32>
    %425 = arith.divf %423, %424 : vector<4x32xf32>
    %426 = vector.extract_strided_slice %419 {offsets = [0, 32], sizes = [4, 32], strides = [1, 1]} : vector<4x128xf32> to vector<4x32xf32>
    %427 = arith.negf %426 : vector<4x32xf32>
    %428 = math.exp %427 : vector<4x32xf32>
    %cst_72 = arith.constant 1.000000e+00 : f32
    %429 = vector.broadcast %cst_72 : f32 to vector<4x32xf32>
    %430 = arith.addf %429, %428 : vector<4x32xf32>
    %431 = arith.divf %429, %430 : vector<4x32xf32>
    %432 = vector.extract_strided_slice %419 {offsets = [0, 64], sizes = [4, 32], strides = [1, 1]} : vector<4x128xf32> to vector<4x32xf32>
    %433 = math.tanh %432 : vector<4x32xf32>
    %434 = vector.extract_strided_slice %419 {offsets = [0, 96], sizes = [4, 32], strides = [1, 1]} : vector<4x128xf32> to vector<4x32xf32>
    %435 = arith.negf %434 : vector<4x32xf32>
    %436 = math.exp %435 : vector<4x32xf32>
    %cst_73 = arith.constant 1.000000e+00 : f32
    %437 = vector.broadcast %cst_73 : f32 to vector<4x32xf32>
    %438 = arith.addf %437, %436 : vector<4x32xf32>
    %439 = arith.divf %437, %438 : vector<4x32xf32>
    %440 = arith.mulf %431, %391 : vector<4x32xf32>
    %441 = arith.mulf %425, %433 : vector<4x32xf32>
    %442 = arith.addf %440, %441 : vector<4x32xf32>
    %443 = math.tanh %442 : vector<4x32xf32>
    %444 = arith.mulf %439, %443 : vector<4x32xf32>
    %445 = tpu.concatenate %444, %442 in 1 : vector<4x32xf32>, vector<4x32xf32> -> vector<4x64xf32>
    %cst_74 = arith.constant dense<0.000000e+00> : vector<4x8xf32>
    %446 = tpu.matmul %445, %2, %cst_74 {dimension_numbers = #tpu.dot_dimension_numbers<[1], [0], [0], [1], [0, 0, 1, 1], [], []>} : vector<4x64xf32>, vector<64x8xf32>, vector<4x8xf32> -> vector<4x8xf32>
    %447 = vector.shape_cast %446 : vector<4x8xf32> to vector<4x1x8xf32>
    %448 = vector.broadcast %447 : vector<4x1x8xf32> to vector<4x8x8xf32>
    %449 = arith.addf %448, %85 : vector<4x8x8xf32>
    %450 = math.tanh %449 : vector<4x8x8xf32>
    %451 = vector.broadcast %4 : vector<1x1x8xf32> to vector<4x8x8xf32>
    %452 = arith.mulf %450, %451 : vector<4x8x8xf32>
    %cst_75 = arith.constant dense<0.000000e+00> : vector<4x8xf32>
    %453 = vector.multi_reduction <add>, %452, %cst_75 [2] : vector<4x8x8xf32> to vector<4x8xf32>
    %cst_76 = arith.constant dense<0xFF800000> : vector<4xf32>
    %454 = vector.multi_reduction <maximumf>, %453, %cst_76 [1] : vector<4x8xf32> to vector<4xf32>
    %455 = vector.shape_cast %454 : vector<4xf32> to vector<4x1xf32>
    %456 = vector.broadcast %455 : vector<4x1xf32> to vector<4x8xf32>
    %457 = arith.subf %453, %456 : vector<4x8xf32>
    %458 = math.exp %457 : vector<4x8xf32>
    %cst_77 = arith.constant dense<0.000000e+00> : vector<4xf32>
    %459 = vector.multi_reduction <add>, %458, %cst_77 [1] : vector<4x8xf32> to vector<4xf32>
    %460 = vector.shape_cast %459 : vector<4xf32> to vector<4x1xf32>
    %461 = tpu.reciprocal %460 {approx = true} : vector<4x1xf32> -> vector<4x1xf32>
    %462 = vector.broadcast %461 : vector<4x1xf32> to vector<4x8xf32>
    %463 = arith.mulf %458, %462 : vector<4x8xf32>
    %464 = vector.extract_strided_slice %0 {offsets = [0, 7, 0], sizes = [4, 1, 8], strides = [1, 1, 1]} : vector<4x8x8xf32> to vector<4x1x8xf32>
    %465 = vector.shape_cast %464 : vector<4x1x8xf32> to vector<4x8xf32>
    %466 = arith.mulf %463, %465 : vector<4x8xf32>
    %467 = tpu.concatenate %466, %444 in 1 : vector<4x8xf32>, vector<4x32xf32> -> vector<4x40xf32>
    %cst_78 = arith.constant dense<0.000000e+00> : vector<4x128xf32>
    %468 = tpu.matmul %467, %5, %cst_78 {dimension_numbers = #tpu.dot_dimension_numbers<[1], [0], [0], [1], [0, 0, 1, 1], [], []>} : vector<4x40xf32>, vector<40x128xf32>, vector<4x128xf32> -> vector<4x128xf32>
    %469 = vector.broadcast %6 : vector<1x128xf32> to vector<4x128xf32>
    %470 = arith.addf %468, %469 : vector<4x128xf32>
    %471 = vector.extract_strided_slice %470 {offsets = [0, 0], sizes = [4, 32], strides = [1, 1]} : vector<4x128xf32> to vector<4x32xf32>
    %472 = arith.negf %471 : vector<4x32xf32>
    %473 = math.exp %472 : vector<4x32xf32>
    %cst_79 = arith.constant 1.000000e+00 : f32
    %474 = vector.broadcast %cst_79 : f32 to vector<4x32xf32>
    %475 = arith.addf %474, %473 : vector<4x32xf32>
    %476 = arith.divf %474, %475 : vector<4x32xf32>
    %477 = vector.extract_strided_slice %470 {offsets = [0, 32], sizes = [4, 32], strides = [1, 1]} : vector<4x128xf32> to vector<4x32xf32>
    %478 = arith.negf %477 : vector<4x32xf32>
    %479 = math.exp %478 : vector<4x32xf32>
    %cst_80 = arith.constant 1.000000e+00 : f32
    %480 = vector.broadcast %cst_80 : f32 to vector<4x32xf32>
    %481 = arith.addf %480, %479 : vector<4x32xf32>
    %482 = arith.divf %480, %481 : vector<4x32xf32>
    %483 = vector.extract_strided_slice %470 {offsets = [0, 64], sizes = [4, 32], strides = [1, 1]} : vector<4x128xf32> to vector<4x32xf32>
    %484 = math.tanh %483 : vector<4x32xf32>
    %485 = vector.extract_strided_slice %470 {offsets = [0, 96], sizes = [4, 32], strides = [1, 1]} : vector<4x128xf32> to vector<4x32xf32>
    %486 = arith.negf %485 : vector<4x32xf32>
    %487 = math.exp %486 : vector<4x32xf32>
    %cst_81 = arith.constant 1.000000e+00 : f32
    %488 = vector.broadcast %cst_81 : f32 to vector<4x32xf32>
    %489 = arith.addf %488, %487 : vector<4x32xf32>
    %490 = arith.divf %488, %489 : vector<4x32xf32>
    %491 = arith.mulf %482, %442 : vector<4x32xf32>
    %492 = arith.mulf %476, %484 : vector<4x32xf32>
    %493 = arith.addf %491, %492 : vector<4x32xf32>
    %494 = math.tanh %493 : vector<4x32xf32>
    %495 = arith.mulf %490, %494 : vector<4x32xf32>
    %496 = vector.shape_cast %109 : vector<4x8xf32> to vector<4x1x8xf32>
    %497 = vector.shape_cast %160 : vector<4x8xf32> to vector<4x1x8xf32>
    %498 = vector.shape_cast %211 : vector<4x8xf32> to vector<4x1x8xf32>
    %499 = vector.shape_cast %262 : vector<4x8xf32> to vector<4x1x8xf32>
    %500 = vector.shape_cast %313 : vector<4x8xf32> to vector<4x1x8xf32>
    %501 = vector.shape_cast %364 : vector<4x8xf32> to vector<4x1x8xf32>
    %502 = vector.shape_cast %415 : vector<4x8xf32> to vector<4x1x8xf32>
    %503 = vector.shape_cast %466 : vector<4x8xf32> to vector<4x1x8xf32>
    %504 = tpu.concatenate %496, %497, %498, %499, %500, %501, %502, %503 in 1 : vector<4x1x8xf32>, vector<4x1x8xf32>, vector<4x1x8xf32>, vector<4x1x8xf32>, vector<4x1x8xf32>, vector<4x1x8xf32>, vector<4x1x8xf32>, vector<4x1x8xf32> -> vector<4x8x8xf32>
    %c0_82 = arith.constant 0 : index
    %c0_83 = arith.constant 0 : index
    %c0_84 = arith.constant 0 : index
    %505 = vector.load %arg8[%c0_82, %c0_83, %c0_84] : memref<4x8x8xf32, #tpu.memory_space<vmem>>, vector<4x8x8xf32>
    tpu.vector_store %arg8[%c0_82, %c0_83, %c0_84], %504 {strides = array<i32>} : memref<4x8x8xf32, #tpu.memory_space<vmem>>, vector<4x8x8xf32>,
    %506 = vector.shape_cast %138 : vector<4x32xf32> to vector<4x1x32xf32>
    %507 = vector.shape_cast %189 : vector<4x32xf32> to vector<4x1x32xf32>
    %508 = vector.shape_cast %240 : vector<4x32xf32> to vector<4x1x32xf32>
    %509 = vector.shape_cast %291 : vector<4x32xf32> to vector<4x1x32xf32>
    %510 = vector.shape_cast %342 : vector<4x32xf32> to vector<4x1x32xf32>
    %511 = vector.shape_cast %393 : vector<4x32xf32> to vector<4x1x32xf32>
    %512 = vector.shape_cast %444 : vector<4x32xf32> to vector<4x1x32xf32>
    %513 = vector.shape_cast %495 : vector<4x32xf32> to vector<4x1x32xf32>
    %514 = tpu.concatenate %506, %507, %508, %509, %510, %511, %512, %513 in 1 : vector<4x1x32xf32>, vector<4x1x32xf32>, vector<4x1x32xf32>, vector<4x1x32xf32>, vector<4x1x32xf32>, vector<4x1x32xf32>, vector<4x1x32xf32>, vector<4x1x32xf32> -> vector<4x8x32xf32>
    %c0_85 = arith.constant 0 : index
    %c0_86 = arith.constant 0 : index
    %c0_87 = arith.constant 0 : index
    %515 = vector.load %arg9[%c0_85, %c0_86, %c0_87] : memref<4x8x32xf32, #tpu.memory_space<vmem>>, vector<4x8x32xf32>
    tpu.vector_store %arg9[%c0_85, %c0_86, %c0_87], %514 {strides = array<i32>} : memref<4x8x32xf32, #tpu.memory_space<vmem>>, vector<4x8x32xf32>,
    return
  }
}

</mosaic_0001>

<bundles_post_ra>
// kernel: encoder_forward.1
= control target key start
LH: loop header
LB: loop body
LE: loop exit
PB: predicated region body
PF: predicated region fallthrough
CT: control target
= control target key end

     0   :  { %15 = vsyncpa [#allocation3], 0  ;;  %s6729_s0 = inlined_call_operand.vmem [shape: f32[4,8,8], index: 0, kind: input, shape index: {}]   ;;  %s6730_s1 = inlined_call_operand.hbm [shape: f32[8,8], index: 1, kind: input, shape index: {}]   ;;  %s6731_s2 = inlined_call_operand.vmem [shape: f32[1,8], index: 2, kind: input, shape index: {}]   ;;  %s6732_s3 = inlined_call_operand.vmem [shape: f32[1,8], index: 3, kind: input, shape index: {}]   ;;  %s6733_s4 = inlined_call_operand.vmem [shape: f32[64,8], index: 4, kind: input, shape index: {}]   ;;  %s6734_s5 = inlined_call_operand.vmem [shape: f32[1,8], index: 5, kind: input, shape index: {}]   ;;  %s6735_s6 = inlined_call_operand.vmem [shape: f32[40,128], index: 6, kind: input, shape index: {}]   ;;  %s6736_s7 = inlined_call_operand.vmem [shape: f32[1,128], index: 7, kind: input, shape index: {}]   ;;  %s6737_s8 = inlined_call_operand.hbm [shape: f32[4,8,8], index: 8, kind: output, shape index: {0}]   ;;  %s6738_s9 = inlined_call_operand.hbm [shape: f32[4,8,32], index: 9, kind: output, shape index: {1}]  }
   0x1   :  { %16 = vsyncpa [#allocation4], 0 }
   0x2   :  { %17 = vsyncpa [#allocation7], 0  ;;  %s5307_s30 = smov [#allocation2]   ;;  %s5235_s13 = scalar_lea.hbm %s6730_s1, 128 }
   0x3   :  { %s26_s10 = sshll.u32 %s5307_s30, 4  ;;  %p5236_p0 = scmp.ne.s32.totalorder %s6730_s1, %s5235_s13  ;;  %s27_s10 = int_to_ptr.vmem [resolvable:$true] %s26_s10 }
   0x4   :  { %p5239_p1 = scmp.lt.u32.totalorder %s5235_s13, %s6730_s1 }
   0x6   :  { %p5241_p2 = pnand %p5239_p1, %p5236_p0 }
   0x8   :  { %5244 = shalt.err (!%p5241_p2)
}
   0x9   :  { %s5245_s18 = scalar_lea.vmem %s27_s10, 128  ;;  %p5250_p4 = scmp.lt.s32.totalorder %s27_s10, %s27_s10 }
   0xa   :  { %p5246_p3 = scmp.ne.s32.totalorder %s27_s10, %s5245_s18  ;;  %p5251_p5 = scmp.lt.s32.totalorder %s5245_s18, %s5245_s18 }
   0xc   :  { %p5252_p6 = por %p5251_p5, %p5250_p4 }
   0xe   :  { %p5253_p7 = pnand %p5252_p6, %p5246_p3 }
  0x10   :  { %5256 = shalt.err (!%p5253_p7)
}
  0x11   :  { %29 = dma.hbm_to_vmem [thread:$0]  %s6730_s1, 128, %s27_s10, [#allocation3]  }
  0x12   :  { %5301 = dma.done.wait [#allocation3], 128  }
  0x13   :  { %5302 = vsyncadd [#allocation3], 4294967168  ;;  %v6743_v0 = vlaneseq  ;;  %v6741_v1 = vmov 0.0|0.0   ;;  %vm5309_vm0 = vmmov 0   ;;  %v6739_v2 = vmov 0.0   ;;  %v50_v5 = vld [vmem:[%s6733_s4] sm:$0xff] }
  0x14   :  { %4863 = vmatprep.subr.bf16.mxu0 %v6741_v1  ;;  %4623 = vmatprep.mubr.msk.f32.mxu0 %vm5309_vm0, %v6739_v2  ;;  %v51_v6 = vld [vmem:[%s6733_s4 + $0x8] sm:$0xff]  ;;  %v52_v7 = vld [vmem:[%s6733_s4 + $0x10] sm:$0xff]  ;;  %v53_v9 = vld [vmem:[%s6733_s4 + $0x18] sm:$0xff]  ;;  %vm532_vm1 = vcmask 64512   ;;  %vm567_vm2 = vcmask 1041409   ;;  %vm569_vm3 = vcmask 1042434  }
  0x15   :  { %v5386_v3 = vshrl.u32 %v6743_v0, 7  ;;  %4875 = vmatprep.subr.bf16.mxu1 %v6741_v1  ;;  %4636 = vmatprep.mubr.msk.f32.mxu1 %vm5309_vm0, %v6739_v2  ;;  %v5403_v8 = vpack.c.bf16 %v51_v6, %v50_v5  ;;  %v5411_v10 = vld [vmem:[%s6729_s0] sm:$0xff]  ;;  %v5414_v11 = vpack.c.bf16 %v53_v9, %v52_v7  ;;  %v5423_v13 = vld [vmem:[%s6729_s0 + $0x10] sm:$0xff]  ;;  %v5428_v14 = vld [vmem:[%s6729_s0 + $0x8] sm:$0xff]  ;;  %vm571_vm4 = vcmask 1043459   ;;  %s5313_s15 = smov 64  }
  0x16   :  { %v5433_v15 = vld [vmem:[%s6729_s0 + $0x18] sm:$0xff]  ;;  %v54_v16 = vld [vmem:[%s6733_s4 + $0x20] sm:$0xff]  ;;  %v55_v17 = vld [vmem:[%s6733_s4 + $0x28] sm:$0xff]  ;;  %vm574_vm5 = vcmask 60416   ;;  %vm759_vm6 = vcmask 326656   ;;  %s5314_s16 = smov 32  }
  0x17   :  { %v5392_v4 = vsub.s32 0, %v5386_v3  ;;  %4865 = vmatpush3.bf16.msra.mxu0 %v5403_v8  ;;  %v5452_v20 = vsub.s32 1, %v5386_v3  ;;  %v5460_v22 = vpack.c.bf16 %v55_v17, %v54_v16  ;;  %v56_v23 = vld [vmem:[%s6733_s4 + $0x30] sm:$0xff]  ;;  %v57_v24 = vld [vmem:[%s6733_s4 + $0x38] sm:$0xff]  ;;  %v5489_v29 = vsub.s32 2, %v5386_v3  ;;  %v5638_v7 = vld [vmem:[#allocation2] sm:$0xff] }
  0x18   :  { %4866 = vmatprep.subr.bf16.mxu0 %v6741_v1  ;;  %v5480_v27 = vpack.c.bf16 %v57_v24, %v56_v23  ;;  %v5517_v34 = vsub.s32 3, %v5386_v3  ;;  %v5540_v39 = vsub.s32 4, %v5386_v3  ;;  %v5563_v44 = vsub.s32 5, %v5386_v3  ;;  %v65_v9 = vld [vmem:[%s6731_s2] sm:$0x1]  ;;  %s5315_s17 = smov 40  }
  0x19   :  { %v5418_v12 = vrot.slane %v5411_v10, %v5392_v4  ;;  %v5444_v18 = vrot.slane %v5423_v13, %v5392_v4  ;;  %v5449_v19 = vrot.slane %v5428_v14, %v5392_v4  ;;  %v5457_v21 = vrot.slane %v5433_v15, %v5392_v4 }
  0x1a   :  { %v5472_v25 = vrot.slane %v5411_v10, %v5452_v20  ;;  %v5477_v26 = vrot.slane %v5428_v14, %v5452_v20  ;;  %v5486_v28 = vrot.slane %v5423_v13, %v5452_v20  ;;  %v5494_v30 = vrot.slane %v5433_v15, %v5452_v20 }
  0x1b   :  { %80 = vbcast.lane.b32.xlu0 %v5418_v12, 256  ;;  %94 = vbcast.lane.b32.xlu1 %v5444_v18, 256  ;;  %v5501_v31 = vrot.slane %v5411_v10, %v5489_v29  ;;  %v5507_v32 = vrot.slane %v5428_v14, %v5489_v29  ;;  %v5514_v33 = vrot.slane %v5423_v13, %v5489_v29  ;;  %v5586_v49 = vsub.s32 6, %v5386_v3 }
  0x1c   :  { %4868 = vmatpush3.bf16.msra.mxu0 %v5414_v11  ;;  %v5522_v35 = vrot.slane %v5433_v15, %v5489_v29  ;;  %v5527_v36 = vrot.slane %v5411_v10, %v5517_v34  ;;  %v5532_v37 = vrot.slane %v5428_v14, %v5517_v34  ;;  %v5537_v38 = vrot.slane %v5423_v13, %v5517_v34 }
  0x1d   :  { %4869 = vmatprep.subr.bf16.mxu0 %v6741_v1  ;;  %v5545_v40 = vrot.slane %v5433_v15, %v5517_v34  ;;  %v5550_v41 = vrot.slane %v5411_v10, %v5540_v39  ;;  %v5555_v42 = vrot.slane %v5428_v14, %v5540_v39  ;;  %v5560_v43 = vrot.slane %v5423_v13, %v5540_v39 }
  0x1e   :  { %6762 = vst [vmem:[#allocation11_spill] sm:$0xff] %v5537_v38  ;;  %v5568_v45 = vrot.slane %v5433_v15, %v5540_v39  ;;  %v5573_v46 = vrot.slane %v5411_v10, %v5563_v44  ;;  %v5578_v47 = vrot.slane %v5428_v14, %v5563_v44  ;;  %v5583_v48 = vrot.slane %v5423_v13, %v5563_v44 }
  0x1f   :  { %87 = vbcast.lane.b32.xlu0 %v5449_v19, 256  ;;  %101 = vbcast.lane.b32.xlu1 %v5457_v21, 256  ;;  %6763 = vst [vmem:[#allocation12_spill] sm:$0xff] %v5545_v40  ;;  %6764 = vst [vmem:[#allocation13_spill] sm:$0xff] %v5550_v41  ;;  %v5591_v50 = vrot.slane %v5433_v15, %v5563_v44  ;;  %v5596_v51 = vrot.slane %v5411_v10, %v5586_v49  ;;  %v5609_v54 = vsub.s32 7, %v5386_v3  ;;  %vm861_vm7 = vcmask 261120  }
  0x20   :  { %4871 = vmatpush3.bf16.msra.mxu0 %v5460_v22  ;;  %6765 = vst [vmem:[#allocation14_spill] sm:$0xff] %v5555_v42  ;;  %6766 = vst [vmem:[#allocation15_spill] sm:$0xff] %v5560_v43  ;;  %v5601_v52 = vrot.slane %v5428_v14, %v5586_v49  ;;  %v5606_v53 = vrot.slane %v5423_v13, %v5586_v49  ;;  %v5614_v55 = vrot.slane %v5433_v15, %v5586_v49  ;;  %vm395_vm8 = vcmask 523264  }
  0x21   :  { %4872 = vmatprep.subr.bf16.mxu0 %v6741_v1  ;;  %6767 = vst [vmem:[#allocation16_spill] sm:$0xff] %v5568_v45  ;;  %6768 = vst [vmem:[#allocation17_spill] sm:$0xff] %v5573_v46  ;;  %v5619_v56 = vrot.slane %v5411_v10, %v5609_v54  ;;  %v5624_v57 = vrot.slane %v5428_v14, %v5609_v54  ;;  %v5629_v58 = vrot.slane %v5423_v13, %v5609_v54  ;;  %v66_v10 = vld [vmem:[%s6732_s3] sm:$0x1]  ;;  %vm4005_vm9 = vcmask 1040384  }
  0x22   :  { %6769 = vst [vmem:[#allocation18_spill] sm:$0xff] %v5578_v47  ;;  %6770 = vst [vmem:[#allocation19_spill] sm:$0xff] %v5583_v48  ;;  %v5634_v59 = vrot.slane %v5433_v15, %v5609_v54  ;;  %v67_v15 = vadd.f32 %v66_v10, %v65_v9  ;;  %v106_v16 = vrot.slane %v5638_v7, %v5392_v4  ;;  %vm4010_vm10 = vcmask 1041408  }
  0x23   :  { %120 = vbcast.lane.b32.xlu0 %v5472_v25, 256  ;;  %127 = vbcast.lane.b32.xlu1 %v5477_v26, 256  ;;  %6771 = vst [vmem:[#allocation20_spill] sm:$0xff] %v5591_v50  ;;  %6772 = vst [vmem:[#allocation21_spill] sm:$0xff] %v5596_v51  ;;  %v186_v9 = vrot.slane %v5638_v7, %v5489_v29  ;;  %vm4015_vm11 = vcmask 1042432   ;;  %vm4020_vm12 = vcmask 1043456  }
  0x24   :  { %4874 = vmatpush3.bf16.msra.mxu0 %v5480_v27  ;;  %6773 = vst [vmem:[#allocation22_spill] sm:$0xff] %v5601_v52  ;;  %6774 = vst [vmem:[#allocation23_spill] sm:$0xff] %v5606_v53  ;;  %v72_v24 = vrot.slane %v67_v15, %v5392_v4  ;;  %vm4025_vm13 = vcmask 1044480   ;;  %vm4030_vm14 = vcmask 1045504   ;;  %vm4035_vm15 = vcmask 1046528  }
  0x25   :  { %4893 = vmatprep.subr.bf16.mxu0 %v6741_v1  ;;  %6775 = vst [vmem:[#allocation24_spill] sm:$0xff] %v5614_v55  ;;  %6776 = vst [vmem:[#allocation25_spill] sm:$0xff] %v5619_v56  ;;  %v146_v1 = vrot.slane %v5638_v7, %v5452_v20 }
  0x26   :  { %6777 = vst [vmem:[#allocation26_spill] sm:$0xff] %v5624_v57  ;;  %6778 = vst [vmem:[#allocation27_spill] sm:$0xff] %v5629_v58 }
  0x27   :  { %134 = vbcast.lane.b32.xlu0 %v5486_v28, 256  ;;  %4624 = vmatmul.mubr.f32.vlgmr.msra.gmra.mrb[0].mxu0 %v6739_v2  ;;  %6779 = vst [vmem:[#allocation28_spill] sm:$0xff] %v5634_v59 }
  0x28   :  { %141 = vbcast.lane.b32.xlu1 %v5494_v30, 256  ;;  %4668 = vmatprep.mubr.msk.f32.mxu0 %vm5309_vm0, %v6739_v2 }
  0x2b   :  { %160 = vbcast.lane.b32.xlu0 %v5501_v31, 256 }
  0x2c   :  { %167 = vbcast.lane.b32.xlu1 %v5507_v32, 256 }
  0x2f   :  { %174 = vbcast.lane.b32.xlu0 %v5514_v33, 256 }
  0x30   :  { %181 = vbcast.lane.b32.xlu1 %v5522_v35, 256 }
  0x33   :  { %200 = vbcast.lane.b32.xlu0 %v5527_v36, 256 }
  0x34   :  { %207 = vbcast.lane.b32.xlu1 %v5532_v37, 256 }
  0x37   :  { %214 = vbcast.lane.b32.xlu0 %v5537_v38, 256 }
  0x38   :  { %221 = vbcast.lane.b32.xlu1 %v5545_v40, 256 }
  0x3b   :  { %240 = vbcast.lane.b32.xlu0 %v5550_v41, 256 }
  0x3c   :  { %247 = vbcast.lane.b32.xlu1 %v5555_v42, 256 }
  0x3f   :  { %254 = vbcast.lane.b32.xlu0 %v5560_v43, 256 }
  0x40   :  { %261 = vbcast.lane.b32.xlu1 %v5568_v45, 256 }
  0x43   :  { %280 = vbcast.lane.b32.xlu0 %v5573_v46, 256 }
  0x44   :  { %287 = vbcast.lane.b32.xlu1 %v5578_v47, 256 }
  0x47   :  { %294 = vbcast.lane.b32.xlu0 %v5583_v48, 256 }
  0x48   :  { %301 = vbcast.lane.b32.xlu1 %v5591_v50, 256 }
  0x4b   :  { %320 = vbcast.lane.b32.xlu0 %v5596_v51, 256 }
  0x4c   :  { %327 = vbcast.lane.b32.xlu1 %v5601_v52, 256 }
  0x4f   :  { %334 = vbcast.lane.b32.xlu0 %v5606_v53, 256 }
  0x50   :  { %341 = vbcast.lane.b32.xlu1 %v5614_v55, 256 }
  0x53   :  { %360 = vbcast.lane.b32.xlu0 %v5619_v56, 256 }
  0x54   :  { %367 = vbcast.lane.b32.xlu1 %v5624_v57, 256 }
  0x57   :  { %374 = vbcast.lane.b32.xlu0 %v5629_v58, 256 }
  0x58   :  { %381 = vbcast.lane.b32.xlu1 %v5634_v59, 256 }
  0x8d   :  { %v81_v60 = vpop.permute.xlu0 %80  ;;  %v95_v61 = vpop.permute.xlu1 %94 }
  0x8e   :  { %v107_v2 = vmul.f32 %v106_v16, %v81_v60  ;;  %v109_v56 = vmul.f32 %v106_v16, %v95_v61  ;;  %v226_v60 = vrot.slane %v5638_v7, %v5517_v34 }
  0x90   :  { %v111_v57 = vadd.f32 %v107_v2, %v72_v24  ;;  %v113_v15 = vadd.f32 %v109_v56, %v72_v24 }
  0x91   :  { %v88_v62 = vpop.permute.xlu0 %87  ;;  %v102_v63 = vpop.permute.xlu1 %101 }
  0x92   :  { %v108_v0 = vmul.f32 %v106_v16, %v88_v62  ;;  %v110_v53 = vmul.f32 %v106_v16, %v102_v63 }
  0x94   :  { %v112_v10 = vadd.f32 %v108_v0, %v72_v24  ;;  %v114_v46 = vadd.f32 %v110_v53, %v72_v24  ;;  %v266_v0 = vrot.slane %v5638_v7, %v5540_v39 }
  0x95   :  { %v121_v5 = vpop.permute.xlu0 %120  ;;  %v128_v6 = vpop.permute.xlu1 %127 }
  0x96   :  { %v147_v55 = vmul.f32 %v146_v1, %v121_v5  ;;  %v148_v52 = vmul.f32 %v146_v1, %v128_v6 }
  0x98   :  { %v151_v48 = vadd.f32 %v147_v55, %v111_v57  ;;  %v152_v45 = vadd.f32 %v148_v52, %v112_v10 }
  0x99   :  { %v135_v13 = vpop.permute.xlu0 %134 }
  0x9a   :  { %v142_v14 = vpop.permute.xlu1 %141  ;;  %v149_v47 = vmul.f32 %v146_v1, %v135_v13 }
  0x9b   :  { %v150_v2 = vmul.f32 %v146_v1, %v142_v14 }
  0x9c   :  { %v153_v63 = vadd.f32 %v149_v47, %v113_v15  ;;  %v306_v47 = vrot.slane %v5638_v7, %v5563_v44  ;;  %v346_v44 = vrot.slane %v5638_v7, %v5586_v49 }
  0x9d   :  { %v161_v17 = vpop.permute.xlu0 %160  ;;  %v154_v41 = vadd.f32 %v150_v2, %v114_v46 }
  0x9e   :  { %v168_v23 = vpop.permute.xlu1 %167  ;;  %v187_v62 = vmul.f32 %v186_v9, %v161_v17 }
  0x9f   :  { %v188_v61 = vmul.f32 %v186_v9, %v168_v23 }
  0xa0   :  { %v191_v6 = vadd.f32 %v187_v62, %v151_v48 }
  0xa1   :  { %v175_v59 = vpop.permute.xlu0 %174  ;;  %v192_v40 = vadd.f32 %v188_v61, %v152_v45 }
  0xa2   :  { %v182_v58 = vpop.permute.xlu1 %181  ;;  %v189_v16 = vmul.f32 %v186_v9, %v175_v59 }
  0xa3   :  { %v190_v38 = vmul.f32 %v186_v9, %v182_v58 }
  0xa4   :  { %v193_v13 = vadd.f32 %v189_v16, %v153_v63 }
  0xa5   :  { %v201_v51 = vpop.permute.xlu0 %200  ;;  %v194_v14 = vadd.f32 %v190_v38, %v154_v41 }
  0xa6   :  { %v208_v50 = vpop.permute.xlu1 %207  ;;  %v227_v42 = vmul.f32 %v226_v60, %v201_v51 }
  0xa7   :  { %v228_v56 = vmul.f32 %v226_v60, %v208_v50 }
  0xa8   :  { %v231_v53 = vadd.f32 %v227_v42, %v191_v6 }
  0xa9   :  { %v215_v5 = vpop.permute.xlu0 %214  ;;  %v232_v17 = vadd.f32 %v228_v56, %v192_v40 }
  0xaa   :  { %v222_v43 = vpop.permute.xlu1 %221  ;;  %v229_v52 = vmul.f32 %v226_v60, %v215_v5 }
  0xab   :  { %v230_v23 = vmul.f32 %v226_v60, %v222_v43 }
  0xac   :  { %v233_v48 = vadd.f32 %v229_v52, %v193_v13 }
  0xad   :  { %v241_v55 = vpop.permute.xlu0 %240  ;;  %v234_v51 = vadd.f32 %v230_v23, %v194_v14 }
  0xae   :  { %v248_v57 = vpop.permute.xlu1 %247  ;;  %v267_v1 = vmul.f32 %v266_v0, %v241_v55 }
  0xaf   :  { %v268_v24 = vmul.f32 %v266_v0, %v248_v57 }
  0xb0   :  { %v271_v46 = vadd.f32 %v267_v1, %v231_v53  ;;  %v386_v1 = vrot.slane %v5638_v7, %v5609_v54  ;;  %v5311_v54 = vmov 1966171168  }
  0xb1   :  { %v255_v10 = vpop.permute.xlu0 %254  ;;  %v272_v50 = vadd.f32 %v268_v24, %v232_v17  ;;  %v471_v7 = vunpack.c.l.s4 %v5311_v54 }
  0xb2   :  { %v262_v39 = vpop.permute.xlu1 %261  ;;  %v269_v45 = vmul.f32 %v266_v0, %v255_v10 }
  0xb3   :  { %v270_v58 = vmul.f32 %v266_v0, %v262_v39 }
  0xb4   :  { %v273_v62 = vadd.f32 %v269_v45, %v233_v48 }
  0xb5   :  { %v281_v59 = vpop.permute.xlu0 %280  ;;  %v274_v40 = vadd.f32 %v270_v58, %v234_v51 }
  0xb6   :  { %v307_v9 = vmul.f32 %v306_v47, %v281_v59  ;;  %v288_v42 = vpop.permute.xlu1 %287 }
  0xb7   :  { %v308_v15 = vmul.f32 %v306_v47, %v288_v42 }
  0xb8   :  { %v311_v38 = vadd.f32 %v307_v9, %v271_v46  ;;  %v472_v9 = vunpack.c.0.s8 %v471_v7 }
  0xb9   :  { %v312_v41 = vadd.f32 %v308_v15, %v272_v50  ;;  %v295_v43 = vpop.permute.xlu0 %294 }
  0xba   :  { %v309_v60 = vmul.f32 %v306_v47, %v295_v43  ;;  %v302_v2 = vpop.permute.xlu1 %301  ;;  %v5672_v42 = vsub.s32 %v472_v9, %v5386_v3 }
  0xbb   :  { %v310_v61 = vmul.f32 %v306_v47, %v302_v2 }
  0xbc   :  { %v313_v5 = vadd.f32 %v309_v60, %v273_v62 }
  0xbd   :  { %v314_v63 = vadd.f32 %v310_v61, %v274_v40  ;;  %v321_v6 = vpop.permute.xlu0 %320 }
  0xbe   :  { %v347_v16 = vmul.f32 %v346_v44, %v321_v6  ;;  %v328_v0 = vpop.permute.xlu1 %327 }
  0xbf   :  { %v348_v56 = vmul.f32 %v346_v44, %v328_v0 }
  0xc0   :  { %v351_v55 = vadd.f32 %v347_v16, %v311_v38 }
  0xc1   :  { %v352_v57 = vadd.f32 %v348_v56, %v312_v41  ;;  %v335_v13 = vpop.permute.xlu0 %334 }
  0xc2   :  { %v349_v53 = vmul.f32 %v346_v44, %v335_v13  ;;  %v342_v52 = vpop.permute.xlu1 %341 }
  0xc3   :  { %v350_v14 = vmul.f32 %v346_v44, %v342_v52 }
  0xc4   :  { %v353_v17 = vadd.f32 %v349_v53, %v313_v5 }
  0xc5   :  { %v354_v23 = vadd.f32 %v350_v14, %v314_v63  ;;  %v361_v24 = vpop.permute.xlu0 %360 }
  0xc6   :  { %v387_v49 = vmul.f32 %v386_v1, %v361_v24  ;;  %v368_v10 = vpop.permute.xlu1 %367 }
  0xc7   :  { %v388_v39 = vmul.f32 %v386_v1, %v368_v10 }
  0xc8   :  { %v5663_v47 = vadd.f32 %v387_v49, %v351_v55  ;;  %v5688_v55 = vld [vmem:[%s6734_s5] ss:$0 sm:$0xff] }
  0xc9   :  { %v5665_v48 = vadd.f32 %v388_v39, %v352_v57  ;;  %v375_v46 = vpop.permute.xlu0 %374 }
  0xca   :  { %v389_v45 = vmul.f32 %v386_v1, %v375_v46  ;;  %v382_v51 = vpop.permute.xlu1 %381  ;;  %v6780_v46 = vlaneseq }
  0xcb   :  { %v390_v50 = vmul.f32 %v386_v1, %v382_v51 }
  0xcc   :  { %v5667_v58 = vadd.f32 %v389_v45, %v353_v17  ;;  %v550_v45 = vand.u32 127, %v6780_v46 }
  0xcd   :  { %v5669_v59 = vadd.f32 %v390_v50, %v354_v23 }
  0xce   :  { %v5700_v50 = vsub.s32 %v550_v45, %v5386_v3 }
  0xfa   :  { %v465_v15 = vpop.f32.mrb[0].mxu0 }
  0xfb   :  { %v476_v62 = vrot.slane %v465_v15, %v5672_v42  ;;  %v4625_v38 = vpop.f32.mrb[1].mxu0 }
  0xfd   :  { %v477_v40 = vcombine.high %v476_v62, %v476_v62  ;;  %v484_v41 = vrot.slane %v476_v62, %v5672_v42 }
  0xff   :  { %v491_v43 = vrot.slane %v477_v40, %v5672_v42  ;;  %v492_v60 = vcombine.high %v484_v41, %v484_v41  ;;  %v497_v2 = vrot.slane %v484_v41, %v5392_v4 }
 0x101   :  { %v493_v44 = vcombine.high %v491_v43, %v491_v43  ;;  %v501_v61 = vrot.slane %v491_v43, %v5392_v4  ;;  %v505_v5 = vrot.slane %v492_v60, %v5392_v4  ;;  %v514_v63 = vadd.f32 %v497_v2, %v5663_v47 }
 0x102   :  { %v5312_v2 = vmov 0  }
 0x103   :  { %v509_v6 = vrot.slane %v493_v44, %v5392_v4  ;;  %v515_v16 = vadd.f32 %v501_v61, %v5665_v48  ;;  %v516_v0 = vadd.f32 %v505_v5, %v5667_v58  ;;  %5022 = vtanh.f32 %v514_v63  ;;  %5021 = vset.pattern.permute.xlu1 %v5312_v2  ;;  %5020 = vset.pattern.permute.xlu0 %v5312_v2 }
 0x105   :  { %v517_v56 = vadd.f32 %v509_v6, %v5669_v59  ;;  %5024 = vtanh.f32 %v515_v16 }
 0x106   :  { %5026 = vtanh.f32 %v516_v0 }
 0x107   :  { %5028 = vtanh.f32 %v517_v56 }
 0x10d   :  { %v5023_v57 = vpop.eup %5022 }
 0x10e   :  { %v528_v13 = vmul.f32 %v5023_v57, %v5688_v55 }
 0x10f   :  { %v5025_v53 = vpop.eup %5024 }
 0x110   :  { %v5027_v52 = vpop.eup %5026  ;;  %v533_v1 = vsel %vm532_vm1, %v528_v13, 0.0  ;;  %v529_v14 = vmul.f32 %v5025_v53, %v5688_v55 }
 0x111   :  { %v5029_v17 = vpop.eup %5028  ;;  %534 = vadd.xlane.f32.xlu0 %v533_v1  ;;  %v530_v23 = vmul.f32 %v5027_v52, %v5688_v55 }
 0x112   :  { %v536_v24 = vsel %vm532_vm1, %v529_v14, 0.0  ;;  %v531_v10 = vmul.f32 %v5029_v17, %v5688_v55 }
 0x113   :  { %537 = vadd.xlane.f32.xlu1 %v536_v24  ;;  %v539_v49 = vsel %vm532_vm1, %v530_v23, 0.0 }
 0x114   :  { %v542_v39 = vsel %vm532_vm1, %v531_v10, 0.0 }
 0x115   :  { %540 = vadd.xlane.f32.xlu0 %v539_v49 }
 0x119   :  { %543 = vadd.xlane.f32.xlu0 %v542_v39 }
 0x19e   :  { %v535_v51 = vpop.xlane.xlu0 %534 }
 0x19f   :  { %v554_v15 = vrot.slane %v535_v51, %v5700_v50 }
 0x1a0   :  { %v538_v54 = vpop.xlane.xlu1 %537 }
 0x1a1   :  { %v558_v7 = vrot.slane %v538_v54, %v5700_v50 }
 0x1a2   :  { %v541_v9 = vpop.xlane.xlu0 %540 }
 0x1a3   :  { %v562_v62 = vrot.slane %v541_v9, %v5700_v50  ;;  %v568_v38 = vsel %vm567_vm2, %v558_v7, %v554_v15 }
 0x1a5   :  { %v570_v3 = vsel %vm569_vm3, %v562_v62, %v568_v38 }
 0x1a6   :  { %v544_v40 = vpop.xlane.xlu0 %543 }
 0x1a7   :  { %v566_v41 = vrot.slane %v544_v40, %v5700_v50 }
 0x1a9   :  { %v572_v43 = vsel %vm571_vm4, %v566_v41, %v570_v3 }
 0x1aa   :  { %v575_v60 = vsel %vm574_vm5, %v572_v43, -inf }
 0x1ab   :  { %576 = vmax.xlane.f32.xlu1 %v575_v60 }
 0x238   :  { %v577_v44 = vpop.xlane.xlu1 %576 }
 0x239   :  { %v582_v61 = vrot.slane %v577_v44, %v5392_v4  ;;  %v586_v5 = vrot.slane %v577_v44, %v5452_v20  ;;  %v590_v63 = vrot.slane %v577_v44, %v5489_v29  ;;  %v594_v0 = vrot.slane %v577_v44, %v5517_v34 }
 0x23b   :  { %v599_v6 = vsub.f32 %v535_v51, %v582_v61  ;;  %v600_v16 = vsub.f32 %v538_v54, %v586_v5  ;;  %v601_v56 = vsub.f32 %v541_v9, %v590_v63  ;;  %v602_v53 = vsub.f32 %v544_v40, %v594_v0  ;;  %v59_v0 = vld [vmem:[%s6735_s6] sm:$0xff] }
 0x23d   :  { %v603_v57 = vmul.f32 1.442695, %v599_v6  ;;  %v605_v13 = vmul.f32 1.442695, %v600_v16  ;;  %v607_v52 = vmul.f32 1.442695, %v601_v56 }
 0x23e   :  { %v609_v1 = vmul.f32 1.442695, %v602_v53  ;;  %v60_v56 = vld [vmem:[%s6735_s6 + $0x8] sm:$0xff] }
 0x23f   :  { %5030 = vpow2.f32 %v603_v57 }
 0x240   :  { %5032 = vpow2.f32 %v605_v13  ;;  %v5736_v13 = vpack.c.bf16 %v60_v56, %v59_v0 }
 0x241   :  { %5034 = vpow2.f32 %v607_v52  ;;  %v6781_v52 = vmov 0.0|0.0  }
 0x242   :  { %5036 = vpow2.f32 %v609_v1  ;;  %4877 = vmatpush3.bf16.msra.mxu1 %v5736_v13  ;;  %4895 = vmatpush3.bf16.msra.mxu0 %v5736_v13  ;;  %v61_v1 = vld [vmem:[%s6735_s6 + $0x10] sm:$0xff] }
 0x243   :  { %4878 = vmatprep.subr.bf16.mxu1 %v6781_v52  ;;  %4896 = vmatprep.subr.bf16.mxu0 %v6781_v52 }
 0x249   :  { %v5031_v14 = vpop.eup %5030 }
 0x24a   :  { %v5033_v17 = vpop.eup %5032  ;;  %616 = vperm.xlu0 %5020, %v5031_v14  }
 0x24b   :  { %619 = vperm.xlu1 %5021, %v5033_v17   ;;  %v5035_v23 = vpop.eup %5034 }
 0x24c   :  { %v5037_v24 = vpop.eup %5036 }
 0x24e   :  { %685 = vbcast.lane.b32.xlu0 %v5418_v12, 256 }
 0x24f   :  { %622 = vperm.xlu1 %5021, %v5035_v23  }
 0x252   :  { %692 = vbcast.lane.b32.xlu0 %v5449_v19, 256 }
 0x253   :  { %625 = vperm.xlu1 %5021, %v5037_v24  }
 0x256   :  { %699 = vbcast.lane.b32.xlu0 %v5444_v18, 256 }
 0x25a   :  { %706 = vbcast.lane.b32.xlu0 %v5457_v21, 256 }
 0x2c9   :  { %v617_v10 = vpop.permute.xlu0 %616 }
 0x2ca   :  { %v620_v49 = vpop.permute.xlu1 %619  ;;  %v630_v45 = vrot.slane %v617_v10, %v5700_v50 }
 0x2cb   :  { %v634_v46 = vrot.slane %v620_v49, %v5700_v50 }
 0x2cd   :  { %v643_v7 = vsel %vm567_vm2, %v634_v46, %v630_v45  ;;  %v686_v15 = vpop.permute.xlu0 %685 }
 0x2ce   :  { %v623_v39 = vpop.permute.xlu1 %622 }
 0x2cf   :  { %v638_v51 = vrot.slane %v623_v39, %v5700_v50 }
 0x2d1   :  { %v644_v19 = vsel %vm569_vm3, %v638_v51, %v643_v7  ;;  %v693_v62 = vpop.permute.xlu0 %692 }
 0x2d2   :  { %v626_v54 = vpop.permute.xlu1 %625 }
 0x2d3   :  { %v642_v12 = vrot.slane %v626_v54, %v5700_v50 }
 0x2d5   :  { %v645_v18 = vsel %vm571_vm4, %v642_v12, %v644_v19  ;;  %v700_v2 = vpop.permute.xlu0 %699 }
 0x2d6   :  { %v647_v21 = vsel %vm574_vm5, %v645_v18, 0.0 }
 0x2d7   :  { %648 = vadd.xlane.f32.xlu1 %v647_v21 }
 0x2d9   :  { %v707_v57 = vpop.permute.xlu0 %706 }
 0x364   :  { %v649_v9 = vpop.xlane.xlu1 %648 }
 0x365   :  { %5038 = vrcp.f32 %v649_v9  ;;  %v5797_v9 = vld [vmem:[%s6736_s7] ss:$0 sm:$0xff] }
 0x36f   :  { %v5039_v38 = vpop.eup %5038 }
 0x370   :  { %v655_v40 = vrot.slane %v5039_v38, %v5392_v4  ;;  %v659_v41 = vrot.slane %v5039_v38, %v5452_v20  ;;  %v663_v3 = vrot.slane %v5039_v38, %v5489_v29  ;;  %v667_v63 = vrot.slane %v5039_v38, %v5517_v34 }
 0x372   :  { %v672_v43 = vmul.f32 %v5031_v14, %v655_v40  ;;  %v673_v60 = vmul.f32 %v5033_v17, %v659_v41  ;;  %v674_v5 = vmul.f32 %v5035_v23, %v663_v3  ;;  %v675_v16 = vmul.f32 %v5037_v24, %v667_v63  ;;  %v62_v14 = vld [vmem:[%s6735_s6 + $0x18] sm:$0xff]  ;;  %v5756_v24 = vld [vmem:[%s6735_s6 + $0x20] sm:$0xff] }
 0x373   :  { %v5748_v17 = vpack.c.bf16 %v62_v14, %v61_v1  ;;  %v6782_v23 = vmov 0.0  }
 0x374   :  { %v712_v44 = vmul.f32 %v686_v15, %v672_v43  ;;  %v713_v61 = vmul.f32 %v693_v62, %v673_v60  ;;  %v714_v6 = vmul.f32 %v700_v2, %v674_v5  ;;  %v715_v53 = vmul.f32 %v707_v57, %v675_v16 }
 0x375   :  { %4880 = vmatpush3.bf16.msra.mxu1 %v5748_v17  ;;  %4898 = vmatpush3.bf16.msra.mxu0 %v5748_v17 }
 0x376   :  { %721 = vperm.xlu0 %5020, %v712_v44   ;;  %724 = vperm.xlu1 %5021, %v713_v61  }
 0x377   :  { %4634 = vmatprep.subr.mxu1 %v6782_v23  ;;  %4666 = vmatprep.subr.mxu0 %v6782_v23 }
 0x379   :  { %4635 = vmatpush3.msra.mxu1 %v5756_v24  ;;  %4667 = vmatpush3.msra.mxu0 %v5756_v24 }
 0x37a   :  { %727 = vperm.xlu0 %5020, %v714_v6   ;;  %4881 = vmatprep.subr.bf16.mxu1 %v6781_v52 }
 0x37b   :  { %4899 = vmatprep.subr.bf16.mxu0 %v6781_v52 }
 0x37e   :  { %730 = vperm.xlu0 %5020, %v715_v53  }
 0x3f5   :  { %v722_v49 = vpop.permute.xlu0 %721  ;;  %v725_v10 = vpop.permute.xlu1 %724 }
 0x3f6   :  { %v5764_v46 = vrot.slane %v725_v10, %v5700_v50  ;;  %v5767_v45 = vrot.slane %v722_v49, %v5700_v50 }
 0x3f8   :  { %v748_v12 = vsel %vm567_vm2, %v5764_v46, %v5767_v45 }
 0x3f9   :  { %v728_v39 = vpop.permute.xlu0 %727 }
 0x3fa   :  { %v5770_v51 = vrot.slane %v728_v39, %v5700_v50 }
 0x3fc   :  { %v749_v19 = vsel %vm569_vm3, %v5770_v51, %v748_v12 }
 0x3fd   :  { %v731_v54 = vpop.permute.xlu0 %730 }
 0x3fe   :  { %v5776_v7 = vrot.slane %v731_v54, %v5700_v50 }
 0x400   :  { %v750_v18 = vsel %vm571_vm4, %v5776_v7, %v749_v19 }
 0x401   :  { %v752_v21 = vsel %vm532_vm1, %v750_v18, 0.0 }
 0x402   :  { %4637 = vmatmul.mubr.msk.f32.vlgmr.msra.gmra.mrb[0].mxu1 %vm759_vm6, %v752_v21 }
 0x403   :  { %4883 = vmatpush3.bf16.msra.mxu1 %v5403_v8  ;;  %4655 = vmatprep.mubr.msk.f32.mxu1 %vm5309_vm0, %v6782_v23 }
 0x404   :  { %4884 = vmatprep.subr.bf16.mxu1 %v6781_v52 }
 0x407   :  { %4886 = vmatpush3.bf16.msra.mxu1 %v5414_v11 }
 0x408   :  { %4887 = vmatprep.subr.bf16.mxu1 %v6781_v52 }
 0x40b   :  { %4889 = vmatpush3.bf16.msra.mxu1 %v5460_v22 }
 0x40c   :  { %4890 = vmatprep.subr.bf16.mxu1 %v6781_v52 }
 0x40f   :  { %4892 = vmatpush3.bf16.msra.mxu1 %v5480_v27 }
 0x410   :  { %4911 = vmatprep.subr.bf16.mxu1 %v6781_v52 }
 0x4d5   :  { %v829_v15 = vpop.f32.mrb[0].mxu1 }
 0x4d6   :  { %v830_v62 = vadd.f32 %v5797_v9, %v829_v15  ;;  %v4638_v38 = vpop.f32.mrb[1].mxu1 }
 0x4d8   :  { %5040 = vtanh.f32 %v830_v62  ;;  %v4465_v41 = vmul.f32 -1.442695, %v830_v62 }
 0x4da   :  { %5042 = vpow2.f32 %v4465_v41 }
 0x4e2   :  { %v5041_v40 = vpop.eup %5040 }
 0x4e3   :  { %842 = vrot.lane.b32.xlu0 %v5041_v40, %s5313_s15 }
 0x4e4   :  { %v5043_v3 = vpop.eup %5042 }
 0x4e5   :  { %v836_v43 = vadd.f32 1.0, %v5043_v3 }
 0x4e7   :  { %5044 = vrcp.f32 %v836_v43 }
 0x4f1   :  { %v5045_v60 = vpop.eup %5044 }
 0x4f2   :  { %v840_v61 = vmul.f32 0.0, %v5045_v60 }
 0x555   :  { %v843_v2 = vpop.permute.xlu0 %842 }
 0x556   :  { %v845_v44 = vmul.f32 %v5045_v60, %v843_v2 }
 0x558   :  { %847 = vrot.lane.b32.xlu0 %v845_v44, %s5314_s16 }
 0x5ca   :  { %v848_v5 = vpop.permute.xlu0 %847 }
 0x5cb   :  { %v5802_v63 = vadd.f32 %v848_v5, %v840_v61 }
 0x5cd   :  { %5046 = vtanh.f32 %v5802_v63 }
 0x5d7   :  { %v5047_v6 = vpop.eup %5046 }
 0x5d8   :  { %853 = vrot.lane.b32.xlu1 %v5047_v6, %s5313_s15 }
 0x64a   :  { %v854_v16 = vpop.permute.xlu1 %853 }
 0x64b   :  { %v5806_v0 = vmul.f32 %v5045_v60, %v854_v16 }
 0x64d   :  { %858 = vrot.lane.b32.xlu0 %v5806_v0, %s5314_s16 }
 0x6bf   :  { %v859_v56 = vpop.permute.xlu0 %858 }
 0x6c0   :  { %v862_v57 = vsel %vm861_vm7, %v859_v56, %v5802_v63 }
 0x6c1   :  { %4656 = vmatmul.mubr.msk.f32.vlgmr.msra.gmra.mrb[2].mxu1 %vm395_vm8, %v862_v57 }
 0x6c2   :  { %4913 = vmatpush3.bf16.msra.mxu1 %v5736_v13  ;;  %4700 = vmatprep.mubr.msk.f32.mxu1 %vm5309_vm0, %v6782_v23 }
 0x6c3   :  { %4914 = vmatprep.subr.bf16.mxu1 %v6781_v52 }
 0x6c6   :  { %4916 = vmatpush3.bf16.msra.mxu1 %v5748_v17 }
 0x6c7   :  { %4698 = vmatprep.subr.mxu1 %v6782_v23 }
 0x6ca   :  { %4699 = vmatpush3.msra.mxu1 %v5756_v24 }
 0x6cb   :  { %4917 = vmatprep.subr.bf16.mxu1 %v6781_v52 }
 0x794   :  { %v932_v53 = vpop.f32.mrb[2].mxu1 }
 0x795   :  { %v943_v1 = vrot.slane %v932_v53, %v5672_v42  ;;  %v4657_v14 = vpop.f32.mrb[3].mxu1 }
 0x797   :  { %v944_v49 = vcombine.high %v943_v1, %v943_v1  ;;  %v951_v10 = vrot.slane %v943_v1, %v5672_v42 }
 0x799   :  { %v958_v39 = vrot.slane %v944_v49, %v5672_v42  ;;  %v959_v54 = vcombine.high %v951_v10, %v951_v10  ;;  %v964_v12 = vrot.slane %v951_v10, %v5392_v4 }
 0x79b   :  { %v960_v19 = vcombine.high %v958_v39, %v958_v39  ;;  %v968_v18 = vrot.slane %v958_v39, %v5392_v4  ;;  %v972_v21 = vrot.slane %v959_v54, %v5392_v4  ;;  %v981_v15 = vadd.f32 %v964_v12, %v5663_v47 }
 0x79d   :  { %v976_v62 = vrot.slane %v960_v19, %v5392_v4  ;;  %v982_v38 = vadd.f32 %v968_v18, %v5665_v48  ;;  %v983_v40 = vadd.f32 %v972_v21, %v5667_v58  ;;  %5048 = vtanh.f32 %v981_v15 }
 0x79f   :  { %v984_v41 = vadd.f32 %v976_v62, %v5669_v59  ;;  %5050 = vtanh.f32 %v982_v38 }
 0x7a0   :  { %5052 = vtanh.f32 %v983_v40 }
 0x7a1   :  { %5054 = vtanh.f32 %v984_v41 }
 0x7a7   :  { %v5049_v3 = vpop.eup %5048 }
 0x7a8   :  { %v989_v43 = vmul.f32 %v5049_v3, %v5688_v55 }
 0x7a9   :  { %v5051_v60 = vpop.eup %5050 }
 0x7aa   :  { %v5053_v2 = vpop.eup %5052  ;;  %v993_v44 = vsel %vm532_vm1, %v989_v43, 0.0  ;;  %v990_v61 = vmul.f32 %v5051_v60, %v5688_v55 }
 0x7ab   :  { %994 = vadd.xlane.f32.xlu1 %v993_v44  ;;  %v991_v6 = vmul.f32 %v5053_v2, %v5688_v55  ;;  %v5055_v16 = vpop.eup %5054 }
 0x7ac   :  { %v996_v5 = vsel %vm532_vm1, %v990_v61, 0.0  ;;  %v992_v57 = vmul.f32 %v5055_v16, %v5688_v55 }
 0x7ad   :  { %997 = vadd.xlane.f32.xlu0 %v996_v5  ;;  %v999_v56 = vsel %vm532_vm1, %v991_v6, 0.0 }
 0x7ae   :  { %v1002_v53 = vsel %vm532_vm1, %v992_v57, 0.0 }
 0x7b1   :  { %1000 = vadd.xlane.f32.xlu0 %v999_v56 }
 0x7b5   :  { %1003 = vadd.xlane.f32.xlu0 %v1002_v53 }
 0x838   :  { %v995_v14 = vpop.xlane.xlu1 %994 }
 0x839   :  { %v1012_v54 = vrot.slane %v995_v14, %v5700_v50 }
 0x83a   :  { %v998_v1 = vpop.xlane.xlu0 %997 }
 0x83b   :  { %v1016_v10 = vrot.slane %v998_v1, %v5700_v50 }
 0x83d   :  { %v1025_v18 = vsel %vm567_vm2, %v1016_v10, %v1012_v54 }
 0x83e   :  { %v1001_v49 = vpop.xlane.xlu0 %1000 }
 0x83f   :  { %v1020_v39 = vrot.slane %v1001_v49, %v5700_v50 }
 0x841   :  { %v1026_v21 = vsel %vm569_vm3, %v1020_v39, %v1025_v18 }
 0x842   :  { %v1004_v12 = vpop.xlane.xlu0 %1003 }
 0x843   :  { %v1024_v19 = vrot.slane %v1004_v12, %v5700_v50 }
 0x845   :  { %v1027_v15 = vsel %vm571_vm4, %v1024_v19, %v1026_v21 }
 0x846   :  { %v1029_v62 = vsel %vm574_vm5, %v1027_v15, -inf }
 0x847   :  { %1030 = vmax.xlane.f32.xlu1 %v1029_v62 }
 0x8d4   :  { %v1031_v38 = vpop.xlane.xlu1 %1030 }
 0x8d5   :  { %v1036_v40 = vrot.slane %v1031_v38, %v5392_v4  ;;  %v1040_v41 = vrot.slane %v1031_v38, %v5452_v20  ;;  %v1044_v3 = vrot.slane %v1031_v38, %v5489_v29  ;;  %v1048_v2 = vrot.slane %v1031_v38, %v5517_v34 }
 0x8d7   :  { %v1053_v43 = vsub.f32 %v995_v14, %v1036_v40  ;;  %v1054_v60 = vsub.f32 %v998_v1, %v1040_v41  ;;  %v1055_v44 = vsub.f32 %v1001_v49, %v1044_v3  ;;  %v1056_v6 = vsub.f32 %v1004_v12, %v1048_v2 }
 0x8d9   :  { %v1057_v61 = vmul.f32 1.442695, %v1053_v43  ;;  %v1059_v5 = vmul.f32 1.442695, %v1054_v60  ;;  %v1061_v16 = vmul.f32 1.442695, %v1055_v44 }
 0x8da   :  { %v1063_v56 = vmul.f32 1.442695, %v1056_v6 }
 0x8db   :  { %5056 = vpow2.f32 %v1057_v61 }
 0x8dc   :  { %5058 = vpow2.f32 %v1059_v5 }
 0x8dd   :  { %5060 = vpow2.f32 %v1061_v16 }
 0x8de   :  { %5062 = vpow2.f32 %v1063_v56 }
 0x8e5   :  { %v5057_v57 = vpop.eup %5056 }
 0x8e6   :  { %v5059_v53 = vpop.eup %5058  ;;  %1070 = vperm.xlu0 %5020, %v5057_v57  }
 0x8e7   :  { %1073 = vperm.xlu1 %5021, %v5059_v53   ;;  %v5061_v10 = vpop.eup %5060 }
 0x8e8   :  { %v5063_v14 = vpop.eup %5062 }
 0x8eb   :  { %1076 = vperm.xlu1 %5021, %v5061_v10  }
 0x8ef   :  { %1079 = vperm.xlu1 %5021, %v5063_v14  }
 0x8f3   :  { %1135 = vbcast.lane.b32.xlu1 %v5472_v25, 256 }
 0x8f7   :  { %1142 = vbcast.lane.b32.xlu1 %v5477_v26, 256 }
 0x8fb   :  { %1149 = vbcast.lane.b32.xlu1 %v5486_v28, 256 }
 0x8ff   :  { %1156 = vbcast.lane.b32.xlu1 %v5494_v30, 256 }
 0x965   :  { %v1071_v49 = vpop.permute.xlu0 %1070 }
 0x966   :  { %v1074_v1 = vpop.permute.xlu1 %1073  ;;  %v1084_v12 = vrot.slane %v1071_v49, %v5700_v50 }
 0x967   :  { %v1088_v54 = vrot.slane %v1074_v1, %v5700_v50 }
 0x969   :  { %v1097_v25 = vsel %vm567_vm2, %v1088_v54, %v1084_v12 }
 0x96a   :  { %v1077_v39 = vpop.permute.xlu1 %1076 }
 0x96b   :  { %v1092_v19 = vrot.slane %v1077_v39, %v5700_v50 }
 0x96d   :  { %v1098_v26 = vsel %vm569_vm3, %v1092_v19, %v1097_v25 }
 0x96e   :  { %v1080_v18 = vpop.permute.xlu1 %1079 }
 0x96f   :  { %v1096_v21 = vrot.slane %v1080_v18, %v5700_v50 }
 0x971   :  { %v1099_v28 = vsel %vm571_vm4, %v1096_v21, %v1098_v26 }
 0x972   :  { %v1101_v30 = vsel %vm574_vm5, %v1099_v28, 0.0  ;;  %v1136_v15 = vpop.permute.xlu1 %1135 }
 0x973   :  { %1102 = vadd.xlane.f32.xlu0 %v1101_v30 }
 0x976   :  { %v1143_v38 = vpop.permute.xlu1 %1142 }
 0x97a   :  { %v1150_v40 = vpop.permute.xlu1 %1149 }
 0x97e   :  { %v1157_v2 = vpop.permute.xlu1 %1156 }
 0xa00   :  { %v1103_v62 = vpop.xlane.xlu0 %1102 }
 0xa01   :  { %5064 = vrcp.f32 %v1103_v62 }
 0xa0b   :  { %v5065_v41 = vpop.eup %5064 }
 0xa0c   :  { %v1109_v3 = vrot.slane %v5065_v41, %v5392_v4  ;;  %v1113_v43 = vrot.slane %v5065_v41, %v5452_v20  ;;  %v1121_v60 = vrot.slane %v5065_v41, %v5517_v34  ;;  %v1117_v16 = vrot.slane %v5065_v41, %v5489_v29 }
 0xa0e   :  { %v1126_v44 = vmul.f32 %v5057_v57, %v1109_v3  ;;  %v1129_v61 = vmul.f32 %v5063_v14, %v1121_v60  ;;  %v1127_v6 = vmul.f32 %v5059_v53, %v1113_v43  ;;  %v1128_v49 = vmul.f32 %v5061_v10, %v1117_v16 }
 0xa10   :  { %v1162_v5 = vmul.f32 %v1136_v15, %v1126_v44  ;;  %v1165_v56 = vmul.f32 %v1157_v2, %v1129_v61  ;;  %v1163_v1 = vmul.f32 %v1143_v38, %v1127_v6  ;;  %v1164_v39 = vmul.f32 %v1150_v40, %v1128_v49 }
 0xa12   :  { %1180 = vperm.xlu0 %5020, %v1165_v56   ;;  %1171 = vperm.xlu1 %5021, %v1162_v5  }
 0xa16   :  { %1174 = vperm.xlu1 %5021, %v1163_v1  }
 0xa1a   :  { %1177 = vperm.xlu1 %5021, %v1164_v39  }
 0xa1e   :  { %1202 = vrot.lane.b32.xlu1 %v5806_v0, %s5315_s17 }
 0xa91   :  { %v1172_v54 = vpop.permute.xlu1 %1171  ;;  %v1181_v53 = vpop.permute.xlu0 %1180 }
 0xa92   :  { %v5874_v14 = vrot.slane %v1172_v54, %v5700_v50  ;;  %v5880_v10 = vrot.slane %v1181_v53, %v5700_v50 }
 0xa95   :  { %v1175_v12 = vpop.permute.xlu1 %1174 }
 0xa96   :  { %v5871_v57 = vrot.slane %v1175_v12, %v5700_v50 }
 0xa98   :  { %v1198_v21 = vsel %vm567_vm2, %v5871_v57, %v5874_v14 }
 0xa99   :  { %v1178_v19 = vpop.permute.xlu1 %1177 }
 0xa9a   :  { %v5877_v18 = vrot.slane %v1178_v19, %v5700_v50 }
 0xa9c   :  { %v1199_v25 = vsel %vm569_vm3, %v5877_v18, %v1198_v21 }
 0xa9d   :  { %v1200_v26 = vsel %vm571_vm4, %v5880_v10, %v1199_v25  ;;  %v1203_v28 = vpop.permute.xlu1 %1202 }
 0xa9e   :  { %v1205_v30 = vsel %vm532_vm1, %v1200_v26, %v1203_v28 }
 0xa9f   :  { %4669 = vmatmul.mubr.msk.f32.vlgmr.msra.gmra.mrb[2].mxu0 %vm759_vm6, %v1205_v30 }
 0xaa0   :  { %4901 = vmatpush3.bf16.msra.mxu0 %v5403_v8  ;;  %4687 = vmatprep.mubr.msk.f32.mxu0 %vm5309_vm0, %v6782_v23 }
 0xaa1   :  { %4902 = vmatprep.subr.bf16.mxu0 %v6781_v52 }
 0xaa4   :  { %4904 = vmatpush3.bf16.msra.mxu0 %v5414_v11 }
 0xaa5   :  { %4905 = vmatprep.subr.bf16.mxu0 %v6781_v52 }
 0xaa8   :  { %4907 = vmatpush3.bf16.msra.mxu0 %v5460_v22 }
 0xaa9   :  { %4908 = vmatprep.subr.bf16.mxu0 %v6781_v52 }
 0xaac   :  { %4910 = vmatpush3.bf16.msra.mxu0 %v5480_v27 }
 0xaad   :  { %4929 = vmatprep.subr.bf16.mxu0 %v6781_v52 }
 0xb72   :  { %v1275_v15 = vpop.f32.mrb[2].mxu0 }
 0xb73   :  { %v1276_v62 = vadd.f32 %v5797_v9, %v1275_v15  ;;  %v4670_v38 = vpop.f32.mrb[3].mxu0 }
 0xb75   :  { %5066 = vtanh.f32 %v1276_v62  ;;  %v4468_v41 = vmul.f32 -1.442695, %v1276_v62 }
 0xb77   :  { %5068 = vpow2.f32 %v4468_v41 }
 0xb7f   :  { %v5067_v40 = vpop.eup %5066 }
 0xb80   :  { %1288 = vrot.lane.b32.xlu1 %v5067_v40, %s5313_s15 }
 0xb81   :  { %v5069_v3 = vpop.eup %5068 }
 0xb82   :  { %v1282_v43 = vadd.f32 1.0, %v5069_v3 }
 0xb84   :  { %5070 = vrcp.f32 %v1282_v43 }
 0xb8e   :  { %v5071_v60 = vpop.eup %5070 }
 0xb8f   :  { %v1286_v61 = vmul.f32 %v5071_v60, %v5802_v63 }
 0xbf2   :  { %v1289_v2 = vpop.permute.xlu1 %1288 }
 0xbf3   :  { %v1291_v44 = vmul.f32 %v5071_v60, %v1289_v2 }
 0xbf5   :  { %1293 = vrot.lane.b32.xlu1 %v1291_v44, %s5314_s16 }
 0xc67   :  { %v1294_v5 = vpop.permute.xlu1 %1293 }
 0xc68   :  { %v5905_v6 = vadd.f32 %v1294_v5, %v1286_v61 }
 0xc6a   :  { %5072 = vtanh.f32 %v5905_v6 }
 0xc74   :  { %v5073_v16 = vpop.eup %5072 }
 0xc75   :  { %1299 = vrot.lane.b32.xlu1 %v5073_v16, %s5313_s15 }
 0xce7   :  { %v1300_v56 = vpop.permute.xlu1 %1299 }
 0xce8   :  { %v5909_v1 = vmul.f32 %v5071_v60, %v1300_v56 }
 0xcea   :  { %1304 = vrot.lane.b32.xlu1 %v5909_v1, %s5314_s16 }
 0xd5c   :  { %v1305_v49 = vpop.permute.xlu1 %1304 }
 0xd5d   :  { %v1307_v39 = vsel %vm861_vm7, %v1305_v49, %v5905_v6 }
 0xd5e   :  { %4688 = vmatmul.mubr.msk.f32.vlgmr.msra.gmra.mrb[4].mxu0 %vm395_vm8, %v1307_v39 }
 0xd5f   :  { %4931 = vmatpush3.bf16.msra.mxu0 %v5736_v13  ;;  %4732 = vmatprep.mubr.msk.f32.mxu0 %vm5309_vm0, %v6782_v23 }
 0xd60   :  { %4932 = vmatprep.subr.bf16.mxu0 %v6781_v52 }
 0xd63   :  { %4934 = vmatpush3.bf16.msra.mxu0 %v5748_v17 }
 0xd64   :  { %4730 = vmatprep.subr.mxu0 %v6782_v23 }
 0xd67   :  { %4731 = vmatpush3.msra.mxu0 %v5756_v24 }
 0xd68   :  { %4935 = vmatprep.subr.bf16.mxu0 %v6781_v52 }
 0xe31   :  { %v1377_v63 = vpop.f32.mrb[4].mxu0 }
 0xe32   :  { %v1388_v54 = vrot.slane %v1377_v63, %v5672_v42  ;;  %v4689_v12 = vpop.f32.mrb[5].mxu0 }
 0xe34   :  { %v1389_v53 = vcombine.high %v1388_v54, %v1388_v54  ;;  %v1396_v19 = vrot.slane %v1388_v54, %v5672_v42 }
 0xe36   :  { %v1403_v21 = vrot.slane %v1389_v53, %v5672_v42  ;;  %v1404_v25 = vcombine.high %v1396_v19, %v1396_v19  ;;  %v1409_v26 = vrot.slane %v1396_v19, %v5392_v4 }
 0xe38   :  { %v1405_v28 = vcombine.high %v1403_v21, %v1403_v21  ;;  %v1413_v30 = vrot.slane %v1403_v21, %v5392_v4  ;;  %v1417_v15 = vrot.slane %v1404_v25, %v5392_v4  ;;  %v1426_v62 = vadd.f32 %v1409_v26, %v5663_v47 }
 0xe3a   :  { %v1421_v38 = vrot.slane %v1405_v28, %v5392_v4  ;;  %v1427_v40 = vadd.f32 %v1413_v30, %v5665_v48  ;;  %v1428_v41 = vadd.f32 %v1417_v15, %v5667_v58  ;;  %5074 = vtanh.f32 %v1426_v62 }
 0xe3c   :  { %v1429_v3 = vadd.f32 %v1421_v38, %v5669_v59  ;;  %5076 = vtanh.f32 %v1427_v40 }
 0xe3d   :  { %5078 = vtanh.f32 %v1428_v41 }
 0xe3e   :  { %5080 = vtanh.f32 %v1429_v3 }
 0xe44   :  { %v5075_v43 = vpop.eup %5074 }
 0xe45   :  { %v1434_v60 = vmul.f32 %v5075_v43, %v5688_v55 }
 0xe46   :  { %v5077_v2 = vpop.eup %5076 }
 0xe47   :  { %v5079_v44 = vpop.eup %5078  ;;  %v1438_v61 = vsel %vm532_vm1, %v1434_v60, 0.0  ;;  %v1435_v5 = vmul.f32 %v5077_v2, %v5688_v55 }
 0xe48   :  { %v5081_v16 = vpop.eup %5080  ;;  %1439 = vadd.xlane.f32.xlu1 %v1438_v61  ;;  %v1436_v39 = vmul.f32 %v5079_v44, %v5688_v55 }
 0xe49   :  { %v1441_v56 = vsel %vm532_vm1, %v1435_v5, 0.0  ;;  %v1437_v49 = vmul.f32 %v5081_v16, %v5688_v55 }
 0xe4a   :  { %1442 = vadd.xlane.f32.xlu0 %v1441_v56  ;;  %v1444_v54 = vsel %vm532_vm1, %v1436_v39, 0.0 }
 0xe4b   :  { %v1447_v63 = vsel %vm532_vm1, %v1437_v49, 0.0 }
 0xe4c   :  { %1448 = vadd.xlane.f32.xlu1 %v1447_v63 }
 0xe4e   :  { %1445 = vadd.xlane.f32.xlu0 %v1444_v54 }
 0xed5   :  { %v1440_v12 = vpop.xlane.xlu1 %1439 }
 0xed6   :  { %v1457_v25 = vrot.slane %v1440_v12, %v5700_v50 }
 0xed7   :  { %v1443_v53 = vpop.xlane.xlu0 %1442 }
 0xed8   :  { %v1461_v19 = vrot.slane %v1443_v53, %v5700_v50 }
 0xed9   :  { %v1449_v21 = vpop.xlane.xlu1 %1448 }
 0xeda   :  { %v1469_v30 = vrot.slane %v1449_v21, %v5700_v50  ;;  %v1470_v55 = vsel %vm567_vm2, %v1461_v19, %v1457_v25 }
 0xedb   :  { %v1446_v26 = vpop.xlane.xlu0 %1445 }
 0xedc   :  { %v1465_v28 = vrot.slane %v1446_v26, %v5700_v50 }
 0xede   :  { %v1471_v15 = vsel %vm569_vm3, %v1465_v28, %v1470_v55 }
 0xedf   :  { %v1472_v62 = vsel %vm571_vm4, %v1469_v30, %v1471_v15 }
 0xee0   :  { %v1474_v38 = vsel %vm574_vm5, %v1472_v62, -inf }
 0xee1   :  { %1475 = vmax.xlane.f32.xlu0 %v1474_v38 }
 0xf6e   :  { %v1476_v40 = vpop.xlane.xlu0 %1475 }
 0xf6f   :  { %v1481_v41 = vrot.slane %v1476_v40, %v5392_v4  ;;  %v1485_v3 = vrot.slane %v1476_v40, %v5452_v20  ;;  %v1489_v43 = vrot.slane %v1476_v40, %v5489_v29  ;;  %v1493_v60 = vrot.slane %v1476_v40, %v5517_v34 }
 0xf71   :  { %v1498_v2 = vsub.f32 %v1440_v12, %v1481_v41  ;;  %v1499_v44 = vsub.f32 %v1443_v53, %v1485_v3  ;;  %v1500_v61 = vsub.f32 %v1446_v26, %v1489_v43  ;;  %v1501_v56 = vsub.f32 %v1449_v21, %v1493_v60 }
 0xf73   :  { %v1502_v5 = vmul.f32 1.442695, %v1498_v2  ;;  %v1504_v16 = vmul.f32 1.442695, %v1499_v44  ;;  %v1506_v49 = vmul.f32 1.442695, %v1500_v61 }
 0xf74   :  { %v1508_v39 = vmul.f32 1.442695, %v1501_v56 }
 0xf75   :  { %5082 = vpow2.f32 %v1502_v5 }
 0xf76   :  { %5084 = vpow2.f32 %v1504_v16 }
 0xf77   :  { %5086 = vpow2.f32 %v1506_v49 }
 0xf78   :  { %5088 = vpow2.f32 %v1508_v39 }
 0xf7f   :  { %v5083_v63 = vpop.eup %5082 }
 0xf80   :  { %v5085_v54 = vpop.eup %5084  ;;  %1515 = vperm.xlu1 %5021, %v5083_v63  }
 0xf81   :  { %1518 = vperm.xlu0 %5020, %v5085_v54   ;;  %v5087_v19 = vpop.eup %5086 }
 0xf82   :  { %v5089_v25 = vpop.eup %5088 }
 0xf84   :  { %1521 = vperm.xlu1 %5021, %v5087_v19  }
 0xf88   :  { %1524 = vperm.xlu1 %5021, %v5089_v25  }
 0xf8c   :  { %1580 = vbcast.lane.b32.xlu1 %v5501_v31, 256 }
 0xf90   :  { %1587 = vbcast.lane.b32.xlu1 %v5507_v32, 256 }
 0xf94   :  { %1594 = vbcast.lane.b32.xlu1 %v5514_v33, 256 }
 0xf98   :  { %1601 = vbcast.lane.b32.xlu1 %v5522_v35, 256 }
 0xfff   :  { %v1516_v12 = vpop.permute.xlu1 %1515 }
0x1000   :  { %v1519_v53 = vpop.permute.xlu0 %1518  ;;  %v1529_v28 = vrot.slane %v1516_v12, %v5700_v50 }
0x1001   :  { %v1533_v26 = vrot.slane %v1519_v53, %v5700_v50 }
0x1003   :  { %v1522_v21 = vpop.permute.xlu1 %1521  ;;  %v1542_v31 = vsel %vm567_vm2, %v1533_v26, %v1529_v28  ;;  %v4006_v26 = vsel %vm4005_vm9, %v5767_v45, %v5874_v14  ;;  %v4008_v45 = vsel %vm4005_vm9, %v5770_v51, %v5877_v18 }
0x1004   :  { %v1537_v30 = vrot.slane %v1522_v21, %v5700_v50 }
0x1006   :  { %v1543_v32 = vsel %vm569_vm3, %v1537_v30, %v1542_v31 }
0x1007   :  { %v1525_v55 = vpop.permute.xlu1 %1524 }
0x1008   :  { %v1541_v15 = vrot.slane %v1525_v55, %v5700_v50 }
0x100a   :  { %v1544_v33 = vsel %vm571_vm4, %v1541_v15, %v1543_v32 }
0x100b   :  { %v1546_v35 = vsel %vm574_vm5, %v1544_v33, 0.0  ;;  %v1581_v38 = vpop.permute.xlu1 %1580 }
0x100c   :  { %1547 = vadd.xlane.f32.xlu0 %v1546_v35 }
0x100f   :  { %v1588_v43 = vpop.permute.xlu1 %1587 }
0x1013   :  { %v1595_v5 = vpop.permute.xlu1 %1594 }
0x1017   :  { %v1602_v53 = vpop.permute.xlu1 %1601 }
0x1022   :  { %1647 = vrot.lane.b32.xlu0 %v5909_v1, %s5315_s17 }
0x1099   :  { %v1548_v62 = vpop.xlane.xlu0 %1547 }
0x109a   :  { %5090 = vrcp.f32 %v1548_v62 }
0x109d   :  { %v1648_v62 = vpop.permute.xlu0 %1647 }
0x10a4   :  { %v5091_v40 = vpop.eup %5090 }
0x10a5   :  { %v1554_v41 = vrot.slane %v5091_v40, %v5392_v4  ;;  %v1558_v3 = vrot.slane %v5091_v40, %v5452_v20  ;;  %v1562_v61 = vrot.slane %v5091_v40, %v5489_v29  ;;  %v1566_v49 = vrot.slane %v5091_v40, %v5517_v34 }
0x10a7   :  { %v1571_v60 = vmul.f32 %v5083_v63, %v1554_v41  ;;  %v1572_v44 = vmul.f32 %v5085_v54, %v1558_v3  ;;  %v1573_v56 = vmul.f32 %v5087_v19, %v1562_v61  ;;  %v1574_v12 = vmul.f32 %v5089_v25, %v1566_v49 }
0x10a8   :  { %v4007_v25 = vsel %vm4005_vm9, %v5764_v46, %v5871_v57  ;;  %v4009_v46 = vsel %vm4005_vm9, %v5776_v7, %v5880_v10 }
0x10a9   :  { %v1607_v2 = vmul.f32 %v1581_v38, %v1571_v60  ;;  %v1608_v16 = vmul.f32 %v1588_v43, %v1572_v44  ;;  %v1609_v39 = vmul.f32 %v1595_v5, %v1573_v56  ;;  %v1610_v21 = vmul.f32 %v1602_v53, %v1574_v12 }
0x10ab   :  { %1616 = vperm.xlu1 %5021, %v1607_v2  }
0x10af   :  { %1619 = vperm.xlu1 %5021, %v1608_v16  }
0x10b3   :  { %1622 = vperm.xlu1 %5021, %v1609_v39  }
0x10b7   :  { %1625 = vperm.xlu1 %5021, %v1610_v21  }
0x112a   :  { %v1617_v63 = vpop.permute.xlu1 %1616 }
0x112b   :  { %v1630_v54 = vrot.slane %v1617_v63, %v5700_v50 }
0x112d   :  { %v5978_v19 = vsel %vm4010_vm10, %v4006_v26, %v1630_v54 }
0x112e   :  { %v1620_v28 = vpop.permute.xlu1 %1619 }
0x112f   :  { %v1634_v30 = vrot.slane %v1620_v28, %v5700_v50 }
0x1131   :  { %v5985_v55 = vsel %vm4010_vm10, %v4007_v25, %v1634_v30  ;;  %v1643_v33 = vsel %vm567_vm2, %v1634_v30, %v1630_v54 }
0x1132   :  { %v1623_v15 = vpop.permute.xlu1 %1622 }
0x1133   :  { %v1638_v31 = vrot.slane %v1623_v15, %v5700_v50 }
0x1135   :  { %v5992_v14 = vsel %vm4010_vm10, %v4008_v45, %v1638_v31  ;;  %v1644_v57 = vsel %vm569_vm3, %v1638_v31, %v1643_v33 }
0x1136   :  { %v1626_v32 = vpop.permute.xlu1 %1625 }
0x1137   :  { %v1642_v35 = vrot.slane %v1626_v32, %v5700_v50 }
0x1139   :  { %v1645_v38 = vsel %vm571_vm4, %v1642_v35, %v1644_v57  ;;  %v6002_v40 = vsel %vm4010_vm10, %v4009_v46, %v1642_v35 }
0x113a   :  { %v1650_v51 = vsel %vm532_vm1, %v1645_v38, %v1648_v62  ;;  %v6053_v62 = vld [vmem:[%s6734_s5] ss:$0 sm:$0xff] }
0x113b   :  { %4701 = vmatmul.mubr.msk.f32.vlgmr.msra.gmra.mrb[4].mxu1 %vm759_vm6, %v1650_v51 }
0x113c   :  { %4919 = vmatpush3.bf16.msra.mxu1 %v5403_v8  ;;  %4719 = vmatprep.mubr.msk.f32.mxu1 %vm5309_vm0, %v6782_v23 }
0x113d   :  { %4920 = vmatprep.subr.bf16.mxu1 %v6781_v52 }
0x1140   :  { %4922 = vmatpush3.bf16.msra.mxu1 %v5414_v11 }
0x1141   :  { %4923 = vmatprep.subr.bf16.mxu1 %v6781_v52 }
0x1144   :  { %4925 = vmatpush3.bf16.msra.mxu1 %v5460_v22 }
0x1145   :  { %4926 = vmatprep.subr.bf16.mxu1 %v6781_v52 }
0x1148   :  { %4928 = vmatpush3.bf16.msra.mxu1 %v5480_v27 }
0x1149   :  { %4947 = vmatprep.subr.bf16.mxu1 %v6781_v52 }
0x120e   :  { %v1720_v7 = vpop.f32.mrb[4].mxu1 }
0x120f   :  { %v1721_v18 = vadd.f32 %v5797_v9, %v1720_v7  ;;  %v4702_v10 = vpop.f32.mrb[5].mxu1 }
0x1211   :  { %5092 = vtanh.f32 %v1721_v18  ;;  %v4471_v3 = vmul.f32 -1.442695, %v1721_v18 }
0x1213   :  { %5094 = vpow2.f32 %v4471_v3 }
0x121b   :  { %v5093_v41 = vpop.eup %5092 }
0x121c   :  { %1733 = vrot.lane.b32.xlu1 %v5093_v41, %s5313_s15 }
0x121d   :  { %v5095_v43 = vpop.eup %5094 }
0x121e   :  { %v1727_v60 = vadd.f32 1.0, %v5095_v43 }
0x1220   :  { %5096 = vrcp.f32 %v1727_v60 }
0x122a   :  { %v5097_v2 = vpop.eup %5096 }
0x122b   :  { %v1731_v5 = vmul.f32 %v5097_v2, %v5905_v6 }
0x128e   :  { %v1734_v44 = vpop.permute.xlu1 %1733 }
0x128f   :  { %v1736_v61 = vmul.f32 %v5097_v2, %v1734_v44 }
0x1291   :  { %1738 = vrot.lane.b32.xlu1 %v1736_v61, %s5314_s16 }
0x1303   :  { %v1739_v16 = vpop.permute.xlu1 %1738 }
0x1304   :  { %v6020_v56 = vadd.f32 %v1739_v16, %v1731_v5 }
0x1306   :  { %5098 = vtanh.f32 %v6020_v56 }
0x1310   :  { %v5099_v9 = vpop.eup %5098 }
0x1311   :  { %1744 = vrot.lane.b32.xlu1 %v5099_v9, %s5313_s15 }
0x1383   :  { %v1745_v49 = vpop.permute.xlu1 %1744 }
0x1384   :  { %v6024_v39 = vmul.f32 %v5097_v2, %v1745_v49 }
0x1386   :  { %1749 = vrot.lane.b32.xlu1 %v6024_v39, %s5314_s16 }
0x13f8   :  { %v1750_v12 = vpop.permute.xlu1 %1749 }
0x13f9   :  { %v1752_v53 = vsel %vm861_vm7, %v1750_v12, %v6020_v56 }
0x13fa   :  { %4720 = vmatmul.mubr.msk.f32.vlgmr.msra.gmra.mrb[6].mxu1 %vm395_vm8, %v1752_v53 }
0x13fb   :  { %4949 = vmatpush3.bf16.msra.mxu1 %v5736_v13  ;;  %4764 = vmatprep.mubr.msk.f32.mxu1 %vm5309_vm0, %v6782_v23 }
0x13fc   :  { %4950 = vmatprep.subr.bf16.mxu1 %v6781_v52 }
0x13ff   :  { %4952 = vmatpush3.bf16.msra.mxu1 %v5748_v17 }
0x1400   :  { %4762 = vmatprep.subr.mxu1 %v6782_v23 }
0x1403   :  { %4763 = vmatpush3.msra.mxu1 %v5756_v24 }
0x1404   :  { %4953 = vmatprep.subr.bf16.mxu1 %v6781_v52 }
0x14cd   :  { %v1822_v6 = vpop.f32.mrb[6].mxu1 }
0x14ce   :  { %v1833_v21 = vrot.slane %v1822_v6, %v5672_v42  ;;  %v4721_v63 = vpop.f32.mrb[7].mxu1 }
0x14d0   :  { %v1834_v54 = vcombine.high %v1833_v21, %v1833_v21  ;;  %v1841_v26 = vrot.slane %v1833_v21, %v5672_v42 }
0x14d2   :  { %v1848_v28 = vrot.slane %v1834_v54, %v5672_v42  ;;  %v1849_v30 = vcombine.high %v1841_v26, %v1841_v26  ;;  %v1854_v25 = vrot.slane %v1841_v26, %v5392_v4 }
0x14d4   :  { %v1850_v15 = vcombine.high %v1848_v28, %v1848_v28  ;;  %v1858_v31 = vrot.slane %v1848_v28, %v5392_v4  ;;  %v1862_v45 = vrot.slane %v1849_v30, %v5392_v4  ;;  %v1871_v24 = vadd.f32 %v1854_v25, %v5663_v47 }
0x14d6   :  { %v1866_v32 = vrot.slane %v1850_v15, %v5392_v4  ;;  %v1872_v33 = vadd.f32 %v1858_v31, %v5665_v48  ;;  %v1873_v35 = vadd.f32 %v1862_v45, %v5667_v58  ;;  %5100 = vtanh.f32 %v1871_v24 }
0x14d8   :  { %v1874_v46 = vadd.f32 %v1866_v32, %v5669_v59  ;;  %5102 = vtanh.f32 %v1872_v33 }
0x14d9   :  { %5104 = vtanh.f32 %v1873_v35 }
0x14da   :  { %5106 = vtanh.f32 %v1874_v46 }
0x14e0   :  { %v5101_v57 = vpop.eup %5100 }
0x14e1   :  { %v1879_v38 = vmul.f32 %v6053_v62, %v5101_v57 }
0x14e2   :  { %v5103_v51 = vpop.eup %5102 }
0x14e3   :  { %v5105_v7 = vpop.eup %5104  ;;  %v1883_v18 = vsel %vm532_vm1, %v1879_v38, 0.0  ;;  %v1880_v10 = vmul.f32 %v6053_v62, %v5103_v51 }
0x14e4   :  { %v5107_v41 = vpop.eup %5106  ;;  %1884 = vadd.xlane.f32.xlu1 %v1883_v18  ;;  %v1881_v60 = vmul.f32 %v6053_v62, %v5105_v7 }
0x14e5   :  { %v1886_v3 = vsel %vm532_vm1, %v1880_v10, 0.0  ;;  %v1882_v43 = vmul.f32 %v6053_v62, %v5107_v41  ;;  %v6783_v41 = vld [vmem:[#allocation11_spill] sm:$0xff] }
0x14e6   :  { %1887 = vadd.xlane.f32.xlu0 %v1886_v3  ;;  %v1889_v44 = vsel %vm532_vm1, %v1881_v60, 0.0  ;;  %v6784_v3 = vld [vmem:[#allocation12_spill] sm:$0xff] }
0x14e7   :  { %v1892_v2 = vsel %vm532_vm1, %v1882_v43, 0.0 }
0x14e8   :  { %1893 = vadd.xlane.f32.xlu1 %v1892_v2 }
0x14ea   :  { %1890 = vadd.xlane.f32.xlu0 %v1889_v44 }
0x1571   :  { %v1885_v61 = vpop.xlane.xlu1 %1884 }
0x1572   :  { %v1902_v49 = vrot.slane %v1885_v61, %v5700_v50 }
0x1573   :  { %v1888_v5 = vpop.xlane.xlu0 %1887 }
0x1574   :  { %v1906_v16 = vrot.slane %v1888_v5, %v5700_v50 }
0x1575   :  { %v1894_v9 = vpop.xlane.xlu1 %1893 }
0x1576   :  { %v1914_v6 = vrot.slane %v1894_v9, %v5700_v50  ;;  %v1915_v21 = vsel %vm567_vm2, %v1906_v16, %v1902_v49 }
0x1577   :  { %v1891_v12 = vpop.xlane.xlu0 %1890 }
0x1578   :  { %v1910_v53 = vrot.slane %v1891_v12, %v5700_v50 }
0x157a   :  { %v1916_v63 = vsel %vm569_vm3, %v1910_v53, %v1915_v21 }
0x157b   :  { %v1917_v54 = vsel %vm571_vm4, %v1914_v6, %v1916_v63 }
0x157c   :  { %v1919_v26 = vsel %vm574_vm5, %v1917_v54, -inf }
0x157d   :  { %1920 = vmax.xlane.f32.xlu0 %v1919_v26 }
0x160a   :  { %v1921_v28 = vpop.xlane.xlu0 %1920 }
0x160b   :  { %v1926_v30 = vrot.slane %v1921_v28, %v5392_v4  ;;  %v1930_v25 = vrot.slane %v1921_v28, %v5452_v20  ;;  %v1934_v15 = vrot.slane %v1921_v28, %v5489_v29  ;;  %v1938_v31 = vrot.slane %v1921_v28, %v5517_v34 }
0x160d   :  { %v1943_v45 = vsub.f32 %v1885_v61, %v1926_v30  ;;  %v1944_v24 = vsub.f32 %v1888_v5, %v1930_v25  ;;  %v1945_v32 = vsub.f32 %v1891_v12, %v1934_v15  ;;  %v1946_v46 = vsub.f32 %v1894_v9, %v1938_v31 }
0x160f   :  { %v1947_v33 = vmul.f32 1.442695, %v1943_v45  ;;  %v1949_v35 = vmul.f32 1.442695, %v1944_v24  ;;  %v1951_v57 = vmul.f32 1.442695, %v1945_v32 }
0x1610   :  { %v1953_v38 = vmul.f32 1.442695, %v1946_v46 }
0x1611   :  { %5108 = vpow2.f32 %v1947_v33 }
0x1612   :  { %5110 = vpow2.f32 %v1949_v35 }
0x1613   :  { %5112 = vpow2.f32 %v1951_v57 }
0x1614   :  { %5114 = vpow2.f32 %v1953_v38 }
0x161b   :  { %v5109_v51 = vpop.eup %5108 }
0x161c   :  { %v5111_v7 = vpop.eup %5110  ;;  %1960 = vperm.xlu1 %5021, %v5109_v51  }
0x161d   :  { %1963 = vperm.xlu0 %5020, %v5111_v7   ;;  %v5113_v18 = vpop.eup %5112 }
0x161e   :  { %v5115_v10 = vpop.eup %5114 }
0x1620   :  { %1966 = vperm.xlu1 %5021, %v5113_v18  }
0x1624   :  { %1969 = vperm.xlu1 %5021, %v5115_v10  }
0x1628   :  { %2025 = vbcast.lane.b32.xlu1 %v5527_v36, 256 }
0x162c   :  { %2032 = vbcast.lane.b32.xlu1 %v5532_v37, 256 }
0x1630   :  { %2039 = vbcast.lane.b32.xlu1 %v6783_v41, 256 }
0x1634   :  { %2046 = vbcast.lane.b32.xlu1 %v6784_v3, 256 }
0x169b   :  { %v1961_v43 = vpop.permute.xlu1 %1960 }
0x169c   :  { %v1964_v60 = vpop.permute.xlu0 %1963  ;;  %v1974_v61 = vrot.slane %v1961_v43, %v5700_v50 }
0x169d   :  { %v1978_v44 = vrot.slane %v1964_v60, %v5700_v50 }
0x169f   :  { %v1967_v2 = vpop.permute.xlu1 %1966  ;;  %v1987_v36 = vsel %vm567_vm2, %v1978_v44, %v1974_v61 }
0x16a0   :  { %v1982_v5 = vrot.slane %v1967_v2, %v5700_v50 }
0x16a2   :  { %v1988_v37 = vsel %vm569_vm3, %v1982_v5, %v1987_v36 }
0x16a3   :  { %v1970_v16 = vpop.permute.xlu1 %1969 }
0x16a4   :  { %v1986_v9 = vrot.slane %v1970_v16, %v5700_v50 }
0x16a6   :  { %v1989_v49 = vsel %vm571_vm4, %v1986_v9, %v1988_v37 }
0x16a7   :  { %v1991_v12 = vsel %vm574_vm5, %v1989_v49, 0.0  ;;  %v2026_v6 = vpop.permute.xlu1 %2025 }
0x16a8   :  { %1992 = vadd.xlane.f32.xlu0 %v1991_v12 }
0x16ab   :  { %v2033_v26 = vpop.permute.xlu1 %2032 }
0x16af   :  { %v2040_v31 = vpop.permute.xlu1 %2039 }
0x16b3   :  { %v2047_v46 = vpop.permute.xlu1 %2046 }
0x16be   :  { %2092 = vrot.lane.b32.xlu0 %v6024_v39, %s5315_s17 }
0x1735   :  { %v1993_v53 = vpop.xlane.xlu0 %1992 }
0x1736   :  { %5116 = vrcp.f32 %v1993_v53 }
0x1739   :  { %v2093_v5 = vpop.permute.xlu0 %2092 }
0x1740   :  { %v5117_v21 = vpop.eup %5116 }
0x1741   :  { %v1999_v63 = vrot.slane %v5117_v21, %v5392_v4  ;;  %v2003_v54 = vrot.slane %v5117_v21, %v5452_v20  ;;  %v2007_v15 = vrot.slane %v5117_v21, %v5489_v29  ;;  %v2011_v32 = vrot.slane %v5117_v21, %v5517_v34 }
0x1743   :  { %v2016_v28 = vmul.f32 %v5109_v51, %v1999_v63  ;;  %v2017_v25 = vmul.f32 %v5111_v7, %v2003_v54  ;;  %v2018_v24 = vmul.f32 %v5113_v18, %v2007_v15  ;;  %v2019_v35 = vmul.f32 %v5115_v10, %v2011_v32 }
0x1745   :  { %v2052_v30 = vmul.f32 %v2026_v6, %v2016_v28  ;;  %v2053_v45 = vmul.f32 %v2033_v26, %v2017_v25  ;;  %v2054_v33 = vmul.f32 %v2040_v31, %v2018_v24  ;;  %v2055_v57 = vmul.f32 %v2047_v46, %v2019_v35 }
0x1747   :  { %2061 = vperm.xlu1 %5021, %v2052_v30  }
0x174b   :  { %2064 = vperm.xlu1 %5021, %v2053_v45  }
0x174f   :  { %2067 = vperm.xlu1 %5021, %v2054_v33  }
0x1753   :  { %2070 = vperm.xlu1 %5021, %v2055_v57  }
0x17c6   :  { %v2062_v38 = vpop.permute.xlu1 %2061 }
0x17c7   :  { %v2075_v51 = vrot.slane %v2062_v38, %v5700_v50 }
0x17c9   :  { %v6096_v7 = vsel %vm4015_vm11, %v5978_v19, %v2075_v51 }
0x17ca   :  { %v2065_v41 = vpop.permute.xlu1 %2064 }
0x17cb   :  { %v2079_v18 = vrot.slane %v2065_v41, %v5700_v50 }
0x17cd   :  { %v6101_v3 = vsel %vm4015_vm11, %v5985_v55, %v2079_v18  ;;  %v2088_v44 = vsel %vm567_vm2, %v2079_v18, %v2075_v51 }
0x17ce   :  { %v2068_v10 = vpop.permute.xlu1 %2067 }
0x17cf   :  { %v2083_v43 = vrot.slane %v2068_v10, %v5700_v50 }
0x17d1   :  { %v6106_v60 = vsel %vm4015_vm11, %v5992_v14, %v2083_v43  ;;  %v2089_v61 = vsel %vm569_vm3, %v2083_v43, %v2088_v44 }
0x17d2   :  { %v2071_v2 = vpop.permute.xlu1 %2070 }
0x17d3   :  { %v2087_v19 = vrot.slane %v2071_v2, %v5700_v50 }
0x17d5   :  { %v2090_v16 = vsel %vm571_vm4, %v2087_v19, %v2089_v61  ;;  %v6114_v55 = vsel %vm4015_vm11, %v6002_v40, %v2087_v19  ;;  %v6131_v40 = vld [vmem:[%s6736_s7] ss:$0 sm:$0xff] }
0x17d6   :  { %v2095_v9 = vsel %vm532_vm1, %v2090_v16, %v2093_v5 }
0x17d7   :  { %4733 = vmatmul.mubr.msk.f32.vlgmr.msra.gmra.mrb[6].mxu0 %vm759_vm6, %v2095_v9 }
0x17d8   :  { %4937 = vmatpush3.bf16.msra.mxu0 %v5403_v8  ;;  %4751 = vmatprep.mubr.msk.f32.mxu0 %vm5309_vm0, %v6782_v23 }
0x17d9   :  { %4938 = vmatprep.subr.bf16.mxu0 %v6781_v52 }
0x17dc   :  { %4940 = vmatpush3.bf16.msra.mxu0 %v5414_v11 }
0x17dd   :  { %4941 = vmatprep.subr.bf16.mxu0 %v6781_v52 }
0x17e0   :  { %4943 = vmatpush3.bf16.msra.mxu0 %v5460_v22 }
0x17e1   :  { %4944 = vmatprep.subr.bf16.mxu0 %v6781_v52 }
0x17e4   :  { %4946 = vmatpush3.bf16.msra.mxu0 %v5480_v27 }
0x17e5   :  { %4965 = vmatprep.subr.bf16.mxu0 %v6781_v52 }
0x18aa   :  { %v2165_v14 = vpop.f32.mrb[6].mxu0 }
0x18ab   :  { %v2166_v36 = vadd.f32 %v6131_v40, %v2165_v14  ;;  %v4734_v37 = vpop.f32.mrb[7].mxu0 }
0x18ad   :  { %5118 = vtanh.f32 %v2166_v36  ;;  %v4474_v12 = vmul.f32 -1.442695, %v2166_v36 }
0x18af   :  { %5120 = vpow2.f32 %v4474_v12 }
0x18b7   :  { %v5119_v49 = vpop.eup %5118 }
0x18b8   :  { %2178 = vrot.lane.b32.xlu1 %v5119_v49, %s5313_s15 }
0x18b9   :  { %v5121_v53 = vpop.eup %5120 }
0x18ba   :  { %v2172_v6 = vadd.f32 1.0, %v5121_v53 }
0x18bc   :  { %5122 = vrcp.f32 %v2172_v6 }
0x18c6   :  { %v5123_v21 = vpop.eup %5122 }
0x18c7   :  { %v2176_v26 = vmul.f32 %v5123_v21, %v6020_v56  ;;  %v6157_v56 = vld [vmem:[%s6735_s6 + $0x20] sm:$0xff] }
0x192a   :  { %v2179_v63 = vpop.permute.xlu1 %2178 }
0x192b   :  { %v2181_v54 = vmul.f32 %v5123_v21, %v2179_v63 }
0x192d   :  { %2183 = vrot.lane.b32.xlu1 %v2181_v54, %s5314_s16 }
0x199f   :  { %v2184_v28 = vpop.permute.xlu1 %2183 }
0x19a0   :  { %v6137_v30 = vadd.f32 %v2184_v28, %v2176_v26 }
0x19a2   :  { %5124 = vtanh.f32 %v6137_v30 }
0x19ac   :  { %v5125_v25 = vpop.eup %5124 }
0x19ad   :  { %2189 = vrot.lane.b32.xlu1 %v5125_v25, %s5313_s15 }
0x1a1f   :  { %v2190_v15 = vpop.permute.xlu1 %2189 }
0x1a20   :  { %v6141_v31 = vmul.f32 %v5123_v21, %v2190_v15 }
0x1a22   :  { %2194 = vrot.lane.b32.xlu1 %v6141_v31, %s5314_s16 }
0x1a94   :  { %v2195_v45 = vpop.permute.xlu1 %2194 }
0x1a95   :  { %v2197_v24 = vsel %vm861_vm7, %v2195_v45, %v6137_v30 }
0x1a96   :  { %4752 = vmatmul.mubr.msk.f32.vlgmr.msra.gmra.mrb[8].mxu0 %vm395_vm8, %v2197_v24 }
0x1a97   :  { %4967 = vmatpush3.bf16.msra.mxu0 %v5736_v13  ;;  %4796 = vmatprep.mubr.msk.f32.mxu0 %vm5309_vm0, %v6782_v23 }
0x1a98   :  { %4968 = vmatprep.subr.bf16.mxu0 %v6781_v52 }
0x1a9b   :  { %4970 = vmatpush3.bf16.msra.mxu0 %v5748_v17 }
0x1a9c   :  { %4794 = vmatprep.subr.mxu0 %v6782_v23 }
0x1a9f   :  { %4795 = vmatpush3.msra.mxu0 %v6157_v56 }
0x1aa0   :  { %4971 = vmatprep.subr.bf16.mxu0 %v6781_v52 }
0x1b69   :  { %v2267_v32 = vpop.f32.mrb[8].mxu0 }
0x1b6a   :  { %v2278_v33 = vrot.slane %v2267_v32, %v5672_v42  ;;  %v4753_v35 = vpop.f32.mrb[9].mxu0 }
0x1b6c   :  { %v2279_v46 = vcombine.high %v2278_v33, %v2278_v33  ;;  %v2286_v57 = vrot.slane %v2278_v33, %v5672_v42 }
0x1b6e   :  { %v2293_v38 = vrot.slane %v2279_v46, %v5672_v42  ;;  %v2294_v51 = vcombine.high %v2286_v57, %v2286_v57  ;;  %v2299_v41 = vrot.slane %v2286_v57, %v5392_v4 }
0x1b70   :  { %v2295_v18 = vcombine.high %v2293_v38, %v2293_v38  ;;  %v2303_v10 = vrot.slane %v2293_v38, %v5392_v4  ;;  %v2307_v43 = vrot.slane %v2294_v51, %v5392_v4  ;;  %v2316_v2 = vadd.f32 %v2299_v41, %v5663_v47 }
0x1b72   :  { %v2311_v44 = vrot.slane %v2295_v18, %v5392_v4  ;;  %v2317_v19 = vadd.f32 %v2303_v10, %v5665_v48  ;;  %v2318_v61 = vadd.f32 %v2307_v43, %v5667_v58  ;;  %5126 = vtanh.f32 %v2316_v2 }
0x1b74   :  { %v2319_v5 = vadd.f32 %v2311_v44, %v5669_v59  ;;  %5128 = vtanh.f32 %v2317_v19 }
0x1b75   :  { %5130 = vtanh.f32 %v2318_v61 }
0x1b76   :  { %5132 = vtanh.f32 %v2319_v5 }
0x1b7c   :  { %v5127_v16 = vpop.eup %5126 }
0x1b7d   :  { %v2324_v9 = vmul.f32 %v6053_v62, %v5127_v16 }
0x1b7e   :  { %v5129_v14 = vpop.eup %5128 }
0x1b7f   :  { %v5131_v36 = vpop.eup %5130  ;;  %v2328_v37 = vsel %vm532_vm1, %v2324_v9, 0.0  ;;  %v2325_v49 = vmul.f32 %v6053_v62, %v5129_v14 }
0x1b80   :  { %v5133_v12 = vpop.eup %5132  ;;  %2329 = vadd.xlane.f32.xlu1 %v2328_v37  ;;  %v2326_v21 = vmul.f32 %v6053_v62, %v5131_v36 }
0x1b81   :  { %v2331_v53 = vsel %vm532_vm1, %v2325_v49, 0.0  ;;  %v2327_v6 = vmul.f32 %v6053_v62, %v5133_v12 }
0x1b82   :  { %2332 = vadd.xlane.f32.xlu0 %v2331_v53  ;;  %v2334_v54 = vsel %vm532_vm1, %v2326_v21, 0.0  ;;  %v6785_v53 = vld [vmem:[#allocation13_spill] sm:$0xff]  ;;  %v6787_v21 = vld [vmem:[#allocation15_spill] sm:$0xff] }
0x1b83   :  { %v2337_v63 = vsel %vm532_vm1, %v2327_v6, 0.0  ;;  %v6786_v6 = vld [vmem:[#allocation14_spill] sm:$0xff] }
0x1b84   :  { %2338 = vadd.xlane.f32.xlu1 %v2337_v63  ;;  %v6788_v63 = vld [vmem:[#allocation16_spill] sm:$0xff] }
0x1b86   :  { %2335 = vadd.xlane.f32.xlu0 %v2334_v54 }
0x1c0d   :  { %v2330_v26 = vpop.xlane.xlu1 %2329 }
0x1c0e   :  { %v2347_v45 = vrot.slane %v2330_v26, %v5700_v50 }
0x1c0f   :  { %v2333_v28 = vpop.xlane.xlu0 %2332 }
0x1c10   :  { %v2351_v25 = vrot.slane %v2333_v28, %v5700_v50 }
0x1c11   :  { %v2339_v15 = vpop.xlane.xlu1 %2338 }
0x1c12   :  { %v2360_v33 = vsel %vm567_vm2, %v2351_v25, %v2347_v45  ;;  %v2359_v35 = vrot.slane %v2339_v15, %v5700_v50 }
0x1c13   :  { %v2336_v24 = vpop.xlane.xlu0 %2335 }
0x1c14   :  { %v2355_v32 = vrot.slane %v2336_v24, %v5700_v50 }
0x1c16   :  { %v2361_v46 = vsel %vm569_vm3, %v2355_v32, %v2360_v33 }
0x1c17   :  { %v2362_v57 = vsel %vm571_vm4, %v2359_v35, %v2361_v46 }
0x1c18   :  { %v2364_v38 = vsel %vm574_vm5, %v2362_v57, -inf }
0x1c19   :  { %2365 = vmax.xlane.f32.xlu0 %v2364_v38 }
0x1ca6   :  { %v2366_v51 = vpop.xlane.xlu0 %2365 }
0x1ca7   :  { %v2371_v41 = vrot.slane %v2366_v51, %v5392_v4  ;;  %v2375_v18 = vrot.slane %v2366_v51, %v5452_v20  ;;  %v2379_v10 = vrot.slane %v2366_v51, %v5489_v29  ;;  %v2383_v43 = vrot.slane %v2366_v51, %v5517_v34 }
0x1ca9   :  { %v2388_v2 = vsub.f32 %v2330_v26, %v2371_v41  ;;  %v2389_v44 = vsub.f32 %v2333_v28, %v2375_v18  ;;  %v2390_v19 = vsub.f32 %v2336_v24, %v2379_v10  ;;  %v2391_v16 = vsub.f32 %v2339_v15, %v2383_v43 }
0x1cab   :  { %v2392_v61 = vmul.f32 1.442695, %v2388_v2  ;;  %v2394_v5 = vmul.f32 1.442695, %v2389_v44  ;;  %v2396_v9 = vmul.f32 1.442695, %v2390_v19 }
0x1cac   :  { %v2398_v14 = vmul.f32 1.442695, %v2391_v16 }
0x1cad   :  { %5134 = vpow2.f32 %v2392_v61 }
0x1cae   :  { %5136 = vpow2.f32 %v2394_v5 }
0x1caf   :  { %5138 = vpow2.f32 %v2396_v9 }
0x1cb0   :  { %5140 = vpow2.f32 %v2398_v14 }
0x1cb7   :  { %v5135_v36 = vpop.eup %5134 }
0x1cb8   :  { %v5137_v37 = vpop.eup %5136  ;;  %2405 = vperm.xlu1 %5021, %v5135_v36  }
0x1cb9   :  { %2408 = vperm.xlu0 %5020, %v5137_v37   ;;  %v5139_v49 = vpop.eup %5138 }
0x1cba   :  { %v5141_v12 = vpop.eup %5140 }
0x1cbc   :  { %2411 = vperm.xlu1 %5021, %v5139_v49  }
0x1cc0   :  { %2414 = vperm.xlu1 %5021, %v5141_v12  }
0x1cc4   :  { %2470 = vbcast.lane.b32.xlu1 %v6785_v53, 256 }
0x1cc8   :  { %2477 = vbcast.lane.b32.xlu1 %v6786_v6, 256 }
0x1ccc   :  { %2484 = vbcast.lane.b32.xlu1 %v6787_v21, 256 }
0x1cd0   :  { %2491 = vbcast.lane.b32.xlu1 %v6788_v63, 256 }
0x1d37   :  { %v2406_v54 = vpop.permute.xlu1 %2405 }
0x1d38   :  { %v2409_v26 = vpop.permute.xlu0 %2408  ;;  %v2419_v15 = vrot.slane %v2406_v54, %v5700_v50 }
0x1d39   :  { %v2423_v25 = vrot.slane %v2409_v26, %v5700_v50 }
0x1d3b   :  { %v2412_v28 = vpop.permute.xlu1 %2411  ;;  %v2432_v32 = vsel %vm567_vm2, %v2423_v25, %v2419_v15 }
0x1d3c   :  { %v2427_v45 = vrot.slane %v2412_v28, %v5700_v50 }
0x1d3e   :  { %v2433_v35 = vsel %vm569_vm3, %v2427_v45, %v2432_v32 }
0x1d3f   :  { %v2415_v24 = vpop.permute.xlu1 %2414 }
0x1d40   :  { %v2431_v33 = vrot.slane %v2415_v24, %v5700_v50 }
0x1d42   :  { %v2434_v46 = vsel %vm571_vm4, %v2431_v33, %v2433_v35 }
0x1d43   :  { %v2436_v57 = vsel %vm574_vm5, %v2434_v46, 0.0  ;;  %v2471_v51 = vpop.permute.xlu1 %2470 }
0x1d44   :  { %2437 = vadd.xlane.f32.xlu0 %v2436_v57 }
0x1d47   :  { %v2478_v43 = vpop.permute.xlu1 %2477 }
0x1d4b   :  { %v2485_v5 = vpop.permute.xlu1 %2484 }
0x1d4f   :  { %v2492_v21 = vpop.permute.xlu1 %2491 }
0x1d5a   :  { %2537 = vrot.lane.b32.xlu0 %v6141_v31, %s5315_s17 }
0x1dd1   :  { %v2438_v38 = vpop.xlane.xlu0 %2437 }
0x1dd2   :  { %5142 = vrcp.f32 %v2438_v38 }
0x1dd5   :  { %v2538_v33 = vpop.permute.xlu0 %2537 }
0x1ddc   :  { %v5143_v41 = vpop.eup %5142 }
0x1ddd   :  { %v2444_v18 = vrot.slane %v5143_v41, %v5392_v4  ;;  %v2448_v10 = vrot.slane %v5143_v41, %v5452_v20  ;;  %v2452_v61 = vrot.slane %v5143_v41, %v5489_v29  ;;  %v2456_v14 = vrot.slane %v5143_v41, %v5517_v34 }
0x1ddf   :  { %v2461_v2 = vmul.f32 %v5135_v36, %v2444_v18  ;;  %v2462_v19 = vmul.f32 %v5137_v37, %v2448_v10  ;;  %v2463_v9 = vmul.f32 %v5139_v49, %v2452_v61  ;;  %v2464_v6 = vmul.f32 %v5141_v12, %v2456_v14 }
0x1de1   :  { %v2497_v44 = vmul.f32 %v2471_v51, %v2461_v2  ;;  %v2498_v16 = vmul.f32 %v2478_v43, %v2462_v19  ;;  %v2499_v53 = vmul.f32 %v2485_v5, %v2463_v9  ;;  %v2500_v63 = vmul.f32 %v2492_v21, %v2464_v6 }
0x1de3   :  { %2506 = vperm.xlu1 %5021, %v2497_v44  }
0x1de7   :  { %2509 = vperm.xlu1 %5021, %v2498_v16  }
0x1deb   :  { %2512 = vperm.xlu1 %5021, %v2499_v53  }
0x1def   :  { %2515 = vperm.xlu1 %5021, %v2500_v63  }
0x1e62   :  { %v2507_v54 = vpop.permute.xlu1 %2506 }
0x1e63   :  { %v2520_v36 = vrot.slane %v2507_v54, %v5700_v50 }
0x1e65   :  { %v6213_v37 = vsel %vm4020_vm12, %v6096_v7, %v2520_v36 }
0x1e66   :  { %v2510_v26 = vpop.permute.xlu1 %2509 }
0x1e67   :  { %v2524_v49 = vrot.slane %v2510_v26, %v5700_v50 }
0x1e69   :  { %v6218_v28 = vsel %vm4020_vm12, %v6101_v3, %v2524_v49  ;;  %v2533_v24 = vsel %vm567_vm2, %v2524_v49, %v2520_v36 }
0x1e6a   :  { %v2513_v12 = vpop.permute.xlu1 %2512 }
0x1e6b   :  { %v2528_v25 = vrot.slane %v2513_v12, %v5700_v50 }
0x1e6d   :  { %v6223_v15 = vsel %vm4020_vm12, %v6106_v60, %v2528_v25  ;;  %v2534_v32 = vsel %vm569_vm3, %v2528_v25, %v2533_v24 }
0x1e6e   :  { %v2516_v45 = vpop.permute.xlu1 %2515 }
0x1e6f   :  { %v2532_v7 = vrot.slane %v2516_v45, %v5700_v50 }
0x1e71   :  { %v2535_v35 = vsel %vm571_vm4, %v2532_v7, %v2534_v32  ;;  %v6231_v3 = vsel %vm4020_vm12, %v6114_v55, %v2532_v7 }
0x1e72   :  { %v2540_v46 = vsel %vm532_vm1, %v2535_v35, %v2538_v33 }
0x1e73   :  { %4765 = vmatmul.mubr.msk.f32.vlgmr.msra.gmra.mrb[8].mxu1 %vm759_vm6, %v2540_v46 }
0x1e74   :  { %4955 = vmatpush3.bf16.msra.mxu1 %v5403_v8  ;;  %4783 = vmatprep.mubr.msk.f32.mxu1 %vm5309_vm0, %v6782_v23 }
0x1e75   :  { %4956 = vmatprep.subr.bf16.mxu1 %v6781_v52 }
0x1e78   :  { %4958 = vmatpush3.bf16.msra.mxu1 %v5414_v11 }
0x1e79   :  { %4959 = vmatprep.subr.bf16.mxu1 %v6781_v52 }
0x1e7c   :  { %4961 = vmatpush3.bf16.msra.mxu1 %v5460_v22 }
0x1e7d   :  { %4962 = vmatprep.subr.bf16.mxu1 %v6781_v52 }
0x1e80   :  { %4964 = vmatpush3.bf16.msra.mxu1 %v5480_v27 }
0x1e81   :  { %4983 = vmatprep.subr.bf16.mxu1 %v6781_v52 }
0x1f46   :  { %v2610_v60 = vpop.f32.mrb[8].mxu1 }
0x1f47   :  { %v2611_v55 = vadd.f32 %v6131_v40, %v2610_v60  ;;  %v4766_v57 = vpop.f32.mrb[9].mxu1 }
0x1f49   :  { %5144 = vtanh.f32 %v2611_v55  ;;  %v4477_v51 = vmul.f32 -1.442695, %v2611_v55 }
0x1f4b   :  { %5146 = vpow2.f32 %v4477_v51 }
0x1f53   :  { %v5145_v38 = vpop.eup %5144 }
0x1f54   :  { %2623 = vrot.lane.b32.xlu1 %v5145_v38, %s5313_s15 }
0x1f55   :  { %v5147_v41 = vpop.eup %5146 }
0x1f56   :  { %v2617_v18 = vadd.f32 1.0, %v5147_v41 }
0x1f58   :  { %5148 = vrcp.f32 %v2617_v18 }
0x1f62   :  { %v5149_v10 = vpop.eup %5148 }
0x1f63   :  { %v2621_v44 = vmul.f32 %v5149_v10, %v6137_v30 }
0x1fc6   :  { %v2624_v43 = vpop.permute.xlu1 %2623 }
0x1fc7   :  { %v2626_v2 = vmul.f32 %v5149_v10, %v2624_v43 }
0x1fc9   :  { %2628 = vrot.lane.b32.xlu1 %v2626_v2, %s5314_s16 }
0x203b   :  { %v2629_v19 = vpop.permute.xlu1 %2628 }
0x203c   :  { %v6249_v61 = vadd.f32 %v2629_v19, %v2621_v44 }
0x203e   :  { %5150 = vtanh.f32 %v6249_v61 }
0x2048   :  { %v5151_v5 = vpop.eup %5150 }
0x2049   :  { %2634 = vrot.lane.b32.xlu1 %v5151_v5, %s5313_s15 }
0x20bb   :  { %v2635_v16 = vpop.permute.xlu1 %2634 }
0x20bc   :  { %v6253_v9 = vmul.f32 %v5149_v10, %v2635_v16 }
0x20be   :  { %2639 = vrot.lane.b32.xlu1 %v6253_v9, %s5314_s16 }
0x2130   :  { %v2640_v14 = vpop.permute.xlu1 %2639 }
0x2131   :  { %v2642_v53 = vsel %vm861_vm7, %v2640_v14, %v6249_v61 }
0x2132   :  { %4784 = vmatmul.mubr.msk.f32.vlgmr.msra.gmra.mrb[10].mxu1 %vm395_vm8, %v2642_v53 }
0x2133   :  { %4985 = vmatpush3.bf16.msra.mxu1 %v5736_v13  ;;  %4828 = vmatprep.mubr.msk.f32.mxu1 %vm5309_vm0, %v6782_v23 }
0x2134   :  { %4986 = vmatprep.subr.bf16.mxu1 %v6781_v52 }
0x2137   :  { %4988 = vmatpush3.bf16.msra.mxu1 %v5748_v17 }
0x2138   :  { %4826 = vmatprep.subr.mxu1 %v6782_v23 }
0x213b   :  { %4827 = vmatpush3.msra.mxu1 %v6157_v56 }
0x213c   :  { %4989 = vmatprep.subr.bf16.mxu1 %v6781_v52 }
0x2205   :  { %v2712_v30 = vpop.f32.mrb[10].mxu1 }
0x2206   :  { %v2723_v6 = vrot.slane %v2712_v30, %v5672_v42  ;;  %v4785_v21 = vpop.f32.mrb[11].mxu1 }
0x2208   :  { %v2724_v63 = vcombine.high %v2723_v6, %v2723_v6  ;;  %v2731_v54 = vrot.slane %v2723_v6, %v5672_v42 }
0x220a   :  { %v2738_v36 = vrot.slane %v2724_v63, %v5672_v42  ;;  %v2739_v26 = vcombine.high %v2731_v54, %v2731_v54  ;;  %v2744_v49 = vrot.slane %v2731_v54, %v5392_v4 }
0x220c   :  { %v2740_v12 = vcombine.high %v2738_v36, %v2738_v36  ;;  %v2748_v25 = vrot.slane %v2738_v36, %v5392_v4  ;;  %v2752_v45 = vrot.slane %v2739_v26, %v5392_v4  ;;  %v2761_v24 = vadd.f32 %v2744_v49, %v5663_v47 }
0x220e   :  { %v2756_v7 = vrot.slane %v2740_v12, %v5392_v4  ;;  %v2762_v32 = vadd.f32 %v2748_v25, %v5665_v48  ;;  %v2763_v33 = vadd.f32 %v2752_v45, %v5667_v58  ;;  %5152 = vtanh.f32 %v2761_v24 }
0x2210   :  { %v2764_v35 = vadd.f32 %v2756_v7, %v5669_v59  ;;  %5154 = vtanh.f32 %v2762_v32 }
0x2211   :  { %5156 = vtanh.f32 %v2763_v33 }
0x2212   :  { %5158 = vtanh.f32 %v2764_v35 }
0x2218   :  { %v5153_v46 = vpop.eup %5152 }
0x2219   :  { %v2769_v60 = vmul.f32 %v6053_v62, %v5153_v46 }
0x221a   :  { %v5155_v55 = vpop.eup %5154 }
0x221b   :  { %v5157_v57 = vpop.eup %5156  ;;  %v2773_v38 = vsel %vm532_vm1, %v2769_v60, 0.0  ;;  %v2770_v51 = vmul.f32 %v6053_v62, %v5155_v55 }
0x221c   :  { %v5159_v41 = vpop.eup %5158  ;;  %2774 = vadd.xlane.f32.xlu1 %v2773_v38  ;;  %v2771_v43 = vmul.f32 %v6053_v62, %v5157_v57 }
0x221d   :  { %v2776_v18 = vsel %vm532_vm1, %v2770_v51, 0.0  ;;  %v2772_v10 = vmul.f32 %v6053_v62, %v5159_v41  ;;  %v6789_v41 = vld [vmem:[#allocation17_spill] sm:$0xff] }
0x221e   :  { %2777 = vadd.xlane.f32.xlu0 %v2776_v18  ;;  %v2779_v44 = vsel %vm532_vm1, %v2771_v43, 0.0  ;;  %v6791_v43 = vld [vmem:[#allocation19_spill] sm:$0xff] }
0x221f   :  { %v2782_v2 = vsel %vm532_vm1, %v2772_v10, 0.0  ;;  %v6790_v10 = vld [vmem:[#allocation18_spill] sm:$0xff] }
0x2220   :  { %2783 = vadd.xlane.f32.xlu1 %v2782_v2  ;;  %v6792_v2 = vld [vmem:[#allocation20_spill] sm:$0xff] }
0x2222   :  { %2780 = vadd.xlane.f32.xlu0 %v2779_v44 }
0x22a9   :  { %v2775_v19 = vpop.xlane.xlu1 %2774 }
0x22aa   :  { %v2792_v53 = vrot.slane %v2775_v19, %v5700_v50 }
0x22ab   :  { %v2778_v5 = vpop.xlane.xlu0 %2777 }
0x22ac   :  { %v2796_v16 = vrot.slane %v2778_v5, %v5700_v50 }
0x22ad   :  { %v2784_v14 = vpop.xlane.xlu1 %2783 }
0x22ae   :  { %v2805_v21 = vsel %vm567_vm2, %v2796_v16, %v2792_v53  ;;  %v2804_v62 = vrot.slane %v2784_v14, %v5700_v50 }
0x22af   :  { %v2781_v30 = vpop.xlane.xlu0 %2780 }
0x22b0   :  { %v2800_v6 = vrot.slane %v2781_v30, %v5700_v50 }
0x22b2   :  { %v2806_v63 = vsel %vm569_vm3, %v2800_v6, %v2805_v21 }
0x22b3   :  { %v2807_v54 = vsel %vm571_vm4, %v2804_v62, %v2806_v63 }
0x22b4   :  { %v2809_v36 = vsel %vm574_vm5, %v2807_v54, -inf }
0x22b5   :  { %2810 = vmax.xlane.f32.xlu0 %v2809_v36 }
0x2342   :  { %v2811_v26 = vpop.xlane.xlu0 %2810 }
0x2343   :  { %v2816_v49 = vrot.slane %v2811_v26, %v5392_v4  ;;  %v2820_v12 = vrot.slane %v2811_v26, %v5452_v20  ;;  %v2824_v25 = vrot.slane %v2811_v26, %v5489_v29  ;;  %v2828_v45 = vrot.slane %v2811_v26, %v5517_v34 }
0x2345   :  { %v2833_v24 = vsub.f32 %v2775_v19, %v2816_v49  ;;  %v2834_v7 = vsub.f32 %v2778_v5, %v2820_v12  ;;  %v2835_v32 = vsub.f32 %v2781_v30, %v2824_v25  ;;  %v2836_v46 = vsub.f32 %v2784_v14, %v2828_v45 }
0x2347   :  { %v2837_v33 = vmul.f32 1.442695, %v2833_v24  ;;  %v2839_v35 = vmul.f32 1.442695, %v2834_v7  ;;  %v2841_v60 = vmul.f32 1.442695, %v2835_v32 }
0x2348   :  { %v2843_v55 = vmul.f32 1.442695, %v2836_v46 }
0x2349   :  { %5160 = vpow2.f32 %v2837_v33 }
0x234a   :  { %5162 = vpow2.f32 %v2839_v35 }
0x234b   :  { %5164 = vpow2.f32 %v2841_v60 }
0x234c   :  { %5166 = vpow2.f32 %v2843_v55 }
0x2353   :  { %v5161_v57 = vpop.eup %5160 }
0x2354   :  { %v5163_v38 = vpop.eup %5162  ;;  %2850 = vperm.xlu1 %5021, %v5161_v57  }
0x2355   :  { %2853 = vperm.xlu0 %5020, %v5163_v38   ;;  %v5165_v51 = vpop.eup %5164 }
0x2356   :  { %v5167_v18 = vpop.eup %5166 }
0x2358   :  { %2856 = vperm.xlu1 %5021, %v5165_v51  }
0x2359   :  { %2915 = vbcast.lane.b32.xlu0 %v6789_v41, 256 }
0x235c   :  { %2859 = vperm.xlu1 %5021, %v5167_v18  }
0x235d   :  { %2922 = vbcast.lane.b32.xlu0 %v6790_v10, 256 }
0x2361   :  { %2929 = vbcast.lane.b32.xlu0 %v6791_v43, 256 }
0x2365   :  { %2936 = vbcast.lane.b32.xlu0 %v6792_v2, 256 }
0x23d3   :  { %v2851_v44 = vpop.permute.xlu1 %2850 }
0x23d4   :  { %v2854_v19 = vpop.permute.xlu0 %2853  ;;  %v2864_v14 = vrot.slane %v2851_v44, %v5700_v50 }
0x23d5   :  { %v2868_v16 = vrot.slane %v2854_v19, %v5700_v50 }
0x23d7   :  { %v2857_v5 = vpop.permute.xlu1 %2856  ;;  %v2877_v6 = vsel %vm567_vm2, %v2868_v16, %v2864_v14 }
0x23d8   :  { %v2872_v53 = vrot.slane %v2857_v5, %v5700_v50  ;;  %v2916_v26 = vpop.permute.xlu0 %2915 }
0x23da   :  { %v2878_v62 = vsel %vm569_vm3, %v2872_v53, %v2877_v6 }
0x23db   :  { %v2860_v30 = vpop.permute.xlu1 %2859 }
0x23dc   :  { %v2876_v21 = vrot.slane %v2860_v30, %v5700_v50  ;;  %v2923_v45 = vpop.permute.xlu0 %2922 }
0x23de   :  { %v2879_v63 = vsel %vm571_vm4, %v2876_v21, %v2878_v62 }
0x23df   :  { %v2881_v54 = vsel %vm574_vm5, %v2879_v63, 0.0 }
0x23e0   :  { %2882 = vadd.xlane.f32.xlu1 %v2881_v54  ;;  %v2930_v35 = vpop.permute.xlu0 %2929 }
0x23e4   :  { %v2937_v43 = vpop.permute.xlu0 %2936 }
0x246d   :  { %v2883_v36 = vpop.xlane.xlu1 %2882 }
0x246e   :  { %5168 = vrcp.f32 %v2883_v36 }
0x2478   :  { %v5169_v49 = vpop.eup %5168 }
0x2479   :  { %v2889_v12 = vrot.slane %v5169_v49, %v5392_v4  ;;  %v2893_v25 = vrot.slane %v5169_v49, %v5452_v20  ;;  %v2897_v33 = vrot.slane %v5169_v49, %v5489_v29  ;;  %v2901_v55 = vrot.slane %v5169_v49, %v5517_v34 }
0x247b   :  { %v2906_v24 = vmul.f32 %v5161_v57, %v2889_v12  ;;  %v2907_v32 = vmul.f32 %v5163_v38, %v2893_v25  ;;  %v2908_v60 = vmul.f32 %v5165_v51, %v2897_v33  ;;  %v2909_v10 = vmul.f32 %v5167_v18, %v2901_v55 }
0x247d   :  { %v2942_v7 = vmul.f32 %v2916_v26, %v2906_v24  ;;  %v2943_v46 = vmul.f32 %v2923_v45, %v2907_v32  ;;  %v2944_v41 = vmul.f32 %v2930_v35, %v2908_v60  ;;  %v2945_v2 = vmul.f32 %v2937_v43, %v2909_v10 }
0x247f   :  { %2951 = vperm.xlu0 %5020, %v2942_v7  }
0x2483   :  { %2954 = vperm.xlu0 %5020, %v2943_v46  }
0x2487   :  { %2957 = vperm.xlu0 %5020, %v2944_v41  }
0x248b   :  { %2960 = vperm.xlu0 %5020, %v2945_v2  }
0x248f   :  { %2982 = vrot.lane.b32.xlu0 %v6253_v9, %s5315_s17 }
0x24fe   :  { %v2952_v57 = vpop.permute.xlu0 %2951 }
0x24ff   :  { %v2965_v38 = vrot.slane %v2952_v57, %v5700_v50 }
0x2501   :  { %v6320_v44 = vsel %vm4025_vm13, %v6213_v37, %v2965_v38 }
0x2502   :  { %v2955_v51 = vpop.permute.xlu0 %2954 }
0x2503   :  { %v2969_v19 = vrot.slane %v2955_v51, %v5700_v50 }
0x2505   :  { %v6325_v18 = vsel %vm4025_vm13, %v6218_v28, %v2969_v19  ;;  %v2978_v30 = vsel %vm567_vm2, %v2969_v19, %v2965_v38 }
0x2506   :  { %v2958_v5 = vpop.permute.xlu0 %2957 }
0x2507   :  { %v2973_v16 = vrot.slane %v2958_v5, %v5700_v50 }
0x2509   :  { %v6330_v14 = vsel %vm4025_vm13, %v6223_v15, %v2973_v16  ;;  %v2979_v6 = vsel %vm569_vm3, %v2973_v16, %v2978_v30 }
0x250a   :  { %v2961_v53 = vpop.permute.xlu0 %2960 }
0x250b   :  { %v2977_v37 = vrot.slane %v2961_v53, %v5700_v50 }
0x250d   :  { %v6337_v21 = vsel %vm4025_vm13, %v6231_v3, %v2977_v37  ;;  %v2980_v28 = vsel %vm571_vm4, %v2977_v37, %v2979_v6  ;;  %v6388_v6 = vld [vmem:[%s6734_s5] ss:$0 sm:$0xff] }
0x250e   :  { %v2983_v62 = vpop.permute.xlu0 %2982 }
0x250f   :  { %v2985_v63 = vsel %vm532_vm1, %v2980_v28, %v2983_v62 }
0x2510   :  { %4797 = vmatmul.mubr.msk.f32.vlgmr.msra.gmra.mrb[10].mxu0 %vm759_vm6, %v2985_v63 }
0x2511   :  { %4973 = vmatpush3.bf16.msra.mxu0 %v5403_v8  ;;  %4815 = vmatprep.mubr.msk.f32.mxu0 %vm5309_vm0, %v6782_v23 }
0x2512   :  { %4974 = vmatprep.subr.bf16.mxu0 %v6781_v52 }
0x2515   :  { %4976 = vmatpush3.bf16.msra.mxu0 %v5414_v11 }
0x2516   :  { %4977 = vmatprep.subr.bf16.mxu0 %v6781_v52 }
0x2519   :  { %4979 = vmatpush3.bf16.msra.mxu0 %v5460_v22 }
0x251a   :  { %4980 = vmatprep.subr.bf16.mxu0 %v6781_v52 }
0x251d   :  { %4982 = vmatpush3.bf16.msra.mxu0 %v5480_v27 }
0x251e   :  { %5001 = vmatprep.subr.bf16.mxu0 %v6781_v52 }
0x25e3   :  { %v3055_v15 = vpop.f32.mrb[10].mxu0 }
0x25e4   :  { %v3056_v3 = vadd.f32 %v6131_v40, %v3055_v15  ;;  %v4798_v54 = vpop.f32.mrb[11].mxu0 }
0x25e6   :  { %5170 = vtanh.f32 %v3056_v3  ;;  %v4480_v26 = vmul.f32 -1.442695, %v3056_v3 }
0x25e8   :  { %5172 = vpow2.f32 %v4480_v26 }
0x25f0   :  { %v5171_v36 = vpop.eup %5170 }
0x25f1   :  { %3068 = vrot.lane.b32.xlu1 %v5171_v36, %s5313_s15 }
0x25f2   :  { %v5173_v49 = vpop.eup %5172 }
0x25f3   :  { %v3062_v12 = vadd.f32 1.0, %v5173_v49 }
0x25f5   :  { %5174 = vrcp.f32 %v3062_v12 }
0x25ff   :  { %v5175_v25 = vpop.eup %5174 }
0x2600   :  { %v3066_v7 = vmul.f32 %v5175_v25, %v6249_v61 }
0x2663   :  { %v3069_v45 = vpop.permute.xlu1 %3068 }
0x2664   :  { %v3071_v24 = vmul.f32 %v5175_v25, %v3069_v45 }
0x2666   :  { %3073 = vrot.lane.b32.xlu0 %v3071_v24, %s5314_s16 }
0x26d8   :  { %v3074_v32 = vpop.permute.xlu0 %3073 }
0x26d9   :  { %v6356_v33 = vadd.f32 %v3074_v32, %v3066_v7 }
0x26db   :  { %5176 = vtanh.f32 %v6356_v33 }
0x26e5   :  { %v5177_v40 = vpop.eup %5176 }
0x26e6   :  { %3079 = vrot.lane.b32.xlu0 %v5177_v40, %s5313_s15 }
0x2758   :  { %v3080_v35 = vpop.permute.xlu0 %3079 }
0x2759   :  { %v6360_v46 = vmul.f32 %v5175_v25, %v3080_v35 }
0x275b   :  { %3084 = vrot.lane.b32.xlu0 %v6360_v46, %s5314_s16 }
0x27cd   :  { %v3085_v60 = vpop.permute.xlu0 %3084 }
0x27ce   :  { %v3087_v55 = vsel %vm861_vm7, %v3085_v60, %v6356_v33 }
0x27cf   :  { %4816 = vmatmul.mubr.msk.f32.vlgmr.msra.gmra.mrb[12].mxu0 %vm395_vm8, %v3087_v55 }
0x27d0   :  { %5003 = vmatpush3.bf16.msra.mxu0 %v5736_v13  ;;  %4860 = vmatprep.mubr.msk.f32.mxu0 %vm5309_vm0, %v6782_v23 }
0x27d1   :  { %5004 = vmatprep.subr.bf16.mxu0 %v6781_v52 }
0x27d4   :  { %5006 = vmatpush3.bf16.msra.mxu0 %v5748_v17 }
0x27d5   :  { %4858 = vmatprep.subr.mxu0 %v6782_v23 }
0x27d8   :  { %4859 = vmatpush3.msra.mxu0 %v6157_v56 }
0x28a2   :  { %v3157_v61 = vpop.f32.mrb[12].mxu0 }
0x28a3   :  { %v3168_v41 = vrot.slane %v3157_v61, %v5672_v42  ;;  %v4817_v10 = vpop.f32.mrb[13].mxu0 }
0x28a5   :  { %v3169_v43 = vcombine.high %v3168_v41, %v3168_v41  ;;  %v3176_v2 = vrot.slane %v3168_v41, %v5672_v42 }
0x28a7   :  { %v3183_v13 = vrot.slane %v3169_v43, %v5672_v42  ;;  %v3184_v57 = vcombine.high %v3176_v2, %v3176_v2  ;;  %v3189_v38 = vrot.slane %v3176_v2, %v5392_v4 }
0x28a9   :  { %v3185_v51 = vcombine.high %v3183_v13, %v3183_v13  ;;  %v3193_v19 = vrot.slane %v3183_v13, %v5392_v4  ;;  %v3197_v17 = vrot.slane %v3184_v57, %v5392_v4  ;;  %v3206_v5 = vadd.f32 %v3189_v38, %v5663_v47 }
0x28ab   :  { %v3201_v56 = vrot.slane %v3185_v51, %v5392_v4  ;;  %v3207_v16 = vadd.f32 %v3193_v19, %v5665_v48  ;;  %v3208_v53 = vadd.f32 %v3197_v17, %v5667_v58  ;;  %5178 = vtanh.f32 %v3206_v5 }
0x28ad   :  { %v3209_v30 = vadd.f32 %v3201_v56, %v5669_v59  ;;  %5180 = vtanh.f32 %v3207_v16 }
0x28ae   :  { %5182 = vtanh.f32 %v3208_v53 }
0x28af   :  { %5184 = vtanh.f32 %v3209_v30 }
0x28b5   :  { %v5179_v37 = vpop.eup %5178 }
0x28b6   :  { %v3214_v28 = vmul.f32 %v6388_v6, %v5179_v37 }
0x28b7   :  { %v5181_v62 = vpop.eup %5180 }
0x28b8   :  { %v5183_v63 = vpop.eup %5182  ;;  %v3218_v15 = vsel %vm532_vm1, %v3214_v28, 0.0  ;;  %v3215_v3 = vmul.f32 %v6388_v6, %v5181_v62 }
0x28b9   :  { %v5185_v54 = vpop.eup %5184  ;;  %3219 = vadd.xlane.f32.xlu0 %v3218_v15  ;;  %v3216_v36 = vmul.f32 %v6388_v6, %v5183_v63 }
0x28ba   :  { %v3221_v26 = vsel %vm532_vm1, %v3215_v3, 0.0  ;;  %v3217_v12 = vmul.f32 %v6388_v6, %v5185_v54  ;;  %v6793_v3 = vld [vmem:[#allocation21_spill] sm:$0xff]  ;;  %v6794_v54 = vld [vmem:[#allocation22_spill] sm:$0xff] }
0x28bb   :  { %3222 = vadd.xlane.f32.xlu1 %v3221_v26  ;;  %v3224_v49 = vsel %vm532_vm1, %v3216_v36, 0.0  ;;  %v6795_v36 = vld [vmem:[#allocation23_spill] sm:$0xff]  ;;  %v6796_v26 = vld [vmem:[#allocation24_spill] sm:$0xff] }
0x28bc   :  { %v3227_v25 = vsel %vm532_vm1, %v3217_v12, 0.0 }
0x28bd   :  { %3225 = vadd.xlane.f32.xlu0 %v3224_v49 }
0x28c1   :  { %3228 = vadd.xlane.f32.xlu0 %v3227_v25 }
0x2946   :  { %v3220_v45 = vpop.xlane.xlu0 %3219 }
0x2947   :  { %v3237_v40 = vrot.slane %v3220_v45, %v5700_v50 }
0x2948   :  { %v3223_v24 = vpop.xlane.xlu1 %3222 }
0x2949   :  { %v3241_v7 = vrot.slane %v3223_v24, %v5700_v50 }
0x294a   :  { %v3226_v32 = vpop.xlane.xlu0 %3225 }
0x294b   :  { %v3245_v35 = vrot.slane %v3226_v32, %v5700_v50  ;;  %v3250_v60 = vsel %vm567_vm2, %v3241_v7, %v3237_v40 }
0x294d   :  { %v3251_v41 = vsel %vm569_vm3, %v3245_v35, %v3250_v60 }
0x294e   :  { %v3229_v55 = vpop.xlane.xlu0 %3228 }
0x294f   :  { %v3249_v61 = vrot.slane %v3229_v55, %v5700_v50 }
0x2951   :  { %v3252_v10 = vsel %vm571_vm4, %v3249_v61, %v3251_v41 }
0x2952   :  { %v3254_v43 = vsel %vm574_vm5, %v3252_v10, -inf }
0x2953   :  { %3255 = vmax.xlane.f32.xlu0 %v3254_v43 }
0x29e0   :  { %v3256_v2 = vpop.xlane.xlu0 %3255 }
0x29e1   :  { %v3261_v13 = vrot.slane %v3256_v2, %v5392_v4  ;;  %v3265_v57 = vrot.slane %v3256_v2, %v5452_v20  ;;  %v3269_v38 = vrot.slane %v3256_v2, %v5489_v29  ;;  %v3273_v51 = vrot.slane %v3256_v2, %v5517_v34 }
0x29e3   :  { %v3278_v19 = vsub.f32 %v3220_v45, %v3261_v13  ;;  %v3279_v17 = vsub.f32 %v3223_v24, %v3265_v57  ;;  %v3280_v5 = vsub.f32 %v3226_v32, %v3269_v38  ;;  %v3281_v53 = vsub.f32 %v3229_v55, %v3273_v51 }
0x29e5   :  { %v3282_v56 = vmul.f32 1.442695, %v3278_v19  ;;  %v3284_v16 = vmul.f32 1.442695, %v3279_v17  ;;  %v3286_v30 = vmul.f32 1.442695, %v3280_v5 }
0x29e6   :  { %v3288_v37 = vmul.f32 1.442695, %v3281_v53 }
0x29e7   :  { %5186 = vpow2.f32 %v3282_v56 }
0x29e8   :  { %5188 = vpow2.f32 %v3284_v16 }
0x29e9   :  { %5190 = vpow2.f32 %v3286_v30 }
0x29ea   :  { %5192 = vpow2.f32 %v3288_v37 }
0x29f1   :  { %v5187_v28 = vpop.eup %5186 }
0x29f2   :  { %v5189_v62 = vpop.eup %5188  ;;  %3295 = vperm.xlu1 %5021, %v5187_v28  }
0x29f3   :  { %3298 = vperm.xlu0 %5020, %v5189_v62   ;;  %v5191_v63 = vpop.eup %5190 }
0x29f4   :  { %v5193_v15 = vpop.eup %5192 }
0x29f6   :  { %3301 = vperm.xlu1 %5021, %v5191_v63  }
0x29fa   :  { %3304 = vperm.xlu1 %5021, %v5193_v15  }
0x29fe   :  { %3360 = vbcast.lane.b32.xlu1 %v6793_v3, 256 }
0x2a02   :  { %3367 = vbcast.lane.b32.xlu1 %v6794_v54, 256 }
0x2a06   :  { %3374 = vbcast.lane.b32.xlu1 %v6795_v36, 256 }
0x2a0a   :  { %3381 = vbcast.lane.b32.xlu1 %v6796_v26, 256 }
0x2a71   :  { %v3296_v49 = vpop.permute.xlu1 %3295 }
0x2a72   :  { %v3299_v12 = vpop.permute.xlu0 %3298  ;;  %v3309_v24 = vrot.slane %v3296_v49, %v5700_v50 }
0x2a73   :  { %v3313_v45 = vrot.slane %v3299_v12, %v5700_v50 }
0x2a75   :  { %v3302_v25 = vpop.permute.xlu1 %3301  ;;  %v3322_v40 = vsel %vm567_vm2, %v3313_v45, %v3309_v24 }
0x2a76   :  { %v3317_v7 = vrot.slane %v3302_v25, %v5700_v50 }
0x2a78   :  { %v3323_v60 = vsel %vm569_vm3, %v3317_v7, %v3322_v40 }
0x2a79   :  { %v3305_v32 = vpop.permute.xlu1 %3304 }
0x2a7a   :  { %v3321_v35 = vrot.slane %v3305_v32, %v5700_v50 }
0x2a7c   :  { %v3324_v55 = vsel %vm571_vm4, %v3321_v35, %v3323_v60 }
0x2a7d   :  { %v3326_v61 = vsel %vm574_vm5, %v3324_v55, 0.0  ;;  %v3361_v10 = vpop.permute.xlu1 %3360 }
0x2a7e   :  { %3327 = vadd.xlane.f32.xlu0 %v3326_v61 }
0x2a81   :  { %v3368_v57 = vpop.permute.xlu1 %3367 }
0x2a85   :  { %v3375_v5 = vpop.permute.xlu1 %3374 }
0x2a89   :  { %v3382_v3 = vpop.permute.xlu1 %3381 }
0x2a94   :  { %3427 = vrot.lane.b32.xlu0 %v6360_v46, %s5315_s17 }
0x2b0b   :  { %v3328_v41 = vpop.xlane.xlu0 %3327 }
0x2b0c   :  { %5194 = vrcp.f32 %v3328_v41 }
0x2b0f   :  { %v3428_v32 = vpop.permute.xlu0 %3427 }
0x2b16   :  { %v5195_v43 = vpop.eup %5194 }
0x2b17   :  { %v3334_v2 = vrot.slane %v5195_v43, %v5392_v4  ;;  %v3338_v13 = vrot.slane %v5195_v43, %v5452_v20  ;;  %v3342_v17 = vrot.slane %v5195_v43, %v5489_v29  ;;  %v3346_v53 = vrot.slane %v5195_v43, %v5517_v34 }
0x2b19   :  { %v3351_v38 = vmul.f32 %v5187_v28, %v3334_v2  ;;  %v3352_v19 = vmul.f32 %v5189_v62, %v3338_v13  ;;  %v3353_v16 = vmul.f32 %v5191_v63, %v3342_v17  ;;  %v3354_v37 = vmul.f32 %v5193_v15, %v3346_v53 }
0x2b1b   :  { %v3387_v51 = vmul.f32 %v3361_v10, %v3351_v38  ;;  %v3388_v56 = vmul.f32 %v3368_v57, %v3352_v19  ;;  %v3389_v30 = vmul.f32 %v3375_v5, %v3353_v16  ;;  %v3390_v54 = vmul.f32 %v3382_v3, %v3354_v37 }
0x2b1d   :  { %3396 = vperm.xlu1 %5021, %v3387_v51  }
0x2b21   :  { %3399 = vperm.xlu1 %5021, %v3388_v56  }
0x2b25   :  { %3402 = vperm.xlu1 %5021, %v3389_v30  }
0x2b29   :  { %3405 = vperm.xlu1 %5021, %v3390_v54  }
0x2b9c   :  { %v3397_v36 = vpop.permute.xlu1 %3396 }
0x2b9d   :  { %v3410_v28 = vrot.slane %v3397_v36, %v5700_v50 }
0x2b9f   :  { %v6431_v62 = vsel %vm4030_vm14, %v6320_v44, %v3410_v28 }
0x2ba0   :  { %v3400_v26 = vpop.permute.xlu1 %3399 }
0x2ba1   :  { %v3414_v63 = vrot.slane %v3400_v26, %v5700_v50 }
0x2ba3   :  { %v6436_v49 = vsel %vm4030_vm14, %v6325_v18, %v3414_v63  ;;  %v3423_v24 = vsel %vm567_vm2, %v3414_v63, %v3410_v28 }
0x2ba4   :  { %v3403_v15 = vpop.permute.xlu1 %3402 }
0x2ba5   :  { %v3418_v12 = vrot.slane %v3403_v15, %v5700_v50 }
0x2ba7   :  { %v6441_v25 = vsel %vm4030_vm14, %v6330_v14, %v3418_v12  ;;  %v3424_v7 = vsel %vm569_vm3, %v3418_v12, %v3423_v24 }
0x2ba8   :  { %v3406_v45 = vpop.permute.xlu1 %3405 }
0x2ba9   :  { %v3422_v44 = vrot.slane %v3406_v45, %v5700_v50 }
0x2bab   :  { %v3425_v40 = vsel %vm571_vm4, %v3422_v44, %v3424_v7  ;;  %v6449_v18 = vsel %vm4030_vm14, %v6337_v21, %v3422_v44 }
0x2bac   :  { %v3430_v35 = vsel %vm532_vm1, %v3425_v40, %v3428_v32 }
0x2bad   :  { %4829 = vmatmul.mubr.msk.f32.vlgmr.msra.gmra.mrb[12].mxu1 %vm759_vm6, %v3430_v35 }
0x2bae   :  { %4991 = vmatpush3.bf16.msra.mxu1 %v5403_v8  ;;  %4847 = vmatprep.mubr.msk.f32.mxu1 %vm5309_vm0, %v6782_v23  ;;  %v6465_v8 = vld [vmem:[%s6736_s7] ss:$0 sm:$0xff]  ;;  %s5316_s7 = smov [#allocation5]  }
0x2baf   :  { %4992 = vmatprep.subr.bf16.mxu1 %v6781_v52  ;;  %s4434_s23 = sshll.u32 %s5316_s7, 4  ;;  %s4435_s23 = int_to_ptr.vmem [resolvable:$true] %s4434_s23 }
0x2bb0   :  { %s5257_s2 = scalar_lea.vmem %s4435_s23, 512  ;;  %p5262_p9 = scmp.lt.s32.totalorder %s4435_s23, %s4435_s23 }
0x2bb1   :  { %p5258_p8 = scmp.ne.s32.totalorder %s4435_s23, %s5257_s2  ;;  %p5263_p10 = scmp.lt.s32.totalorder %s5257_s2, %s5257_s2 }
0x2bb2   :  { %4994 = vmatpush3.bf16.msra.mxu1 %v5414_v11 }
0x2bb3   :  { %4995 = vmatprep.subr.bf16.mxu1 %v6781_v52  ;;  %p5264_p11 = por %p5263_p10, %p5262_p9 }
0x2bb5   :  { %p5265_p12 = pnand %p5264_p11, %p5258_p8 }
0x2bb6   :  { %4997 = vmatpush3.bf16.msra.mxu1 %v5460_v22 }
0x2bb7   :  { %4998 = vmatprep.subr.bf16.mxu1 %v6781_v52 }
0x2bba   :  { %5000 = vmatpush3.bf16.msra.mxu1 %v5480_v27 }
0x2c80   :  { %v3500_v14 = vpop.f32.mrb[12].mxu1 }
0x2c81   :  { %v3501_v23 = vadd.f32 %v6465_v8, %v3500_v14  ;;  %v4830_v21 = vpop.f32.mrb[13].mxu1 }
0x2c83   :  { %5196 = vtanh.f32 %v3501_v23  ;;  %v4483_v11 = vmul.f32 -1.442695, %v3501_v23 }
0x2c85   :  { %5198 = vpow2.f32 %v4483_v11 }
0x2c8d   :  { %v5197_v60 = vpop.eup %5196 }
0x2c8e   :  { %3513 = vrot.lane.b32.xlu1 %v5197_v60, %s5313_s15 }
0x2c8f   :  { %v5199_v22 = vpop.eup %5198 }
0x2c90   :  { %v3507_v55 = vadd.f32 1.0, %v5199_v22 }
0x2c92   :  { %5200 = vrcp.f32 %v3507_v55 }
0x2c9c   :  { %v5201_v52 = vpop.eup %5200 }
0x2c9d   :  { %v3511_v41 = vmul.f32 %v5201_v52, %v6356_v33 }
0x2d00   :  { %v3514_v27 = vpop.permute.xlu1 %3513 }
0x2d01   :  { %v3516_v61 = vmul.f32 %v5201_v52, %v3514_v27 }
0x2d03   :  { %3518 = vrot.lane.b32.xlu1 %v3516_v61, %s5314_s16 }
0x2d75   :  { %v3519_v10 = vpop.permute.xlu1 %3518 }
0x2d76   :  { %v6471_v43 = vadd.f32 %v3519_v10, %v3511_v41 }
0x2d78   :  { %5202 = vtanh.f32 %v6471_v43 }
0x2d82   :  { %v5203_v2 = vpop.eup %5202 }
0x2d83   :  { %3524 = vrot.lane.b32.xlu1 %v5203_v2, %s5313_s15 }
0x2df5   :  { %v3525_v13 = vpop.permute.xlu1 %3524 }
0x2df6   :  { %v6475_v57 = vmul.f32 %v5201_v52, %v3525_v13 }
0x2df8   :  { %3529 = vrot.lane.b32.xlu1 %v6475_v57, %s5314_s16 }
0x2e6a   :  { %v3530_v38 = vpop.permute.xlu1 %3529 }
0x2e6b   :  { %v3532_v51 = vsel %vm861_vm7, %v3530_v38, %v6471_v43 }
0x2e6c   :  { %4848 = vmatmul.mubr.msk.f32.vlgmr.msra.gmra.mrb[14].mxu1 %vm395_vm8, %v3532_v51 }
0x2f3f   :  { %v3602_v33 = vpop.f32.mrb[14].mxu1 }
0x2f40   :  { %v3613_v19 = vrot.slane %v3602_v33, %v5672_v42  ;;  %v4849_v17 = vpop.f32.mrb[15].mxu1 }
0x2f42   :  { %v3614_v5 = vcombine.high %v3613_v19, %v3613_v19  ;;  %v3621_v56 = vrot.slane %v3613_v19, %v5672_v42 }
0x2f44   :  { %v3628_v16 = vrot.slane %v3614_v5, %v5672_v42  ;;  %v3629_v53 = vcombine.high %v3621_v56, %v3621_v56  ;;  %v3634_v30 = vrot.slane %v3621_v56, %v5392_v4 }
0x2f46   :  { %v3630_v37 = vcombine.high %v3628_v16, %v3628_v16  ;;  %v3638_v3 = vrot.slane %v3628_v16, %v5392_v4  ;;  %v3642_v54 = vrot.slane %v3629_v53, %v5392_v4  ;;  %v3651_v36 = vadd.f32 %v3634_v30, %v5663_v47 }
0x2f48   :  { %v3646_v28 = vrot.slane %v3630_v37, %v5392_v4  ;;  %v3652_v26 = vadd.f32 %v3638_v3, %v5665_v48  ;;  %v3653_v63 = vadd.f32 %v3642_v54, %v5667_v58  ;;  %5204 = vtanh.f32 %v3651_v36  ;;  %v6797_v36 = vld [vmem:[#allocation25_spill] sm:$0xff] }
0x2f4a   :  { %v3654_v15 = vadd.f32 %v3646_v28, %v5669_v59  ;;  %5206 = vtanh.f32 %v3652_v26  ;;  %v6798_v26 = vld [vmem:[#allocation26_spill] sm:$0xff] }
0x2f4b   :  { %5208 = vtanh.f32 %v3653_v63  ;;  %v6799_v63 = vld [vmem:[#allocation27_spill] sm:$0xff] }
0x2f4c   :  { %5210 = vtanh.f32 %v3654_v15  ;;  %v6800_v15 = vld [vmem:[#allocation28_spill] sm:$0xff] }
0x2f52   :  { %v5205_v12 = vpop.eup %5204 }
0x2f53   :  { %v3659_v45 = vmul.f32 %v6388_v6, %v5205_v12 }
0x2f54   :  { %v5207_v24 = vpop.eup %5206 }
0x2f55   :  { %v5209_v44 = vpop.eup %5208  ;;  %v3663_v7 = vsel %vm532_vm1, %v3659_v45, 0.0  ;;  %v3660_v47 = vmul.f32 %v6388_v6, %v5207_v24 }
0x2f56   :  { %v5211_v32 = vpop.eup %5210  ;;  %3664 = vadd.xlane.f32.xlu1 %v3663_v7  ;;  %v3661_v59 = vmul.f32 %v6388_v6, %v5209_v44 }
0x2f57   :  { %v3666_v48 = vsel %vm532_vm1, %v3660_v47, 0.0  ;;  %v3662_v58 = vmul.f32 %v6388_v6, %v5211_v32 }
0x2f58   :  { %3667 = vadd.xlane.f32.xlu0 %v3666_v48  ;;  %v3669_v35 = vsel %vm532_vm1, %v3661_v59, 0.0 }
0x2f59   :  { %v3672_v40 = vsel %vm532_vm1, %v3662_v58, 0.0 }
0x2f5a   :  { %3673 = vadd.xlane.f32.xlu1 %v3672_v40 }
0x2f5c   :  { %3670 = vadd.xlane.f32.xlu0 %v3669_v35 }
0x2fe3   :  { %v3665_v14 = vpop.xlane.xlu1 %3664 }
0x2fe4   :  { %v3682_v11 = vrot.slane %v3665_v14, %v5700_v50 }
0x2fe5   :  { %v3668_v23 = vpop.xlane.xlu0 %3667 }
0x2fe6   :  { %v3686_v21 = vrot.slane %v3668_v23, %v5700_v50 }
0x2fe7   :  { %v3674_v60 = vpop.xlane.xlu1 %3673 }
0x2fe8   :  { %v3695_v52 = vsel %vm567_vm2, %v3686_v21, %v3682_v11  ;;  %v3694_v6 = vrot.slane %v3674_v60, %v5700_v50 }
0x2fe9   :  { %v3671_v22 = vpop.xlane.xlu0 %3670 }
0x2fea   :  { %v3690_v55 = vrot.slane %v3671_v22, %v5700_v50 }
0x2fec   :  { %v3696_v27 = vsel %vm569_vm3, %v3690_v55, %v3695_v52 }
0x2fed   :  { %v3697_v61 = vsel %vm571_vm4, %v3694_v6, %v3696_v27 }
0x2fee   :  { %v3699_v41 = vsel %vm574_vm5, %v3697_v61, -inf }
0x2fef   :  { %3700 = vmax.xlane.f32.xlu0 %v3699_v41 }
0x307c   :  { %v3701_v10 = vpop.xlane.xlu0 %3700 }
0x307d   :  { %v3706_v2 = vrot.slane %v3701_v10, %v5392_v4  ;;  %v3710_v13 = vrot.slane %v3701_v10, %v5452_v20  ;;  %v3714_v38 = vrot.slane %v3701_v10, %v5489_v29  ;;  %v3718_v51 = vrot.slane %v3701_v10, %v5517_v34 }
0x307f   :  { %v3723_v33 = vsub.f32 %v3665_v14, %v3706_v2  ;;  %v3724_v19 = vsub.f32 %v3668_v23, %v3710_v13  ;;  %v3725_v17 = vsub.f32 %v3671_v22, %v3714_v38  ;;  %v3726_v16 = vsub.f32 %v3674_v60, %v3718_v51 }
0x3081   :  { %v3727_v5 = vmul.f32 1.442695, %v3723_v33  ;;  %v3729_v56 = vmul.f32 1.442695, %v3724_v19  ;;  %v3731_v53 = vmul.f32 1.442695, %v3725_v17 }
0x3082   :  { %v3733_v30 = vmul.f32 1.442695, %v3726_v16 }
0x3083   :  { %5212 = vpow2.f32 %v3727_v5 }
0x3084   :  { %5214 = vpow2.f32 %v3729_v56 }
0x3085   :  { %5216 = vpow2.f32 %v3731_v53 }
0x3086   :  { %5218 = vpow2.f32 %v3733_v30 }
0x308d   :  { %v5213_v37 = vpop.eup %5212 }
0x308e   :  { %v5215_v3 = vpop.eup %5214  ;;  %3740 = vperm.xlu1 %5021, %v5213_v37  }
0x308f   :  { %3743 = vperm.xlu0 %5020, %v5215_v3   ;;  %v5217_v54 = vpop.eup %5216 }
0x3090   :  { %v5219_v28 = vpop.eup %5218 }
0x3092   :  { %3746 = vperm.xlu1 %5021, %v5217_v54  }
0x3093   :  { %3805 = vbcast.lane.b32.xlu0 %v6797_v36, 256 }
0x3096   :  { %3749 = vperm.xlu1 %5021, %v5219_v28  }
0x3097   :  { %3812 = vbcast.lane.b32.xlu0 %v6798_v26, 256 }
0x309b   :  { %3819 = vbcast.lane.b32.xlu0 %v6799_v63, 256 }
0x309f   :  { %3826 = vbcast.lane.b32.xlu0 %v6800_v15, 256 }
0x310d   :  { %v3741_v12 = vpop.permute.xlu1 %3740 }
0x310e   :  { %v3744_v45 = vpop.permute.xlu0 %3743  ;;  %v3754_v7 = vrot.slane %v3741_v12, %v5700_v50 }
0x310f   :  { %v3758_v44 = vrot.slane %v3744_v45, %v5700_v50 }
0x3111   :  { %v3747_v24 = vpop.permute.xlu1 %3746  ;;  %v3767_v48 = vsel %vm567_vm2, %v3758_v44, %v3754_v7 }
0x3112   :  { %v3762_v47 = vrot.slane %v3747_v24, %v5700_v50  ;;  %v3806_v23 = vpop.permute.xlu0 %3805 }
0x3114   :  { %v3768_v59 = vsel %vm569_vm3, %v3762_v47, %v3767_v48  ;;  %v4078_v48 = vrot.slane %v5909_v1, %v5672_v42  ;;  %v4150_v1 = vrot.slane %v6253_v9, %v5672_v42 }
0x3115   :  { %v3750_v32 = vpop.permute.xlu1 %3749 }
0x3116   :  { %v3766_v58 = vrot.slane %v3750_v32, %v5700_v50  ;;  %v3813_v22 = vpop.permute.xlu0 %3812 }
0x3118   :  { %v3769_v40 = vsel %vm571_vm4, %v3766_v58, %v3768_v59  ;;  %v4102_v58 = vrot.slane %v6024_v39, %v5672_v42  ;;  %v4050_v59 = vrot.slane %v5806_v0, %v5672_v42 }
0x3119   :  { %v3771_v35 = vsel %vm574_vm5, %v3769_v40, 0.0  ;;  %v4079_v40 = vcombine.high %v4078_v48, %v4078_v48 }
0x311a   :  { %3772 = vadd.xlane.f32.xlu1 %v3771_v35  ;;  %v3820_v61 = vpop.permute.xlu0 %3819  ;;  %v4126_v35 = vrot.slane %v6141_v31, %v5672_v42  ;;  %v6571_v39 = vrot.slane %v4050_v59, %v5672_v42  ;;  %v4174_v31 = vrot.slane %v6360_v46, %v5672_v42  ;;  %v4110_v9 = vrot.slane %v4102_v58, %v5672_v42 }
0x311e   :  { %v3827_v51 = vpop.permute.xlu0 %3826 }
0x31a7   :  { %v3773_v14 = vpop.xlane.xlu1 %3772 }
0x31a8   :  { %5220 = vrcp.f32 %v3773_v14  ;;  %v4051_v14 = vcombine.high %v4050_v59, %v4050_v59 }
0x31aa   :  { %v4065_v0 = vrot.slane %v4051_v14, %v5672_v42 }
0x31ac   :  { %v4067_v46 = vcombine.high %v4065_v0, %v4065_v0 }
0x31b2   :  { %v5221_v21 = vpop.eup %5220 }
0x31b3   :  { %v3779_v60 = vrot.slane %v5221_v21, %v5392_v4  ;;  %v3783_v11 = vrot.slane %v5221_v21, %v5452_v20  ;;  %v3787_v27 = vrot.slane %v5221_v21, %v5489_v29  ;;  %v3791_v2 = vrot.slane %v5221_v21, %v5517_v34 }
0x31b4   :  { %v4086_v21 = vrot.slane %v4078_v48, %v5672_v42 }
0x31b5   :  { %v3796_v55 = vmul.f32 %v5213_v37, %v3779_v60  ;;  %v3797_v6 = vmul.f32 %v5215_v3, %v3783_v11  ;;  %v3798_v10 = vmul.f32 %v5217_v54, %v3787_v27  ;;  %v3799_v38 = vmul.f32 %v5219_v28, %v3791_v2 }
0x31b6   :  { %v4127_v60 = vcombine.high %v4126_v35, %v4126_v35  ;;  %v4198_v27 = vrot.slane %v6475_v57, %v5672_v42  ;;  %v4151_v2 = vcombine.high %v4150_v1, %v4150_v1 }
0x31b7   :  { %v3832_v52 = vmul.f32 %v3806_v23, %v3796_v55  ;;  %v3833_v41 = vmul.f32 %v3813_v22, %v3797_v6  ;;  %v3834_v13 = vmul.f32 %v3820_v61, %v3798_v10  ;;  %v3835_v33 = vmul.f32 %v3827_v51, %v3799_v38 }
0x31b8   :  { %v4093_v23 = vrot.slane %v4079_v40, %v5672_v42  ;;  %v4094_v55 = vcombine.high %v4086_v21, %v4086_v21  ;;  %v4141_v6 = vrot.slane %v4127_v60, %v5672_v42  ;;  %v4134_v10 = vrot.slane %v4126_v35, %v5672_v42 }
0x31b9   :  { %3841 = vperm.xlu0 %5020, %v3832_v52   ;;  %v4244_v52 = vrot.slane %v4086_v21, %v5392_v4  ;;  %v4175_v51 = vcombine.high %v4174_v31, %v4174_v31 }
0x31ba   :  { %v4095_v22 = vcombine.high %v4093_v23, %v4093_v23  ;;  %v4248_v61 = vrot.slane %v4093_v23, %v5392_v4 }
0x31bc   :  { %v4256_v38 = vrot.slane %v4095_v22, %v5392_v4 }
0x31bd   :  { %3844 = vperm.xlu0 %5020, %v3833_v41  }
0x31c1   :  { %3847 = vperm.xlu0 %5020, %v3834_v13   ;;  %v4066_v13 = vcombine.high %v6571_v39, %v6571_v39 }
0x31c5   :  { %3850 = vperm.xlu0 %5020, %v3835_v33   ;;  %v6587_v33 = vrot.slane %v4094_v55, %v5392_v4 }
0x31c9   :  { %3872 = vrot.lane.b32.xlu0 %v6475_v57, %s5315_s17  ;;  %v4381_v57 = vsel %vm4005_vm9, %v6571_v39, %v4244_v52 }
0x3238   :  { %v3842_v20 = vpop.permute.xlu0 %3841 }
0x3239   :  { %v3855_v29 = vrot.slane %v3842_v20, %v5700_v50  ;;  %v4143_v20 = vcombine.high %v4141_v6, %v4141_v6 }
0x323b   :  { %v4036_v19 = vsel %vm4035_vm15, %v6431_v62, %v3855_v29 }
0x323c   :  { %4040 = vst.msk [vmem:[#allocation5] sm:$0xff] %vm532_vm1, %v4036_v19  ;;  %v3845_v34 = vpop.permute.xlu0 %3844  ;;  %v4382_v19 = vsel %vm4005_vm9, %v4065_v0, %v4248_v61 }
0x323d   :  { %v3859_v17 = vrot.slane %v3845_v34, %v5700_v50  ;;  %v4118_v34 = vcombine.high %v4110_v9, %v4110_v9 }
0x323f   :  { %v4037_v5 = vsel %vm4035_vm15, %v6436_v49, %v3859_v17  ;;  %v3868_v62 = vsel %vm567_vm2, %v3859_v17, %v3855_v29  ;;  %v4199_v29 = vcombine.high %v4198_v27, %v4198_v27  ;;  %v4264_v17 = vrot.slane %v4110_v9, %v5392_v4 }
0x3240   :  { %4041 = vst.msk [vmem:[#allocation5 + $0x8] sm:$0xff] %vm532_vm1, %v4037_v5  ;;  %v3848_v56 = vpop.permute.xlu0 %3847 }
0x3241   :  { %v3863_v16 = vrot.slane %v3848_v56, %v5700_v50 }
0x3243   :  { %v4038_v53 = vsel %vm4035_vm15, %v6441_v25, %v3863_v16  ;;  %v3869_v3 = vsel %vm569_vm3, %v3863_v16, %v3868_v62  ;;  %v4142_v16 = vcombine.high %v4134_v10, %v4134_v10  ;;  %v4284_v62 = vrot.slane %v4134_v10, %v5392_v4 }
0x3244   :  { %4042 = vst.msk [vmem:[#allocation5 + $0x10] sm:$0xff] %vm532_vm1, %v4038_v53  ;;  %v3851_v30 = vpop.permute.xlu0 %3850  ;;  %v6596_v53 = vrot.slane %v4150_v1, %v5672_v42 }
0x3245   :  { %v3867_v37 = vrot.slane %v3851_v30, %v5700_v50  ;;  %v6599_v30 = vrot.slane %v4151_v2, %v5672_v42 }
0x3246   :  { %v4166_v35 = vcombine.high %v6596_v53, %v6596_v53 }
0x3247   :  { %v4039_v49 = vsel %vm4035_vm15, %v6449_v18, %v3867_v37  ;;  %v3870_v54 = vsel %vm571_vm4, %v3867_v37, %v3869_v3  ;;  %v6603_v37 = vrot.slane %v4174_v31, %v5672_v42  ;;  %v6606_v3 = vrot.slane %v4175_v51, %v5672_v42 }
0x3248   :  { %4043 = vst.msk [vmem:[#allocation5 + $0x18] sm:$0xff] %vm532_vm1, %v4039_v49  ;;  %v3873_v36 = vpop.permute.xlu0 %3872  ;;  %v4384_v49 = vsel %vm4005_vm9, %v4067_v46, %v4256_v38 }
0x3249   :  { %v3875_v28 = vsel %vm532_vm1, %v3870_v54, %v3873_v36  ;;  %v4288_v54 = vrot.slane %v4141_v6, %v5392_v4  ;;  %v4296_v36 = vrot.slane %v4143_v20, %v5392_v4  ;;  %v4190_v60 = vcombine.high %v6603_v37, %v6603_v37 }
0x324a   :  { %4861 = vmatmul.mubr.msk.f32.vlgmr.msra.gmra.mrb[14].mxu0 %vm759_vm6, %v3875_v28  ;;  %v6612_v28 = vrot.slane %v4198_v27, %v5672_v42 }
0x324c   :  { %v4214_v52 = vcombine.high %v6612_v28, %v6612_v28 }
0x331d   :  { %v3945_v25 = vpop.f32.mrb[14].mxu0 }
0x331e   :  { %v3946_v26 = vadd.f32 %v6465_v8, %v3945_v25  ;;  %v4862_v63 = vpop.f32.mrb[15].mxu0  ;;  %v6615_v25 = vrot.slane %v4199_v29, %v5672_v42 }
0x331f   :  { %v6618_v63 = vrot.slane %v4118_v34, %v5392_v4 }
0x3320   :  { %5222 = vtanh.f32 %v3946_v26  ;;  %v4486_v15 = vmul.f32 -1.442695, %v3946_v26  ;;  %v4215_v48 = vcombine.high %v6615_v25, %v6615_v25  ;;  %v4348_v27 = vrot.slane %v6615_v25, %v5392_v4 }
0x3322   :  { %5224 = vpow2.f32 %v4486_v15  ;;  %v4385_v15 = vsel %vm4010_vm10, %v4381_v57, %v4264_v17  ;;  %v4356_v61 = vrot.slane %v4215_v48, %v5392_v4 }
0x332a   :  { %v5223_v50 = vpop.eup %5222 }
0x332b   :  { %3958 = vrot.lane.b32.xlu1 %v5223_v50, %s5313_s15 }
0x332c   :  { %v5225_v18 = vpop.eup %5224 }
0x332d   :  { %v3952_v12 = vadd.f32 1.0, %v5225_v18 }
0x332f   :  { %5226 = vrcp.f32 %v3952_v12  ;;  %v6623_v12 = vrot.slane %v4142_v16, %v5392_v4 }
0x3339   :  { %v5227_v45 = vpop.eup %5226 }
0x333a   :  { %v3956_v7 = vmul.f32 %v5227_v45, %v6471_v43  ;;  %v4103_v43 = vcombine.high %v4102_v58, %v4102_v58  ;;  %v4344_v58 = vrot.slane %v6612_v28, %v5392_v4 }
0x333c   :  { %v4117_v11 = vrot.slane %v4103_v43, %v5672_v42  ;;  %v4308_v43 = vrot.slane %v6599_v30, %v5392_v4 }
0x333e   :  { %v4119_v41 = vcombine.high %v4117_v11, %v4117_v11  ;;  %v4268_v5 = vrot.slane %v4117_v11, %v5392_v4  ;;  %v4328_v11 = vrot.slane %v6606_v3, %v5392_v4 }
0x3340   :  { %v4276_v56 = vrot.slane %v4119_v41, %v5392_v4  ;;  %v4386_v18 = vsel %vm4010_vm10, %v4382_v19, %v4268_v5 }
0x3341   :  { %v4390_v59 = vsel %vm4015_vm11, %v4386_v18, %v4288_v54 }
0x339d   :  { %v3959_v24 = vpop.permute.xlu1 %3958 }
0x339e   :  { %v3961_v44 = vmul.f32 %v5227_v45, %v3959_v24  ;;  %v4167_v24 = vcombine.high %v6599_v30, %v6599_v30 }
0x33a0   :  { %3963 = vrot.lane.b32.xlu0 %v3961_v44, %s5314_s16  ;;  %v4304_v44 = vrot.slane %v6596_v53, %v5392_v4  ;;  %v4316_v21 = vrot.slane %v4167_v24, %v5392_v4 }
0x3412   :  { %v3964_v47 = vpop.permute.xlu0 %3963 }
0x3413   :  { %v3966_v32 = vadd.f32 %v3964_v47, %v3956_v7  ;;  %v4388_v7 = vsel %vm4010_vm10, %v4384_v49, %v4276_v56  ;;  %v4191_v47 = vcombine.high %v6606_v3, %v6606_v3 }
0x3414   :  { %v4392_v40 = vsel %vm4015_vm11, %v4388_v7, %v4296_v36 }
0x3415   :  { %5228 = vtanh.f32 %v3966_v32  ;;  %v4336_v55 = vrot.slane %v4191_v47, %v5392_v4 }
0x341f   :  { %v5229_v8 = vpop.eup %5228 }
0x3420   :  { %3969 = vrot.lane.b32.xlu0 %v5229_v8, %s5313_s15  ;;  %v4389_v8 = vsel %vm4015_vm11, %v4385_v15, %v4284_v62 }
0x3421   :  { %v4393_v1 = vsel %vm4020_vm12, %v4389_v8, %v4304_v44 }
0x3492   :  { %v3970_v26 = vpop.permute.xlu0 %3969 }
0x3493   :  { %v3972_v50 = vmul.f32 %v5227_v45, %v3970_v26  ;;  %v4324_v45 = vrot.slane %v6603_v37, %v5392_v4 }
0x3495   :  { %v4223_v32 = vrot.slane %v3972_v50, %v5672_v42  ;;  %v4397_v31 = vsel %vm4025_vm13, %v4393_v1, %v4324_v45 }
0x3496   :  { %v4401_v6 = vsel %vm4030_vm14, %v4397_v31, %v4344_v58 }
0x3497   :  { %v4224_v14 = vcombine.high %v4223_v32, %v4223_v32  ;;  %v4231_v23 = vrot.slane %v4223_v32, %v5672_v42 }
0x3499   :  { %v4238_v0 = vrot.slane %v4224_v14, %v5672_v42  ;;  %v4364_v22 = vrot.slane %v4231_v23, %v5392_v4 }
0x349a   :  { %5268 = shalt.err (!%p5265_p12)
}
0x349b   :  { %s5269_s25 = scalar_lea.hbm %s6737_s8, 512 }
0x349c   :  { %p5270_p13 = scmp.ne.s32.totalorder %s6737_s8, %s5269_s25  ;;  %p5273_p0 = scmp.lt.u32.totalorder %s5269_s25, %s6737_s8 }
0x349e   :  { %p5275_p1 = pnand %p5273_p0, %p5270_p13 }
0x34a0   :  { %5278 = shalt.err (!%p5275_p1)
}
0x34a1   :  { %s5317_s30 = smov 128   ;;  %s5318_s10 = smov 8   ;;  %v4239_v42 = vcombine.high %v4231_v23, %v4231_v23  ;;  %v4240_v9 = vcombine.high %v4238_v0, %v4238_v0  ;;  %v4405_v41 = vsel %vm4035_vm15, %v4401_v6, %v4364_v22  ;;  %v4368_v10 = vrot.slane %v4238_v0, %v5392_v4 }
0x34a2   :  { %4440 = dma.vmem_to_hbm [thread:$0]  %s4435_s23, 512, %s6737_s8, [#allocation4], %s5317_s30, %s5317_s30, %s5318_s10   ;;  %v4383_v2 = vsel %vm4005_vm9, %v4066_v13, %v6587_v33  ;;  %v4312_v46 = vrot.slane %v4166_v35, %v5392_v4  ;;  %v4394_v38 = vsel %vm4020_vm12, %v4390_v59, %v4308_v43  ;;  %v4396_v51 = vsel %vm4020_vm12, %v4392_v40, %v4316_v21 }
0x34a3   :  { %4413 = vrot.lane.b32.xlu0 %v4405_v41, %s5314_s16  ;;  %v4332_v57 = vrot.slane %v4190_v60, %v5392_v4  ;;  %v4398_v20 = vsel %vm4025_vm13, %v4394_v38, %v4328_v11  ;;  %v4376_v29 = vrot.slane %v4240_v9, %v5392_v4  ;;  %v4400_v19 = vsel %vm4025_vm13, %v4396_v51, %v4336_v55  ;;  %s5319_s8 = smov [#allocation6]  }
0x34a4   :  { %v4402_v39 = vsel %vm4030_vm14, %v4398_v20, %v4348_v27  ;;  %v4404_v13 = vsel %vm4030_vm14, %v4400_v19, %v4356_v61  ;;  %v4352_v33 = vrot.slane %v4214_v52, %v5392_v4  ;;  %v4387_v34 = vsel %vm4010_vm10, %v4383_v2, %v6618_v63  ;;  %s4446_s13 = sshll.u32 %s5319_s8, 4  ;;  %s4447_s13 = int_to_ptr.vmem [resolvable:$true] %s4446_s13 }
0x34a5   :  { %v4406_v17 = vsel %vm4035_vm15, %v4402_v39, %v4368_v10  ;;  %v4408_v5 = vsel %vm4035_vm15, %v4404_v13, %v4376_v29  ;;  %v4372_v56 = vrot.slane %v4239_v42, %v5392_v4  ;;  %v4391_v16 = vsel %vm4015_vm11, %v4387_v34, %v6623_v12  ;;  %s5279_s14 = scalar_lea.vmem %s4447_s13, 512  ;;  %p5284_p3 = scmp.lt.s32.totalorder %s4447_s13, %s4447_s13 }
0x34a6   :  { %4419 = vrot.lane.b32.xlu1 %v4408_v5, %s5314_s16  ;;  %v4395_v53 = vsel %vm4020_vm12, %v4391_v16, %v4312_v46  ;;  %p5280_p2 = scmp.ne.s32.totalorder %s4447_s13, %s5279_s14  ;;  %p5285_p4 = scmp.lt.s32.totalorder %s5279_s14, %s5279_s14 }
0x34a7   :  { %4415 = vrot.lane.b32.xlu0 %v4406_v17, %s5314_s16  ;;  %v4399_v30 = vsel %vm4025_vm13, %v4395_v53, %v4332_v57 }
0x34a8   :  { %v4403_v62 = vsel %vm4030_vm14, %v4399_v30, %v4352_v33  ;;  %p5286_p5 = por %p5285_p4, %p5284_p3 }
0x34a9   :  { %v4407_v37 = vsel %vm4035_vm15, %v4403_v62, %v4372_v56 }
0x34aa   :  { %p5287_p6 = pnand %p5286_p5, %p5280_p2 }
0x34ab   :  { %4417 = vrot.lane.b32.xlu0 %v4407_v37, %s5314_s16 }
0x3515   :  { %v4414_v3 = vpop.permute.xlu0 %4413 }
0x3516   :  { %4425 = vst.msk [vmem:[#allocation6] sm:$0xff] %vm861_vm7, %v4414_v3 }
0x3518   :  { %v4420_v49 = vpop.permute.xlu1 %4419 }
0x3519   :  { %v4416_v4 = vpop.permute.xlu0 %4415  ;;  %4428 = vst.msk [vmem:[#allocation6 + $0x18] sm:$0xff] %vm861_vm7, %v4420_v49 }
0x351a   :  { %4426 = vst.msk [vmem:[#allocation6 + $0x8] sm:$0xff] %vm861_vm7, %v4416_v4 }
0x351d   :  { %v4418_v54 = vpop.permute.xlu0 %4417 }
0x351e   :  { %4427 = vst.msk [vmem:[#allocation6 + $0x10] sm:$0xff] %vm861_vm7, %v4418_v54 }
0x351f   :  { %5290 = shalt.err (!%p5287_p6)
}
0x3520   :  { %s5291_s17 = scalar_lea.hbm %s6738_s9, 512 }
0x3521   :  { %p5292_p7 = scmp.ne.s32.totalorder %s6738_s9, %s5291_s17  ;;  %p5295_p8 = scmp.lt.u32.totalorder %s5291_s17, %s6738_s9 }
0x3523   :  { %p5297_p9 = pnand %p5295_p8, %p5292_p7 }
0x3525   :  { %5300 = shalt.err (!%p5297_p9)
}
0x3526   :  { %4452 = dma.vmem_to_hbm [thread:$0]  %s4447_s13, 512, %s6738_s9, [#allocation7], %s5317_s30, %s5317_s30, %s5318_s10  }
0x3527   :  { %5303 = dma.done.wait [#allocation4], 512  }
0x3528   :  { %5304 = vsyncadd [#allocation4], 4294966784 }
0x3529   :  { %5305 = dma.done.wait [#allocation7], 512  }
0x352a   :  { %5306 = vsyncadd [#allocation7], 4294966784 }
0x352b   :  { %4459 = vsyncpa [#allocation3], 1 }
0x352c   :  { %4460 = vsyncpa [#allocation4], 1 }
0x352d   :  { %4461 = vsyncpa [#allocation7], 1 }

</bundles_post_ra>
